<compile_context>
chip_gen: v5e
topology: v5e:2x2
jax: 0.10.0
libtpu: 0.0.40
codegen_flags: <defaults>
</compile_context>

<pallas_src>
import jax
import jax.numpy as jnp
from jax.experimental import pallas as pl
from jax.experimental.pallas import tpu as pltpu


def _gelu_tanh(x):
    # tanh-approximate GELU; tanh rides the EUP slot (nearly free vs. VALU).
    c0 = 0.7978845608028654   # sqrt(2/pi)
    c1 = 0.044715
    return 0.5 * x * (1.0 + jnp.tanh(c0 * (x + c1 * x * x * x)))


def _make_ffn_kernel(H, W):
    HW = H * W

    def kernel(x_ref, w1_ref, dw_ref, w2_ref, o_ref):
        M = x_ref.shape[0]                       # M = TB * H * W (static)

        # ---- 1x1 expansion (MXU, f32) + GELU ---------------------------------
        h1 = jnp.dot(x_ref[...], w1_ref[...],
                     preferred_element_type=jnp.float32)         # (M, Cm) f32
        h1 = _gelu_tanh(h1)

        # ---- depthwise 3x3, padding=1, on the flat (M, Cm) tensor ------------
        taps = dw_ref[...]                                       # (9, Cm) f32

        pos = jax.lax.broadcasted_iota(jnp.int32, (M, 1), 0)
        col = pos % W                  # column within the image row
        off_in_img = pos % HW          # flat offset within the image
        ok_l = col > 0                 # source column j-1 exists
        ok_r = col < (W - 1)           # source column j+1 exists
        ok_t = off_in_img >= W         # source row i-1 exists
        ok_b = off_in_img < (HW - W)   # source row i+1 exists

        # Column neighbours: sublane rolls (XLU) + border masks (VPU).
        # pltpu.roll requires non-negative shifts -> shift by M-1 for "j+1".
        s_c = h1
        s_l = jnp.where(ok_l, pltpu.roll(h1, shift=1, axis=0), 0.0)       # x[., j-1]
        s_r = jnp.where(ok_r, pltpu.roll(h1, shift=M - 1, axis=0), 0.0)   # x[., j+1]

        def tap(k):                    # (1, Cm) per-channel tap weight
            return taps[k:k + 1, :]

        # Per-kernel-row contributions evaluated at the *source* image row.
        r_top = s_l * tap(0) + s_c * tap(1) + s_r * tap(2)   # kh = 0
        r_mid = s_l * tap(3) + s_c * tap(4) + s_r * tap(5)   # kh = 1
        r_bot = s_l * tap(6) + s_c * tap(7) + s_r * tap(8)   # kh = 2

        # out[p] = r_mid[p] + r_top[p - W] + r_bot[p + W]   (zero off-image).
        acc = r_mid
        acc = acc + jnp.where(ok_t, pltpu.roll(r_top, shift=W, axis=0), 0.0)
        acc = acc + jnp.where(ok_b, pltpu.roll(r_bot, shift=M - W, axis=0), 0.0)
        h2 = _gelu_tanh(acc)

        # ---- 1x1 projection back to dim (MXU) --------------------------------
        out = jnp.dot(h2, w2_ref[...], preferred_element_type=jnp.float32)
        o_ref[...] = out.astype(o_ref.dtype)

    return kernel


def _pick_batch_tile(B, HW, Cm, vmem_budget_bytes=24 * 1024 * 1024):
    """Largest batch tile with >=2 (preferably even) grid steps under budget."""
    def fits(t):
        # ~8 live (M, Cm) f32 intermediates dominate per-step VMEM usage.
        return 8 * t * HW * Cm * 4 <= vmem_budget_bytes

    divs = [t for t in range(1, B + 1) if B % t == 0 and fits(t)]
    if not divs:
        divs = [1]
    multi = [t for t in divs if B // t >= 2]          # keep >= 2 grid steps
    if multi:
        even = [t for t in multi if (B // t) % 2 == 0]  # v7x: balance 2 TCs
        pool = even if even else multi
        return max(pool)
    return max(divs)


def feedforward_pallas(x, w1, dw, w2, *, batch_tile=None):
    """x: [B,H,W,C] f32; w1: [C, C*mult]; dw: [9, C*mult]; w2: [C*mult, C]."""
    B, H, W, C = x.shape
    Cm = w1.shape[1]
    HW = H * W

    if batch_tile is None:
        batch_tile = _pick_batch_tile(B, HW, Cm)
    TB = batch_tile
    assert B % TB == 0, "batch_tile must divide batch"
    M = TB * HW

    # Wrapper-side (free, contiguous) flatten: [B,H,W,C] -> [B*H*W, C].
    xf = x.reshape(B * HW, C)

    out = pl.pallas_call(
        _make_ffn_kernel(H, W),
        out_shape=jax.ShapeDtypeStruct((B * HW, C), x.dtype),
        grid_spec=pltpu.PrefetchScalarGridSpec(
            num_scalar_prefetch=0,
            grid=(B // TB,),
            in_specs=[
                pl.BlockSpec((M, C), lambda b: (b, 0)),
                pl.BlockSpec((C, Cm), lambda b: (0, 0)),
                pl.BlockSpec((9, Cm), lambda b: (0, 0)),
                pl.BlockSpec((Cm, C), lambda b: (0, 0)),
            ],
            out_specs=pl.BlockSpec((M, C), lambda b: (b, 0)),
        ),
        compiler_params=pltpu.CompilerParams(
            dimension_semantics=("parallel",),
            vmem_limit_bytes=32 * 1024 * 1024),
    )(xf, w1, dw, w2)
    return out.reshape(B, H, W, C)


def feedforward_ref(x, w1, dw, w2):
    """Plain-JAX f32 reference of the module's math (exact GELU as in PyTorch)."""
    H, W = x.shape[1], x.shape[2]
    h1 = jax.nn.gelu(jnp.einsum('bhwc,cm->bhwm', x, w1), approximate=False)
    hp = jnp.pad(h1, ((0, 0), (1, 1), (1, 1), (0, 0)))
    acc = jnp.zeros_like(h1)
    for kh in range(3):
        for kw in range(3):
            acc = acc + hp[:, kh:kh + H, kw:kw + W, :] * dw[kh * 3 + kw]
    h2 = jax.nn.gelu(acc, approximate=False)
    return jnp.einsum('bhwm,mc->bhwc', h2, w2)


if __name__ == "__main__":
    key = jax.random.PRNGKey(0)
    # FeedForward(dim=64) as used inside GST_block (conv_features=64), mult=4.
    B, H, W, dim, mult = 8, 8, 8, 64, 4
    Cm = dim * mult

    k1, k2, k3, k4 = jax.random.split(key, 4)
    x = jax.random.normal(k1, (B, H, W, dim), jnp.float32)
    # Synthetic weights in the kernel's layouts (transposed from PyTorch conv):
    #   conv1 weight [Cm, dim, 1, 1] -> w1 [dim, Cm]
    #   dw conv weight [Cm, 1, 3, 3] -> dw [9, Cm]   (tap-major, channel last)
    #   conv3 weight [dim, Cm, 1, 1] -> w2 [Cm, dim]
    w1 = jax.random.normal(k2, (dim, Cm), jnp.float32) * (1.0 / dim ** 0.5)
    dw = jax.random.normal(k3, (9, Cm), jnp.float32) * (1.0 / 3.0)
    w2 = jax.random.normal(k4, (Cm, dim), jnp.float32) * (1.0 / Cm ** 0.5)

    out = jax.jit(feedforward_pallas)(x, w1, dw, w2)
    jax.block_until_ready(out)

    ref = feedforward_ref(x, w1, dw, w2)
    assert out.shape == (B, H, W, dim)
    # tanh-approx GELU vs. the exact-erf reference (f32 matmuls otherwise).
    if not jnp.allclose(out, ref, rtol=2e-2, atol=2e-2):
        err = float(jnp.max(jnp.abs(out - ref)))
        raise AssertionError(
            f"Pallas output mismatches JAX reference (max |err| = {err})")
    print("KERNEL_OK")
</pallas_src>

<mosaic_0001>
module attributes {stable_mosaic.version = 11 : i64} {
  func.func @kernel(%arg0: i32, %arg1: memref<256x64xf32, #tpu.memory_space<vmem>>, %arg2: memref<64x256xf32, #tpu.memory_space<vmem>>, %arg3: memref<9x256xf32, #tpu.memory_space<vmem>>, %arg4: memref<256x64xf32, #tpu.memory_space<vmem>>, %arg5: memref<256x64xf32, #tpu.memory_space<vmem>>) attributes {dimension_semantics = [#tpu.dimension_semantics<parallel>], iteration_bounds = array<i64: 2>, scalar_prefetch = 0 : i64, scratch_operands = 0 : i64, tpu.core_type = #tpu.core_type<tc>, window_params = [{transform_indices = @transform_0, window_bounds = array<i64: 256, 64>}, {pipeline_mode = #tpu.pipeline_mode<synchronous>, transform_indices = @transform_1, window_bounds = array<i64: 64, 256>}, {pipeline_mode = #tpu.pipeline_mode<synchronous>, transform_indices = @transform_2, window_bounds = array<i64: 9, 256>}, {pipeline_mode = #tpu.pipeline_mode<synchronous>, transform_indices = @transform_3, window_bounds = array<i64: 256, 64>}, {transform_indices = @transform_4, window_bounds = array<i64: 256, 64>}]} {
    %c0 = arith.constant 0 : index
    %c0_0 = arith.constant 0 : index
    %0 = vector.load %arg1[%c0, %c0_0] : memref<256x64xf32, #tpu.memory_space<vmem>>, vector<256x64xf32>
    %c0_1 = arith.constant 0 : index
    %c0_2 = arith.constant 0 : index
    %1 = vector.load %arg2[%c0_1, %c0_2] : memref<64x256xf32, #tpu.memory_space<vmem>>, vector<64x256xf32>
    %cst = arith.constant dense<0.000000e+00> : vector<256x256xf32>
    %2 = tpu.matmul %0, %1, %cst {dimension_numbers = #tpu.dot_dimension_numbers<[1], [0], [0], [1], [0, 0, 1, 1], [], []>} : vector<256x64xf32>, vector<64x256xf32>, vector<256x256xf32> -> vector<256x256xf32>
    %cst_3 = arith.constant 5.000000e-01 : f32
    %3 = vector.broadcast %cst_3 : f32 to vector<256x256xf32>
    %4 = arith.mulf %3, %2 : vector<256x256xf32>
    %cst_4 = arith.constant 4.471500e-02 : f32
    %5 = vector.broadcast %cst_4 : f32 to vector<256x256xf32>
    %6 = arith.mulf %5, %2 : vector<256x256xf32>
    %7 = arith.mulf %6, %2 : vector<256x256xf32>
    %8 = arith.mulf %7, %2 : vector<256x256xf32>
    %9 = arith.addf %2, %8 : vector<256x256xf32>
    %cst_5 = arith.constant 0.797884583 : f32
    %10 = vector.broadcast %cst_5 : f32 to vector<256x256xf32>
    %11 = arith.mulf %10, %9 : vector<256x256xf32>
    %12 = math.tanh %11 : vector<256x256xf32>
    %cst_6 = arith.constant 1.000000e+00 : f32
    %13 = vector.broadcast %cst_6 : f32 to vector<256x256xf32>
    %14 = arith.addf %13, %12 : vector<256x256xf32>
    %15 = arith.mulf %4, %14 : vector<256x256xf32>
    %c0_7 = arith.constant 0 : index
    %c0_8 = arith.constant 0 : index
    %16 = vector.load %arg3[%c0_7, %c0_8] : memref<9x256xf32, #tpu.memory_space<vmem>>, vector<9x256xf32>
    %17 = tpu.iota {dimensions = array<i32: 0>} : vector<256x1xi32>
    %c8_i32 = arith.constant 8 : i32
    %c0_i32 = arith.constant 0 : i32
    %18 = arith.cmpi eq, %c8_i32, %c0_i32 : i32
    %c1_i32 = arith.constant 1 : i32
    %19 = arith.select %18, %c1_i32, %c8_i32 : i32
    %20 = vector.broadcast %19 : i32 to vector<256x1xi32>
    %21 = arith.remsi %17, %20 : vector<256x1xi32>
    %c0_i32_9 = arith.constant 0 : i32
    %22 = vector.broadcast %c0_i32_9 : i32 to vector<256x1xi32>
    %23 = arith.cmpi ne, %21, %22 : vector<256x1xi32>
    %c0_i32_10 = arith.constant 0 : i32
    %24 = vector.broadcast %c0_i32_10 : i32 to vector<256x1xi32>
    %25 = arith.cmpi slt, %21, %24 : vector<256x1xi32>
    %c0_i32_11 = arith.constant 0 : i32
    %26 = arith.cmpi slt, %19, %c0_i32_11 : i32
    %27 = vector.broadcast %26 : i1 to vector<256x1xi1>
    %28 = vector.broadcast %27 : vector<256x1xi1> to vector<256x1xi1>
    %29 = arith.xori %25, %28 : vector<256x1xi1>
    %30 = arith.andi %29, %23 : vector<256x1xi1>
    %31 = vector.broadcast %19 : i32 to vector<256x1xi32>
    %32 = arith.addi %21, %31 : vector<256x1xi32>
    %33 = arith.select %30, %32, %21 : vector<256x1xi1>, vector<256x1xi32>
    %c64_i32 = arith.constant 64 : i32
    %c0_i32_12 = arith.constant 0 : i32
    %34 = arith.cmpi eq, %c64_i32, %c0_i32_12 : i32
    %c1_i32_13 = arith.constant 1 : i32
    %35 = arith.select %34, %c1_i32_13, %c64_i32 : i32
    %36 = vector.broadcast %35 : i32 to vector<256x1xi32>
    %37 = arith.remsi %17, %36 : vector<256x1xi32>
    %c0_i32_14 = arith.constant 0 : i32
    %38 = vector.broadcast %c0_i32_14 : i32 to vector<256x1xi32>
    %39 = arith.cmpi ne, %37, %38 : vector<256x1xi32>
    %c0_i32_15 = arith.constant 0 : i32
    %40 = vector.broadcast %c0_i32_15 : i32 to vector<256x1xi32>
    %41 = arith.cmpi slt, %37, %40 : vector<256x1xi32>
    %c0_i32_16 = arith.constant 0 : i32
    %42 = arith.cmpi slt, %35, %c0_i32_16 : i32
    %43 = vector.broadcast %42 : i1 to vector<256x1xi1>
    %44 = vector.broadcast %43 : vector<256x1xi1> to vector<256x1xi1>
    %45 = arith.xori %41, %44 : vector<256x1xi1>
    %46 = arith.andi %45, %39 : vector<256x1xi1>
    %47 = vector.broadcast %35 : i32 to vector<256x1xi32>
    %48 = arith.addi %37, %47 : vector<256x1xi32>
    %49 = arith.select %46, %48, %37 : vector<256x1xi1>, vector<256x1xi32>
    %c0_i32_17 = arith.constant 0 : i32
    %50 = vector.broadcast %c0_i32_17 : i32 to vector<256x1xi32>
    %51 = arith.cmpi sgt, %33, %50 : vector<256x1xi32>
    %c7_i32 = arith.constant 7 : i32
    %52 = vector.broadcast %c7_i32 : i32 to vector<256x1xi32>
    %53 = arith.cmpi slt, %33, %52 : vector<256x1xi32>
    %c8_i32_18 = arith.constant 8 : i32
    %54 = vector.broadcast %c8_i32_18 : i32 to vector<256x1xi32>
    %55 = arith.cmpi sge, %49, %54 : vector<256x1xi32>
    %c56_i32 = arith.constant 56 : i32
    %56 = vector.broadcast %c56_i32 : i32 to vector<256x1xi32>
    %57 = arith.cmpi slt, %49, %56 : vector<256x1xi32>
    %c1_i32_19 = arith.constant 1 : i32
    %58 = tpu.dynamic_rotate %15 by %c1_i32_19 dim 0 : vector<256x256xf32>, i32 -> vector<256x256xf32>
    %cst_20 = arith.constant 0.000000e+00 : f32
    %59 = vector.shape_cast %51 : vector<256x1xi1> to vector<256x1xi1>
    %60 = vector.broadcast %59 : vector<256x1xi1> to vector<256x256xi1>
    %61 = vector.broadcast %cst_20 : f32 to vector<256x256xf32>
    %62 = arith.select %60, %58, %61 : vector<256x256xi1>, vector<256x256xf32>
    %c255_i32 = arith.constant 255 : i32
    %63 = tpu.dynamic_rotate %15 by %c255_i32 dim 0 : vector<256x256xf32>, i32 -> vector<256x256xf32>
    %cst_21 = arith.constant 0.000000e+00 : f32
    %64 = vector.shape_cast %53 : vector<256x1xi1> to vector<256x1xi1>
    %65 = vector.broadcast %64 : vector<256x1xi1> to vector<256x256xi1>
    %66 = vector.broadcast %cst_21 : f32 to vector<256x256xf32>
    %67 = arith.select %65, %63, %66 : vector<256x256xi1>, vector<256x256xf32>
    %68 = vector.extract_strided_slice %16 {offsets = [0, 0], sizes = [1, 256], strides = [1, 1]} : vector<9x256xf32> to vector<1x256xf32>
    %69 = vector.broadcast %68 : vector<1x256xf32> to vector<256x256xf32>
    %70 = arith.mulf %62, %69 : vector<256x256xf32>
    %71 = vector.extract_strided_slice %16 {offsets = [1, 0], sizes = [1, 256], strides = [1, 1]} : vector<9x256xf32> to vector<1x256xf32>
    %72 = vector.broadcast %71 : vector<1x256xf32> to vector<256x256xf32>
    %73 = arith.mulf %15, %72 : vector<256x256xf32>
    %74 = arith.addf %70, %73 : vector<256x256xf32>
    %75 = vector.extract_strided_slice %16 {offsets = [2, 0], sizes = [1, 256], strides = [1, 1]} : vector<9x256xf32> to vector<1x256xf32>
    %76 = vector.broadcast %75 : vector<1x256xf32> to vector<256x256xf32>
    %77 = arith.mulf %67, %76 : vector<256x256xf32>
    %78 = arith.addf %74, %77 : vector<256x256xf32>
    %79 = vector.extract_strided_slice %16 {offsets = [3, 0], sizes = [1, 256], strides = [1, 1]} : vector<9x256xf32> to vector<1x256xf32>
    %80 = vector.broadcast %79 : vector<1x256xf32> to vector<256x256xf32>
    %81 = arith.mulf %62, %80 : vector<256x256xf32>
    %82 = vector.extract_strided_slice %16 {offsets = [4, 0], sizes = [1, 256], strides = [1, 1]} : vector<9x256xf32> to vector<1x256xf32>
    %83 = vector.broadcast %82 : vector<1x256xf32> to vector<256x256xf32>
    %84 = arith.mulf %15, %83 : vector<256x256xf32>
    %85 = arith.addf %81, %84 : vector<256x256xf32>
    %86 = vector.extract_strided_slice %16 {offsets = [5, 0], sizes = [1, 256], strides = [1, 1]} : vector<9x256xf32> to vector<1x256xf32>
    %87 = vector.broadcast %86 : vector<1x256xf32> to vector<256x256xf32>
    %88 = arith.mulf %67, %87 : vector<256x256xf32>
    %89 = arith.addf %85, %88 : vector<256x256xf32>
    %90 = vector.extract_strided_slice %16 {offsets = [6, 0], sizes = [1, 256], strides = [1, 1]} : vector<9x256xf32> to vector<1x256xf32>
    %91 = vector.broadcast %90 : vector<1x256xf32> to vector<256x256xf32>
    %92 = arith.mulf %62, %91 : vector<256x256xf32>
    %93 = vector.extract_strided_slice %16 {offsets = [7, 0], sizes = [1, 256], strides = [1, 1]} : vector<9x256xf32> to vector<1x256xf32>
    %94 = vector.broadcast %93 : vector<1x256xf32> to vector<256x256xf32>
    %95 = arith.mulf %15, %94 : vector<256x256xf32>
    %96 = arith.addf %92, %95 : vector<256x256xf32>
    %97 = vector.extract_strided_slice %16 {offsets = [8, 0], sizes = [1, 256], strides = [1, 1]} : vector<9x256xf32> to vector<1x256xf32>
    %98 = vector.broadcast %97 : vector<1x256xf32> to vector<256x256xf32>
    %99 = arith.mulf %67, %98 : vector<256x256xf32>
    %100 = arith.addf %96, %99 : vector<256x256xf32>
    %c8_i32_22 = arith.constant 8 : i32
    %101 = tpu.dynamic_rotate %78 by %c8_i32_22 dim 0 : vector<256x256xf32>, i32 -> vector<256x256xf32>
    %cst_23 = arith.constant 0.000000e+00 : f32
    %102 = vector.shape_cast %55 : vector<256x1xi1> to vector<256x1xi1>
    %103 = vector.broadcast %102 : vector<256x1xi1> to vector<256x256xi1>
    %104 = vector.broadcast %cst_23 : f32 to vector<256x256xf32>
    %105 = arith.select %103, %101, %104 : vector<256x256xi1>, vector<256x256xf32>
    %106 = arith.addf %89, %105 : vector<256x256xf32>
    %c248_i32 = arith.constant 248 : i32
    %107 = tpu.dynamic_rotate %100 by %c248_i32 dim 0 : vector<256x256xf32>, i32 -> vector<256x256xf32>
    %cst_24 = arith.constant 0.000000e+00 : f32
    %108 = vector.shape_cast %57 : vector<256x1xi1> to vector<256x1xi1>
    %109 = vector.broadcast %108 : vector<256x1xi1> to vector<256x256xi1>
    %110 = vector.broadcast %cst_24 : f32 to vector<256x256xf32>
    %111 = arith.select %109, %107, %110 : vector<256x256xi1>, vector<256x256xf32>
    %112 = arith.addf %106, %111 : vector<256x256xf32>
    %cst_25 = arith.constant 5.000000e-01 : f32
    %113 = vector.broadcast %cst_25 : f32 to vector<256x256xf32>
    %114 = arith.mulf %113, %112 : vector<256x256xf32>
    %cst_26 = arith.constant 4.471500e-02 : f32
    %115 = vector.broadcast %cst_26 : f32 to vector<256x256xf32>
    %116 = arith.mulf %115, %112 : vector<256x256xf32>
    %117 = arith.mulf %116, %112 : vector<256x256xf32>
    %118 = arith.mulf %117, %112 : vector<256x256xf32>
    %119 = arith.addf %112, %118 : vector<256x256xf32>
    %cst_27 = arith.constant 0.797884583 : f32
    %120 = vector.broadcast %cst_27 : f32 to vector<256x256xf32>
    %121 = arith.mulf %120, %119 : vector<256x256xf32>
    %122 = math.tanh %121 : vector<256x256xf32>
    %cst_28 = arith.constant 1.000000e+00 : f32
    %123 = vector.broadcast %cst_28 : f32 to vector<256x256xf32>
    %124 = arith.addf %123, %122 : vector<256x256xf32>
    %125 = arith.mulf %114, %124 : vector<256x256xf32>
    %c0_29 = arith.constant 0 : index
    %c0_30 = arith.constant 0 : index
    %126 = vector.load %arg4[%c0_29, %c0_30] : memref<256x64xf32, #tpu.memory_space<vmem>>, vector<256x64xf32>
    %cst_31 = arith.constant dense<0.000000e+00> : vector<256x64xf32>
    %127 = tpu.matmul %125, %126, %cst_31 {dimension_numbers = #tpu.dot_dimension_numbers<[1], [0], [0], [1], [0, 0, 1, 1], [], []>} : vector<256x256xf32>, vector<256x64xf32>, vector<256x64xf32> -> vector<256x64xf32>
    %c0_32 = arith.constant 0 : index
    %c0_33 = arith.constant 0 : index
    %128 = vector.load %arg5[%c0_32, %c0_33] : memref<256x64xf32, #tpu.memory_space<vmem>>, vector<256x64xf32>
    tpu.vector_store %arg5[%c0_32, %c0_33], %127 {strides = array<i32>} : memref<256x64xf32, #tpu.memory_space<vmem>>, vector<256x64xf32>,
    return
  }
  func.func @transform_0(%arg0: i32) -> (i32, i32) {
    %c0_i32 = arith.constant 0 : i32
    %c0_i32_0 = arith.constant 0 : i32
    return %arg0, %c0_i32 : i32, i32
  }
  func.func @transform_1(%arg0: i32) -> (i32, i32) {
    %c0_i32 = arith.constant 0 : i32
    %c0_i32_0 = arith.constant 0 : i32
    %c0_i32_1 = arith.constant 0 : i32
    return %c0_i32, %c0_i32_0 : i32, i32
  }
  func.func @transform_2(%arg0: i32) -> (i32, i32) {
    %c0_i32 = arith.constant 0 : i32
    %c0_i32_0 = arith.constant 0 : i32
    %c0_i32_1 = arith.constant 0 : i32
    return %c0_i32, %c0_i32_0 : i32, i32
  }
  func.func @transform_3(%arg0: i32) -> (i32, i32) {
    %c0_i32 = arith.constant 0 : i32
    %c0_i32_0 = arith.constant 0 : i32
    %c0_i32_1 = arith.constant 0 : i32
    return %c0_i32, %c0_i32_0 : i32, i32
  }
  func.func @transform_4(%arg0: i32) -> (i32, i32) {
    %c0_i32 = arith.constant 0 : i32
    %c0_i32_0 = arith.constant 0 : i32
    return %arg0, %c0_i32 : i32, i32
  }
}

</mosaic_0001>

<bundles_post_ra>
// kernel: feedforward_pallas.1
= control target key start
LH: loop header
LB: loop body
LE: loop exit
PB: predicated region body
PF: predicated region fallthrough
CT: control target
= control target key end

     0   :  { %9 = vsyncpa [#allocation3], 0  ;;  %s9809_s0 = inlined_call_operand.hbm [shape: f32[512,64], index: 0, kind: input, shape index: {}]   ;;  %s9810_s1 = inlined_call_operand.vmem [shape: f32[64,256], index: 1, kind: input, shape index: {}]   ;;  %s9811_s2 = inlined_call_operand.vmem [shape: f32[9,256], index: 2, kind: input, shape index: {}]   ;;  %s9812_s3 = inlined_call_operand.vmem [shape: f32[256,64], index: 3, kind: input, shape index: {}]   ;;  %s9813_s4 = inlined_call_operand.hbm [shape: f32[512,64], index: 4, kind: output, shape index: {}]  }
   0x1   :  { %11 = vsyncpa [#allocation3 + $0x1], 0 }
   0x2   :  { %12 = vsyncpa [#allocation4], 0 }
   0x3   :  { %14 = vsyncpa [#allocation4 + $0x1], 0  ;;  %s5486_s15 = smov 0   ;;  %s5488_s16 = smov 0  }
   0x4   :  { %s5490_s17 = smov 0   ;;  %s5492_s18 = smov 0  }
   0x5 LB: > { %s5507_s19 = sadd.s32 4294967295, %s5455_s18   ;;  %s4931_s20 = sadd.s32 4294967294, %s5455_s18   ;;  %s5455_s18 = sphi %s5492_s18, %s10752_s18   ;;  %s5451_s17 = sphi %s5490_s17, %s10751_s17   ;;  %s5447_s16 = sphi %s5488_s16, %s10750_s16   ;;  %s5443_s15 = sphi %s5486_s15, %s10749_s15  }
   0x6   : > { %s5511_s21 = sadd.s32 1, %s5455_s18   ;;  %s27_s22 = sadd.s32 1, %s5451_s17 }
   0x7   : > { %s24_s23 = ssub.s32 %s5455_s18, %s5511_s21  ;;  %p34_p0 = scmp.ne.s32.totalorder %s5451_s17, %s5447_s16 }
   0x8   : > { %p25_p1 = scmp.eq.s32.totalorder %s24_s23, 0  ;;  %p35_p2 = scmp.eq.s32.totalorder %s5455_s18, 0 }
   0x9   : > { %p40_p3 = scmp.ne.s32.totalorder %s5447_s16, %s5443_s15  ;;  %p41_p4 = scmp.eq.s32.totalorder %s5507_s19, 0 }
   0xa   : > { %s5523_s24 = scalar_select %p25_p1, %s5451_s17, %s27_s22  }
   0xb   : > { %p5525_p5 = por %p35_p2, %p34_p0  ;;  %p5529_p6 = por %p41_p4, %p40_p3 }
   0xc   : > { %p127_p7 = scmp.eq.s32.totalorder %s5507_s19, 1  ;;  %p133_p8 = scmp.eq.s32.totalorder %s4931_s20, 1 }
   0xd   : > { %p5055_p10 = scmp.lt.s32.totalorder %s5455_s18, 2  ;;  %s162_s29 = sand.u32 1, %s5451_s17  }
   0xe   : > { %p5536_p11 = por %p127_p7, %p34_p0  ;;  %p5540_p12 = por %p133_p8, %p40_p3 }
   0xf   : > { %s5009_s30 = sshll.u32 %s5455_s18, 8  ;;  %s4934_s5 = sshll.u32 %s162_s29, 8 }
  0x10   : > { %s171_s8 = scalar_lea.hbm %s9809_s0, %s5009_s30  ;;  %s166_s10 = scalar_lea.vmem [#allocation2], %s4934_s5 }
  0x11   : > { %s172_s9 = sshll.u32 %s171_s8, 4  ;;  %s174_s11 = sshll.u32 %s166_s10, 4  ;;  %s173_s9 = int_to_ptr.hbm [resolvable:$true] %s172_s9  ;;  %s175_s11 = int_to_ptr.vmem [resolvable:$true] %s174_s11 }
  0x12   : > { %p5551_p13 = pnand %p5055_p10, %p5525_p5  ;;  %p4937_p0 = scmp.ge.s32.totalorder %s5455_s18, 1 }
  0x13   : > { %p182_p1 = scmp.lt.s32.totalorder %s5455_s18, 3  ;;  %s163_s13 = scalar_lea.sflag [#allocation3], %s162_s29 }
  0x14   : > { %s5359_s14 = sshra.s32 %s173_s9, 4  ;;  %p5363_p3 = pneg %p5551_p13  ;;  %s5360_s14 = int_to_ptr.hbm [resolvable:$true] %s5359_s14 }
  0x15   : > { %s5361_s20 = scalar_lea.hbm %s5360_s14, 256  ;;  %s5366_s25 = scalar_lea.hbm %s9809_s0, 512 }
  0x16   : > { %p5362_p2 = scmp.ne.s32.totalorder %s5360_s14, %s5361_s20  ;;  %p5367_p5 = scmp.lt.s32.totalorder %s5360_s14, %s9809_s0 }
  0x17   : > { %p5368_p8 = scmp.lt.s32.totalorder %s5366_s25, %s5361_s20 }
  0x18   : > { %p5364_p4 = pnand %p5363_p3, %p5362_p2 }
  0x19   : > { %p5369_p10 = por %p5368_p8, %p5367_p5 }
  0x1a   : > { %p5365_p7 = pneg %p5364_p4 }
  0x1c   : > { %p5370_p9 = pnand %p5369_p10, %p5365_p7 }
  0x1e   : > { %5373 = shalt.err (!%p5370_p9)
}
  0x1f   : > { %s5457_s29 = smov 128   ;;  %s5458_s6 = smov 8  }
  0x20   : > { %5050 = dma.hbm_to_vmem [thread:$0]  (!%p5551_p13), %s173_s9, 4096, %s175_s11, %s163_s13, %s5457_s29, %s5457_s29, %s5458_s6  }
  0x21   : > { %p183_p2 = pnand %p4937_p0, %p182_p1 }
  0x23   : > { %186 = sbr.rel (%p183_p2) target bundleno = 1076 (0x434), region = 36 }
  0x28   : > { %s5572_s7 = sand.u32 1, %s5447_s16  }
  0x29   : > { %s4938_s8 = sshll.u32 %s5572_s7, 8  ;;  %s189_s10 = scalar_lea.sflag [#allocation3], %s5572_s7 }
  0x2a   : > { %s5578_s14 = scalar_lea.vmem [#allocation2], %s4938_s8 }
  0x2b   : > { %5434 = dma.done.wait (%p5529_p6), %s189_s10, 4096  }
  0x2c   : > { %5436 = vsyncadd (%p5529_p6), %s189_s10, 4294963200  ;;  %v266_v0 = vld [vmem:[%s9810_s1 + $0x70] sm:$0xff]  ;;  %v267_v1 = vld [vmem:[%s9810_s1 + $0x78] sm:$0xff]  ;;  %vm268_vm0 = vcmask 523264   ;;  %v1171_v54 = vlaneseq  ;;  %s8620_s29 = scalar_lea.vmem [#allocation5], %s4938_s8  ;;  %s5010_s12 = sshll.u32 %s5507_s19, 8 }
  0x2d   : > { %v264_v2 = vld [vmem:[%s9810_s1 + $0x60] sm:$0xff]  ;;  %373 = vmatpush.msra.mxu0 %v266_v0  ;;  %486 = vmatpush.msra.mxu1 %v267_v1  ;;  %v265_v3 = vld [vmem:[%s9810_s1 + $0x68] sm:$0xff]  ;;  %v262_v4 = vld [vmem:[%s9810_s1 + $0x50] sm:$0xff]  ;;  %s4854_s22 = scalar_lea.hbm %s9813_s4, %s5010_s12  ;;  %s4855_s23 = sshll.u32 %s8620_s29, 4  ;;  %s4856_s23 = int_to_ptr.vmem [resolvable:$true] %s4855_s23 }
  0x2e   : > { %v263_v5 = vld [vmem:[%s9810_s1 + $0x58] sm:$0xff]  ;;  %v260_v6 = vld [vmem:[%s9810_s1 + $0x40] sm:$0xff]  ;;  %v261_v7 = vld [vmem:[%s9810_s1 + $0x48] sm:$0xff]  ;;  %s4857_s25 = sshll.u32 %s4854_s22, 4  ;;  %s4843_s26 = scalar_lea.sflag [#allocation4], %s5572_s7  ;;  %s4858_s25 = int_to_ptr.hbm [resolvable:$true] %s4857_s25 }
  0x2f   : > { %374 = vmatpush.msra.mxu0 %v264_v2  ;;  %487 = vmatpush.msra.mxu1 %v265_v3  ;;  %v258_v8 = vld [vmem:[%s9810_s1 + $0x30] sm:$0xff]  ;;  %v259_v9 = vld [vmem:[%s9810_s1 + $0x38] sm:$0xff]  ;;  %v256_v10 = vld [vmem:[%s9810_s1 + $0x20] sm:$0xff]  ;;  %s5403_s19 = sshra.s32 %s4858_s25, 4  ;;  %s5404_s19 = int_to_ptr.hbm [resolvable:$true] %s5403_s19 }
  0x30   : > { %v257_v11 = vld [vmem:[%s9810_s1 + $0x28] sm:$0xff]  ;;  %v254_v12 = vld [vmem:[%s9810_s1 + $0x10] sm:$0xff]  ;;  %v255_v13 = vld [vmem:[%s9810_s1 + $0x18] sm:$0xff]  ;;  %s5405_s30 = scalar_lea.hbm %s5404_s19, 256  ;;  %p5410_p0 = scmp.lt.s32.totalorder %s5404_s19, %s9813_s4 }
  0x31   : > { %375 = vmatpush.msra.mxu0 %v262_v4  ;;  %488 = vmatpush.msra.mxu1 %v263_v5  ;;  %v252_v14 = vld [vmem:[%s9810_s1] sm:$0xff]  ;;  %v253_v15 = vld [vmem:[%s9810_s1 + $0x8] sm:$0xff]  ;;  %v222_v18 = vld [vmem:[%s5578_s14 + $0x10] sm:$0xff]  ;;  %v5712_v4 = vshrl.u32 %v1171_v54, 7  ;;  %p5406_p6 = scmp.ne.s32.totalorder %s5404_s19, %s5405_s30 }
  0x32   : > { %v220_v16 = vld [vmem:[%s5578_s14] sm:$0xff]  ;;  %v221_v17 = vld [vmem:[%s5578_s14 + $0x8] sm:$0xff]  ;;  %v223_v19 = vld [vmem:[%s5578_s14 + $0x18] sm:$0xff] }
  0x33   : > { %376 = vmatpush.msra.mxu0 %v260_v6  ;;  %489 = vmatpush.msra.mxu1 %v261_v7  ;;  %v224_v20 = vld [vmem:[%s5578_s14 + $0x20] sm:$0xff]  ;;  %v225_v21 = vld [vmem:[%s5578_s14 + $0x28] sm:$0xff]  ;;  %v226_v22 = vld [vmem:[%s5578_s14 + $0x30] sm:$0xff]  ;;  %vm2164_vm1 = vcmp.lt.s32.totalorder %v5712_v4, 1  ;;  %vm2421_vm2 = vcmp.lt.s32.totalorder %v5712_v4, 7  ;;  %p5407_p9 = pnand %p5406_p6, %p5536_p11 }
  0x34   : > { %v227_v23 = vld [vmem:[%s5578_s14 + $0x38] sm:$0xff]  ;;  %v228_v24 = vld [vmem:[%s5578_s14 + $0x40] sm:$0xff]  ;;  %v229_v25 = vld [vmem:[%s5578_s14 + $0x48] sm:$0xff] }
  0x35   : > { %377 = vmatpush.msra.mxu0 %v258_v8  ;;  %490 = vmatpush.msra.mxu1 %v259_v9  ;;  %v230_v26 = vld [vmem:[%s5578_s14 + $0x50] sm:$0xff]  ;;  %v231_v27 = vld [vmem:[%s5578_s14 + $0x58] sm:$0xff]  ;;  %v232_v28 = vld [vmem:[%s5578_s14 + $0x60] sm:$0xff]  ;;  %p5408_p13 = pneg %p5407_p9 }
  0x36   : > { %v233_v29 = vld [vmem:[%s5578_s14 + $0x68] sm:$0xff]  ;;  %v234_v30 = vld [vmem:[%s5578_s14 + $0x70] sm:$0xff]  ;;  %v235_v31 = vld [vmem:[%s5578_s14 + $0x78] sm:$0xff] }
  0x37   : > { %378 = vmatpush.msra.mxu0 %v256_v10  ;;  %491 = vmatpush.msra.mxu1 %v257_v11  ;;  %v236_v34 = vld [vmem:[%s5578_s14 + $0x80] sm:$0xff]  ;;  %v237_v45 = vld [vmem:[%s5578_s14 + $0x88] sm:$0xff]  ;;  %v238_v61 = vld [vmem:[%s5578_s14 + $0x90] sm:$0xff] }
  0x38   : > { %v5689_v52 = vld [vmem:[%s9811_s2] sm:$0xff]  ;;  %v5694_v56 = vld [vmem:[%s9811_s2 + $0x8] sm:$0xff] }
  0x39   : > { %379 = vmatpush.msra.mxu0 %v254_v12  ;;  %492 = vmatpush.msra.mxu1 %v255_v13  ;;  %v5702_v62 = vperm.slane %v5689_v52, 1  ;;  %v5705_v63 = vperm.slane %v5689_v52, 4  ;;  %v5710_v2 = vperm.slane %v5694_v56, 1  ;;  %v5715_v6 = vperm.slane %v5694_v56, 4 }
  0x3a   : > { %v5718_v7 = vperm.slane %v5689_v52, 7  ;;  %v5725_v13 = vperm.slane %v5694_v56, 7 }
  0x3b   : > { %380 = vmatpush.msra.mxu0 %v252_v14  ;;  %493 = vmatpush.msra.mxu1 %v253_v15  ;;  %9974 = vst [vmem:[#allocation8_spill] sm:$0xff] %v5702_v62 }
  0x3c   : > { %4940 = vmatmul.msk.f32.vlgmr.msra.gmra.mxu0 %vm268_vm0, %v220_v16  ;;  %4972 = vmatmul.msk.f32.vlgmr.msra.gmra.mxu1 %vm268_vm0, %v220_v16 }
  0x44   : > { %4941 = vmatmul.msk.f32.gmra.mxu0 %vm268_vm0, %v221_v17  ;;  %4973 = vmatmul.msk.f32.gmra.mxu1 %vm268_vm0, %v221_v17  ;;  %v5730_v17 = vperm.slane %v5689_v52, 3 }
  0x46   : > { %9975 = vst [vmem:[#allocation9_spill] sm:$0xff] %v5730_v17 }
  0x4c   : > { %4942 = vmatmul.msk.f32.gmra.mxu0 %vm268_vm0, %v222_v18  ;;  %4974 = vmatmul.msk.f32.gmra.mxu1 %vm268_vm0, %v222_v18  ;;  %v5733_v18 = vperm.slane %v5689_v52, 5 }
  0x54   : > { %4943 = vmatmul.msk.f32.gmra.mxu0 %vm268_vm0, %v223_v19  ;;  %4975 = vmatmul.msk.f32.gmra.mxu1 %vm268_vm0, %v223_v19  ;;  %v5736_v19 = vperm.slane %v5694_v56, 3 }
  0x5c   : > { %4944 = vmatmul.msk.f32.gmra.mxu0 %vm268_vm0, %v224_v20  ;;  %4976 = vmatmul.msk.f32.gmra.mxu1 %vm268_vm0, %v224_v20  ;;  %v5739_v20 = vperm.slane %v5694_v56, 5 }
  0x5e   : > { %9976 = vst [vmem:[#allocation10_spill] sm:$0xff] %v5739_v20 }
  0x64   : > { %4945 = vmatmul.msk.f32.gmra.mxu0 %vm268_vm0, %v225_v21  ;;  %4977 = vmatmul.msk.f32.gmra.mxu1 %vm268_vm0, %v225_v21  ;;  %v5742_v21 = vadd.s32 8, %v5712_v4 }
  0x6c   : > { %4946 = vmatmul.msk.f32.gmra.mxu0 %vm268_vm0, %v226_v22  ;;  %4978 = vmatmul.msk.f32.gmra.mxu1 %vm268_vm0, %v226_v22 }
  0x74   : > { %4947 = vmatmul.msk.f32.gmra.mxu0 %vm268_vm0, %v227_v23  ;;  %4979 = vmatmul.msk.f32.gmra.mxu1 %vm268_vm0, %v227_v23  ;;  %v5745_v23 = vperm.slane %v5689_v52, 0 }
  0x7c   : > { %4948 = vmatmul.msk.f32.gmra.mxu0 %vm268_vm0, %v228_v24  ;;  %4980 = vmatmul.msk.f32.gmra.mxu1 %vm268_vm0, %v228_v24  ;;  %v5748_v24 = vperm.slane %v5694_v56, 0 }
  0x7e   : > { %9977 = vst [vmem:[#allocation11_spill] sm:$0xff] %v5748_v24 }
  0x84   : > { %4949 = vmatmul.msk.f32.gmra.mxu0 %vm268_vm0, %v229_v25  ;;  %4981 = vmatmul.msk.f32.gmra.mxu1 %vm268_vm0, %v229_v25  ;;  %v9817_v25 = vand.u32 7, %v5712_v4 }
  0x86   : > { %vm5798_vm4 = vcmp.lt.s32.totalorder %v9817_v25, 7 }
  0x8c   : > { %4950 = vmatmul.msk.f32.gmra.mxu0 %vm268_vm0, %v230_v26  ;;  %4982 = vmatmul.msk.f32.gmra.mxu1 %vm268_vm0, %v230_v26 }
  0x94   : > { %4951 = vmatmul.msk.f32.gmra.mxu0 %vm268_vm0, %v231_v27  ;;  %4983 = vmatmul.msk.f32.gmra.mxu1 %vm268_vm0, %v231_v27 }
  0x9c   : > { %4952 = vmatmul.msk.f32.gmra.mxu0 %vm268_vm0, %v232_v28  ;;  %4984 = vmatmul.msk.f32.gmra.mxu1 %vm268_vm0, %v232_v28 }
  0xa4   : > { %4953 = vmatmul.msk.f32.gmra.mxu0 %vm268_vm0, %v233_v29  ;;  %4985 = vmatmul.msk.f32.gmra.mxu1 %vm268_vm0, %v233_v29 }
  0xac   : > { %4954 = vmatmul.msk.f32.gmra.mxu0 %vm268_vm0, %v234_v30  ;;  %4986 = vmatmul.msk.f32.gmra.mxu1 %vm268_vm0, %v234_v30 }
  0xb4   : > { %4955 = vmatmul.msk.f32.gmra.mxu0 %vm268_vm0, %v235_v31  ;;  %4987 = vmatmul.msk.f32.gmra.mxu1 %vm268_vm0, %v235_v31 }
  0xb9   : > { %v382_v32 = vpop.f32.mrf.mxu0  ;;  %v495_v33 = vpop.f32.mrf.mxu1 }
  0xba   : > { %v655_v35 = vmul.f32 0.044715, %v382_v32  ;;  %v656_v36 = vmul.f32 0.044715, %v495_v33  ;;  %v591_v11 = vmul.f32 0.5, %v382_v32  ;;  %v592_v12 = vmul.f32 0.5, %v495_v33 }
  0xbc   : > { %v719_v37 = vmul.f32 %v655_v35, %v382_v32  ;;  %v720_v38 = vmul.f32 %v656_v36, %v495_v33  ;;  %4956 = vmatmul.msk.f32.gmra.mxu0 %vm268_vm0, %v236_v34  ;;  %4988 = vmatmul.msk.f32.gmra.mxu1 %vm268_vm0, %v236_v34  ;;  %v5762_v36 = vperm.slane %v5689_v52, 6 }
  0xbe   : > { %v783_v39 = vmul.f32 %v719_v37, %v382_v32  ;;  %v784_v40 = vmul.f32 %v720_v38, %v495_v33  ;;  %9978 = vst [vmem:[#allocation12_spill] sm:$0xff] %v5762_v36 }
  0xc0   : > { %v847_v41 = vadd.f32 %v783_v39, %v382_v32  ;;  %v848_v42 = vadd.f32 %v784_v40, %v495_v33  ;;  %v239_v32 = vld [vmem:[%s5578_s14 + $0x98] sm:$0xff]  ;;  %v1215_v40 = vand.u32 7, %v5742_v21 }
  0xc1   : > { %v385_v43 = vpop.f32.mrf.mxu0  ;;  %v498_v44 = vpop.f32.mrf.mxu1 }
  0xc2   : > { %v911_v46 = vmul.f32 0.7978846, %v847_v41  ;;  %v657_v47 = vmul.f32 0.044715, %v385_v43  ;;  %v658_v48 = vmul.f32 0.044715, %v498_v44 }
  0xc3   : > { %v912_v49 = vmul.f32 0.7978846, %v848_v42  ;;  %v593_v27 = vmul.f32 0.5, %v385_v43  ;;  %v594_v33 = vmul.f32 0.5, %v498_v44  ;;  %v5766_v41 = vadd.s32 16, %v5712_v4 }
  0xc4   : > { %4957 = vmatmul.msk.f32.gmra.mxu0 %vm268_vm0, %v237_v45  ;;  %4989 = vmatmul.msk.f32.gmra.mxu1 %vm268_vm0, %v237_v45  ;;  %v721_v50 = vmul.f32 %v657_v47, %v385_v43  ;;  %v722_v51 = vmul.f32 %v658_v48, %v498_v44  ;;  %5095 = vtanh.f32 %v911_v46  ;;  %vm5786_vm3 = vcmp.gt.s32.totalorder %v1215_v40, 0 }
  0xc5   : > { %5097 = vtanh.f32 %v912_v49  ;;  %v5778_v49 = vperm.slane %v5694_v56, 6  ;;  %vm5827_vm5 = vcmp.lt.s32.totalorder %v1215_v40, 7 }
  0xc6   : > { %v785_v53 = vmul.f32 %v721_v50, %v385_v43  ;;  %v786_v55 = vmul.f32 %v722_v51, %v498_v44 }
  0xc7   : > { %9981 = vst [vmem:[#allocation15_spill] sm:$0xff] %v5778_v49 }
  0xc8   : > { %v849_v57 = vadd.f32 %v785_v53, %v385_v43  ;;  %v850_v58 = vadd.f32 %v786_v55, %v498_v44 }
  0xc9   : > { %v5696_v59 = vpop.f32.mrf.mxu0  ;;  %v5698_v60 = vpop.f32.mrf.mxu1 }
  0xca   : > { %v659_v0 = vmul.f32 0.044715, %v5696_v59  ;;  %v660_v1 = vmul.f32 0.044715, %v5698_v60  ;;  %v913_v3 = vmul.f32 0.7978846, %v849_v57  ;;  %v5096_v10 = vpop.eup %5095 }
  0xcb   : > { %v914_v5 = vmul.f32 0.7978846, %v850_v58  ;;  %v5098_v14 = vpop.eup %5097  ;;  %v1039_v22 = vadd.f32 1.0, %v5096_v10  ;;  %v595_v54 = vmul.f32 0.5, %v5696_v59  ;;  %v596_v55 = vmul.f32 0.5, %v5698_v60 }
  0xcc   : > { %v723_v8 = vmul.f32 %v659_v0, %v5696_v59  ;;  %v724_v9 = vmul.f32 %v660_v1, %v5698_v60  ;;  %4958 = vmatmul.msk.f32.gmra.mxu0 %vm268_vm0, %v238_v61  ;;  %4990 = vmatmul.msk.f32.gmra.mxu1 %vm268_vm0, %v238_v61  ;;  %5099 = vtanh.f32 %v913_v3  ;;  %v1040_v26 = vadd.f32 1.0, %v5098_v14 }
  0xcd   : > { %5101 = vtanh.f32 %v914_v5  ;;  %v5768_v43 = vmul.f32 %v1039_v22, %v591_v11  ;;  %v5791_v58 = vperm.slane %v5689_v52, 2  ;;  %v240_v11 = vld [vmem:[%s5578_s14 + $0xa0] sm:$0xff] }
  0xce   : > { %v787_v15 = vmul.f32 %v723_v8, %v5696_v59  ;;  %v788_v16 = vmul.f32 %v724_v9, %v5698_v60  ;;  %v5774_v47 = vmul.f32 %v1040_v26, %v592_v12 }
  0xcf   : > { %9979 = vst [vmem:[#allocation13_spill] sm:$0xff] %v5768_v43  ;;  %v9816_v61 = vrot.slane %v5768_v43, 7  ;;  %v5806_v52 = vmul.f32 %v5702_v62, %v5768_v43  ;;  %v5810_v5 = vmul.f32 %v5705_v63, %v5768_v43 }
  0xd0   : > { %v851_v28 = vadd.f32 %v787_v15, %v5696_v59  ;;  %v852_v29 = vadd.f32 %v788_v16, %v5698_v60  ;;  %9980 = vst [vmem:[#allocation14_spill] sm:$0xff] %v5774_v47  ;;  %v9822_v59 = vand.u32 7, %v5766_v41  ;;  %v9814_v60 = vrot.slane %v5768_v43, 1 }
  0xd1   : > { %v5754_v30 = vpop.f32.mrf.mxu0  ;;  %v5756_v31 = vpop.f32.mrf.mxu1  ;;  %9984 = vst [vmem:[#allocation16_spill] sm:$0xff] %v5791_v58  ;;  %v9815_v12 = vrot.slane %v5774_v47, 7  ;;  %v9823_v22 = vrot.slane %v5774_v47, 1 }
  0xd2   : > { %v661_v34 = vmul.f32 0.044715, %v5754_v30  ;;  %v662_v35 = vmul.f32 0.044715, %v5756_v31  ;;  %v5100_v37 = vpop.eup %5099  ;;  %v915_v38 = vmul.f32 0.7978846, %v851_v28 }
  0xd3   : > { %v916_v39 = vmul.f32 0.7978846, %v852_v29  ;;  %v5102_v42 = vpop.eup %5101  ;;  %v1041_v45 = vadd.f32 1.0, %v5100_v37  ;;  %9987 = vst [vmem:[#allocation17_spill] sm:$0xff] %v5806_v52  ;;  %v5833_v37 = vmul.f32 %v5710_v2, %v5774_v47  ;;  %vm5912_vm6 = vcmp.gt.s32.totalorder %v9822_v59, 0 }
  0xd4   : > { %v725_v44 = vmul.f32 %v661_v34, %v5754_v30  ;;  %v726_v46 = vmul.f32 %v662_v35, %v5756_v31  ;;  %4959 = vmatmul.msk.f32.gmra.mxu0 %vm268_vm0, %v239_v32  ;;  %4991 = vmatmul.msk.f32.gmra.mxu1 %vm268_vm0, %v239_v32  ;;  %v1042_v48 = vadd.f32 1.0, %v5102_v42  ;;  %5103 = vtanh.f32 %v915_v38  ;;  %9988 = vst [vmem:[#allocation18_spill] sm:$0xff] %v5810_v5 }
  0xd5   : > { %v5780_v50 = vmul.f32 %v1041_v45, %v593_v27  ;;  %5105 = vtanh.f32 %v916_v39  ;;  %9991 = vst [vmem:[#allocation19_spill] sm:$0xff] %v5833_v37  ;;  %v5837_v38 = vmul.f32 %v5715_v6, %v5774_v47 }
  0xd6   : > { %v789_v51 = vmul.f32 %v725_v44, %v5754_v30  ;;  %v790_v53 = vmul.f32 %v726_v46, %v5756_v31  ;;  %v5815_v14 = vmul.f32 %v1042_v48, %v594_v33  ;;  %v597_v46 = vmul.f32 0.5, %v5754_v30 }
  0xd7   : > { %v9821_v0 = vrot.slane %v5780_v50, 7  ;;  %v2359_v26 = vrot.slane %v5780_v50, 1  ;;  %9992 = vst [vmem:[#allocation20_spill] sm:$0xff] %v5837_v38  ;;  %v598_v48 = vmul.f32 0.5, %v5756_v31 }
  0xd8   : > { %v853_v1 = vadd.f32 %v789_v51, %v5754_v30  ;;  %v854_v8 = vadd.f32 %v790_v53, %v5756_v31  ;;  %v9818_v45 = vrot.slane %v5815_v14, 7  ;;  %v3336_v30 = vmul.f32 %v5718_v7, %v5780_v50 }
  0xd9   : > { %v394_v9 = vpop.f32.mrf.mxu0  ;;  %v507_v10 = vpop.f32.mrf.mxu1  ;;  %v2225_v32 = vsel %vm2164_vm1, %v9816_v61, %v9821_v0  ;;  %v2360_v31 = vrot.slane %v5815_v14, 1 }
  0xda   : > { %v917_v15 = vmul.f32 0.7978846, %v853_v1  ;;  %v663_v16 = vmul.f32 0.044715, %v394_v9  ;;  %v5104_v21 = vpop.eup %5103  ;;  %v918_v27 = vmul.f32 0.7978846, %v854_v8 }
  0xdb   : > { %v664_v28 = vmul.f32 0.044715, %v507_v10  ;;  %v5106_v29 = vpop.eup %5105  ;;  %v1043_v34 = vadd.f32 1.0, %v5104_v21  ;;  %v5846_v53 = vsel %vm5786_vm3, %v2225_v32, 0.0  ;;  %v5870_v32 = vmul.f32 %v5725_v13, %v5815_v14 }
  0xdc   : > { %5107 = vtanh.f32 %v917_v15  ;;  %v727_v33 = vmul.f32 %v663_v16, %v394_v9  ;;  %4960 = vmatmul.msk.f32.gmra.mxu0 %vm268_vm0, %v240_v11  ;;  %4992 = vmatmul.msk.f32.gmra.mxu1 %vm268_vm0, %v240_v11  ;;  %v1044_v39 = vadd.f32 1.0, %v5106_v29  ;;  %v2226_v29 = vsel %vm2164_vm1, %v9815_v12, %v9818_v45 }
  0xdd   : > { %v728_v42 = vmul.f32 %v664_v28, %v507_v10  ;;  %v5840_v44 = vmul.f32 %v1043_v34, %v595_v54  ;;  %5109 = vtanh.f32 %v918_v27  ;;  %v2482_v54 = vsel %vm2421_vm2, %v9814_v60, %v2359_v26  ;;  %v241_v27 = vld [vmem:[%s5578_s14 + $0xa8] sm:$0xff] }
  0xde   : > { %v791_v40 = vmul.f32 %v727_v33, %v394_v9  ;;  %v5849_v8 = vmul.f32 %v1044_v39, %v596_v55  ;;  %v5860_v28 = vperm.slane %v5694_v56, 2  ;;  %v5874_v56 = vsel %vm5798_vm4, %v2482_v54, 0.0 }
  0xdf   : > { %v792_v51 = vmul.f32 %v728_v42, %v507_v10  ;;  %v9819_v1 = vrot.slane %v5840_v44, 1  ;;  %v599_v54 = vmul.f32 0.5, %v394_v9  ;;  %v5885_v25 = vmul.f32 0.5, %v507_v10 }
  0xe0   : > { %v855_v11 = vadd.f32 %v791_v40, %v394_v9  ;;  %v3270_v40 = vmul.f32 %v5762_v36, %v5846_v53  ;;  %v9820_v60 = vrot.slane %v5849_v8, 1  ;;  %v3339_v24 = vmul.f32 %v5725_v13, %v5849_v8 }
  0xe1   : > { %v856_v15 = vadd.f32 %v792_v51, %v507_v10  ;;  %v397_v16 = vpop.f32.mrf.mxu0  ;;  %v510_v21 = vpop.f32.mrf.mxu1 }
  0xe2   : > { %v5108_v55 = vpop.eup %5107  ;;  %v919_v34 = vmul.f32 0.7978846, %v855_v11  ;;  %v665_v33 = vmul.f32 0.044715, %v397_v16  ;;  %v666_v42 = vmul.f32 0.044715, %v510_v21  ;;  %v2480_v11 = vsel %vm2421_vm2, %v2359_v26, %v9819_v1 }
  0xe3   : > { %v920_v39 = vmul.f32 0.7978846, %v856_v15  ;;  %v5110_v51 = vpop.eup %5109  ;;  %v1045_v15 = vadd.f32 1.0, %v5108_v55  ;;  %v5898_v26 = vsel %vm5786_vm3, %v2226_v29, 0.0  ;;  %v2481_v57 = vsel %vm2421_vm2, %v2360_v31, %v9820_v60 }
  0xe4   : > { %5111 = vtanh.f32 %v919_v34  ;;  %v729_v12 = vmul.f32 %v665_v33, %v397_v16  ;;  %4961 = vmatmul.msk.f32.gmra.mxu0 %vm268_vm0, %v241_v27  ;;  %4993 = vmatmul.msk.f32.gmra.mxu1 %vm268_vm0, %v241_v27  ;;  %v730_v61 = vmul.f32 %v666_v42, %v510_v21  ;;  %v5889_v34 = vmul.f32 %v5733_v18, %v5874_v56  ;;  %v5894_v27 = vld [vmem:[%s9811_s2 + $0x10] ss:$0 sm:$0xff] }
  0xe5   : > { %5113 = vtanh.f32 %v920_v39  ;;  %v1046_v55 = vadd.f32 1.0, %v5110_v51  ;;  %v3400_v42 = vadd.f32 %v3336_v30, %v3270_v40  ;;  %v5918_v51 = vmul.f32 0.5, %v397_v16  ;;  %v5928_v40 = vld [vmem:[%s9811_s2 + $0x18] ss:$0 sm:$0xff] }
  0xe6   : > { %v793_v45 = vmul.f32 %v729_v12, %v397_v16  ;;  %9993 = vst [vmem:[#allocation21_spill] sm:$0xff] %v5889_v34  ;;  %v794_v10 = vmul.f32 %v730_v61, %v510_v21  ;;  %v5903_v12 = vsel %vm5827_vm5, %v2480_v11, 0.0  ;;  %v5916_v61 = vmul.f32 %v1045_v15, %v597_v46 }
  0xe7   : > { %v2483_v30 = vsel %vm2421_vm2, %v9823_v22, %v2360_v31  ;;  %9996 = vst [vmem:[#allocation22_spill] sm:$0xff] %v5928_v40  ;;  %v5930_v46 = vmul.f32 0.5, %v510_v21  ;;  %v3466_v15 = vmul.f32 %v5894_v27, %v5903_v12  ;;  %v5934_v9 = vmul.f32 %v1046_v55, %v598_v48 }
  0xe8   : > { %v857_v39 = vadd.f32 %v793_v45, %v397_v16  ;;  %v858_v11 = vadd.f32 %v794_v10, %v510_v21  ;;  %v242_v45 = vld [vmem:[%s5578_s14 + $0xb0] sm:$0xff]  ;;  %v5938_v31 = vsel %vm5827_vm5, %v2481_v57, 0.0  ;;  %v5944_v21 = vsel %vm5798_vm4, %v2483_v30, 0.0 }
  0xe9   : > { %v400_v1 = vpop.f32.mrf.mxu0  ;;  %v513_v33 = vpop.f32.mrf.mxu1  ;;  %v3271_v48 = vmul.f32 %v5778_v49, %v5898_v26  ;;  %v9997_v55 = vand.u32 7, %v5766_v41  ;;  %v3467_v30 = vmul.f32 %v5928_v40, %v5938_v31  ;;  %v5960_v38 = vadd.f32 %v3466_v15, %v3400_v42  ;;  %v243_v41 = vld [vmem:[%s5578_s14 + $0xb8] sm:$0xff] }
  0xea   : > { %v5112_v60 = vpop.eup %5111  ;;  %v921_v0 = vmul.f32 0.7978846, %v857_v39  ;;  %v667_v16 = vmul.f32 0.044715, %v400_v1  ;;  %v922_v59 = vmul.f32 0.7978846, %v858_v11  ;;  %v3141_v39 = vmul.f32 %v5739_v20, %v5938_v31 }
  0xeb   : > { %v5114_v10 = vpop.eup %5113  ;;  %v668_v37 = vmul.f32 0.044715, %v513_v33  ;;  %vm5950_vm7 = vcmp.lt.s32.totalorder %v9997_v55, 7  ;;  %v1047_v35 = vadd.f32 1.0, %v5112_v60  ;;  %10000 = vst [vmem:[#allocation23_spill] sm:$0xff] %v5960_v38  ;;  %v3401_v60 = vadd.f32 %v5870_v32, %v3271_v48 }
  0xec   : > { %5115 = vtanh.f32 %v921_v0  ;;  %v731_v22 = vmul.f32 %v667_v16, %v400_v1  ;;  %4962 = vmatmul.msk.f32.gmra.mxu0 %vm268_vm0, %v242_v45  ;;  %4994 = vmatmul.msk.f32.gmra.mxu1 %vm268_vm0, %v242_v45  ;;  %v1048_v45 = vadd.f32 1.0, %v5114_v10  ;;  %v5975_v0 = vmul.f32 0.5, %v400_v1 }
  0xed   : > { %5117 = vtanh.f32 %v922_v59  ;;  %v732_v57 = vmul.f32 %v668_v37, %v513_v33  ;;  %v5964_v59 = vmul.f32 %v5739_v20, %v5944_v21  ;;  %v10003_v37 = vrot.slane %v5780_v50, 7 }
  0xee   : > { %v795_v3 = vmul.f32 %v731_v22, %v400_v1  ;;  %v10002_v22 = vrot.slane %v5840_v44, 7  ;;  %v5973_v16 = vmul.f32 %v1047_v35, %v599_v54  ;;  %v5977_v42 = vmul.f32 0.5, %v513_v33 }
  0xef   : > { %v796_v55 = vmul.f32 %v732_v57, %v513_v33  ;;  %10001 = vst [vmem:[#allocation24_spill] sm:$0xff] %v5964_v59  ;;  %v5981_v32 = vmul.f32 %v1048_v45, %v5885_v25  ;;  %v5983_v38 = vadd.f32 %v3467_v30, %v3401_v60  ;;  %v10006_v35 = vrot.slane %v5840_v44, 1 }
  0xf0   : > { %v859_v47 = vadd.f32 %v795_v3, %v400_v1  ;;  %v2223_v10 = vsel %vm2164_vm1, %v10003_v37, %v10002_v22  ;;  %v2944_v45 = vmul.f32 %v5730_v17, %v5846_v53 }
  0xf1   : > { %v860_v15 = vadd.f32 %v796_v55, %v513_v33  ;;  %v403_v57 = vpop.f32.mrf.mxu0  ;;  %v516_v3 = vpop.f32.mrf.mxu1  ;;  %10004 = vst [vmem:[#allocation25_spill] sm:$0xff] %v5983_v38  ;;  %v5987_v1 = vsel %vm5912_vm6, %v2223_v10, 0.0  ;;  %v10005_v33 = vrot.slane %v5916_v61, 1  ;;  %v244_v38 = vld [vmem:[%s5578_s14 + $0xc0] sm:$0xff] }
  0xf2   : > { %v5116_v11 = vpop.eup %5115  ;;  %v923_v48 = vmul.f32 0.7978846, %v859_v47  ;;  %v669_v59 = vmul.f32 0.044715, %v403_v57  ;;  %v670_v54 = vmul.f32 0.044715, %v516_v3 }
  0xf3   : > { %v5118_v52 = vpop.eup %5117  ;;  %v924_v22 = vmul.f32 0.7978846, %v860_v15  ;;  %v2478_v55 = vsel %vm2421_vm2, %v10006_v35, %v10005_v33  ;;  %v1049_v25 = vadd.f32 1.0, %v5116_v11  ;;  %v3010_v11 = vmul.f32 %v5705_v63, %v5780_v50 }
  0xf4   : > { %5119 = vtanh.f32 %v923_v48  ;;  %v733_v47 = vmul.f32 %v669_v59, %v403_v57  ;;  %4963 = vmatmul.msk.f32.gmra.mxu0 %vm268_vm0, %v243_v41  ;;  %4995 = vmatmul.msk.f32.gmra.mxu1 %vm268_vm0, %v243_v41  ;;  %v734_v37 = vmul.f32 %v670_v54, %v516_v3  ;;  %v1050_v10 = vadd.f32 1.0, %v5118_v52 }
  0xf5   : > { %5121 = vtanh.f32 %v924_v22  ;;  %v3140_v59 = vmul.f32 %v5733_v18, %v5903_v12  ;;  %v6009_v35 = vsel %vm5950_vm7, %v2478_v55, 0.0  ;;  %v6012_v22 = vmul.f32 %v1049_v25, %v5918_v51 }
  0xf6   : > { %v797_v15 = vmul.f32 %v733_v47, %v403_v57  ;;  %v798_v33 = vmul.f32 %v734_v37, %v516_v3  ;;  %v6016_v54 = vmul.f32 %v5791_v58, %v5874_v56  ;;  %v3074_v47 = vadd.f32 %v3010_v11, %v2944_v45 }
  0xf7   : > { %10007 = vst [vmem:[#allocation26_spill] sm:$0xff] %v6012_v22  ;;  %v6018_v30 = vmul.f32 0.5, %v403_v57  ;;  %v6020_v60 = vmul.f32 0.5, %v516_v3  ;;  %v3272_v55 = vmul.f32 %v5762_v36, %v5987_v1  ;;  %v6026_v51 = vmul.f32 %v1050_v10, %v5930_v46 }
  0xf8   : > { %v861_v52 = vadd.f32 %v797_v15, %v403_v57  ;;  %10008 = vst [vmem:[#allocation27_spill] sm:$0xff] %v6016_v54  ;;  %v862_v41 = vadd.f32 %v798_v33, %v516_v3  ;;  %v6028_v56 = vadd.f32 %v3140_v59, %v3074_v47  ;;  %v3338_v3 = vmul.f32 %v5718_v7, %v5840_v44 }
  0xf9   : > { %v406_v48 = vpop.f32.mrf.mxu0  ;;  %v519_v37 = vpop.f32.mrf.mxu1  ;;  %10009 = vst [vmem:[#allocation28_spill] sm:$0xff] %v6026_v51  ;;  %v3468_v33 = vmul.f32 %v5894_v27, %v6009_v35  ;;  %v10011_v46 = vrot.slane %v5849_v8, 7  ;;  %v10012_v10 = vrot.slane %v5815_v14, 7 }
  0xfa   : > { %v5120_v34 = vpop.eup %5119  ;;  %v925_v25 = vmul.f32 0.7978846, %v861_v52  ;;  %v671_v15 = vmul.f32 0.044715, %v406_v48  ;;  %10010 = vst [vmem:[#allocation29_spill] sm:$0xff] %v6028_v56  ;;  %v10013_v56 = vrot.slane %v5934_v9, 1 }
  0xfb   : > { %v5122_v45 = vpop.eup %5121  ;;  %v926_v57 = vmul.f32 0.7978846, %v862_v41  ;;  %v672_v11 = vmul.f32 0.044715, %v519_v37  ;;  %v2224_v59 = vsel %vm2164_vm1, %v10012_v10, %v10011_v46  ;;  %v1051_v52 = vadd.f32 1.0, %v5120_v34 }
  0xfc   : > { %5123 = vtanh.f32 %v925_v25  ;;  %v735_v5 = vmul.f32 %v671_v15, %v406_v48  ;;  %4964 = vmatmul.msk.f32.gmra.mxu0 %vm268_vm0, %v244_v38  ;;  %4996 = vmatmul.msk.f32.gmra.mxu1 %vm268_vm0, %v244_v38  ;;  %v1052_v25 = vadd.f32 1.0, %v5122_v45  ;;  %v10014_v38 = vrot.slane %v5849_v8, 1 }
  0xfd   : > { %5125 = vtanh.f32 %v926_v57  ;;  %v736_v47 = vmul.f32 %v672_v11, %v519_v37  ;;  %v3402_v10 = vadd.f32 %v3338_v3, %v3272_v55  ;;  %v6054_v34 = vsel %vm5912_vm6, %v2224_v59, 0.0  ;;  %v245_v55 = vld [vmem:[%s5578_s14 + $0xc8] sm:$0xff] }
  0xfe   : > { %v799_v15 = vmul.f32 %v735_v5, %v406_v48  ;;  %v2479_v43 = vsel %vm2421_vm2, %v10014_v38, %v10013_v56  ;;  %v6056_v57 = vmul.f32 0.5, %v406_v48  ;;  %v6058_v45 = vmul.f32 0.5, %v519_v37 }
  0xff   : > { %v800_v46 = vmul.f32 %v736_v47, %v519_v37  ;;  %v6062_v5 = vmul.f32 %v5860_v28, %v5944_v21  ;;  %v6065_v54 = vmul.f32 %v1051_v52, %v5975_v0  ;;  %v6068_v3 = vadd.f32 %v3468_v33, %v3402_v10 }
 0x100   : > { %v863_v11 = vadd.f32 %v799_v15, %v406_v48  ;;  %v6072_v29 = vsel %vm5950_vm7, %v2479_v43, 0.0  ;;  %v6075_v59 = vmul.f32 %v1052_v25, %v5977_v42  ;;  %v2945_v0 = vmul.f32 %v5736_v19, %v5898_v26 }
 0x101   : > { %10015 = vst [vmem:[#allocation30_spill] sm:$0xff] %v6062_v5  ;;  %v864_v56 = vadd.f32 %v800_v46, %v519_v37  ;;  %v409_v38 = vpop.f32.mrf.mxu0  ;;  %v522_v47 = vpop.f32.mrf.mxu1  ;;  %v3011_v33 = vmul.f32 %v5715_v6, %v5815_v14  ;;  %v3273_v42 = vmul.f32 %v5778_v49, %v6054_v34 }
 0x102   : > { %10016 = vst [vmem:[#allocation31_spill] sm:$0xff] %v6065_v54  ;;  %v5124_v48 = vpop.eup %5123  ;;  %v927_v15 = vmul.f32 0.7978846, %v863_v11  ;;  %v673_v21 = vmul.f32 0.044715, %v409_v38  ;;  %v246_v54 = vld [vmem:[%s5578_s14 + $0xd0] sm:$0xff] }
 0x103   : > { %10017 = vst [vmem:[#allocation32_spill] sm:$0xff] %v6068_v3  ;;  %v5126_v52 = vpop.eup %5125  ;;  %v928_v37 = vmul.f32 0.7978846, %v864_v56  ;;  %v674_v46 = vmul.f32 0.044715, %v522_v47  ;;  %v1053_v43 = vadd.f32 1.0, %v5124_v48  ;;  %v3469_v48 = vmul.f32 %v5928_v40, %v6072_v29 }
 0x104   : > { %10018 = vst [vmem:[#allocation33_spill] sm:$0xff] %v6072_v29  ;;  %5127 = vtanh.f32 %v927_v15  ;;  %v737_v10 = vmul.f32 %v673_v21, %v409_v38  ;;  %4965 = vmatmul.msk.f32.gmra.mxu0 %vm268_vm0, %v245_v55  ;;  %4997 = vmatmul.msk.f32.gmra.mxu1 %vm268_vm0, %v245_v55  ;;  %v1054_v11 = vadd.f32 1.0, %v5126_v52  ;;  %v1175_v15 = vadd.s32 24, %v5712_v4 }
 0x105   : > { %10019 = vst [vmem:[#allocation34_spill] sm:$0xff] %v6075_v59  ;;  %v738_v56 = vmul.f32 %v674_v46, %v522_v47  ;;  %5129 = vtanh.f32 %v928_v37  ;;  %v3075_v25 = vadd.f32 %v3011_v33, %v2945_v0  ;;  %v6097_v52 = vmul.f32 %v1053_v43, %v6018_v30 }
 0x106   : > { %v801_v41 = vmul.f32 %v737_v10, %v409_v38  ;;  %v6099_v46 = vmul.f32 0.5, %v409_v38  ;;  %v6101_v37 = vmul.f32 0.5, %v522_v47  ;;  %v3403_v10 = vadd.f32 %v3339_v24, %v3273_v42 }
 0x107   : > { %10020 = vst [vmem:[#allocation35_spill] sm:$0xff] %v6097_v52  ;;  %v6104_v3 = vmul.f32 %v1054_v11, %v6020_v60  ;;  %v802_v22 = vmul.f32 %v738_v56, %v522_v47  ;;  %v6107_v21 = vadd.f32 %v3141_v39, %v3075_v25  ;;  %v1229_v43 = vand.u32 7, %v1175_v15  ;;  %v247_v39 = vld [vmem:[%s5578_s14 + $0xd8] sm:$0xff] }
 0x108   : > { %v865_v51 = vadd.f32 %v801_v41, %v409_v38  ;;  %v6109_v30 = vadd.f32 %v3469_v48, %v3403_v10  ;;  %v10024_v24 = vrot.slane %v5916_v61, 7  ;;  %v10025_v60 = vrot.slane %v5840_v44, 7 }
 0x109   : > { %10021 = vst [vmem:[#allocation36_spill] sm:$0xff] %v6104_v3  ;;  %v412_v40 = vpop.f32.mrf.mxu0  ;;  %v525_v55 = vpop.f32.mrf.mxu1  ;;  %v866_v29 = vadd.f32 %v802_v22, %v522_v47  ;;  %v6123_v22 = vmul.f32 %v5705_v63, %v6097_v52  ;;  %vm6130_vm8 = vcmp.gt.s32.totalorder %v1229_v43, 0  ;;  %vm6137_vm9 = vcmp.lt.s32.totalorder %v1229_v43, 7 }
 0x10a   : > { %10022 = vst [vmem:[#allocation37_spill] sm:$0xff] %v6107_v21  ;;  %v5128_v5 = vpop.eup %5127  ;;  %v675_v0 = vmul.f32 0.044715, %v412_v40  ;;  %v676_v33 = vmul.f32 0.044715, %v525_v55  ;;  %v2221_v41 = vsel %vm2164_vm1, %v10025_v60, %v10024_v24  ;;  %v6150_v60 = vmul.f32 %v5715_v6, %v6104_v3 }
 0x10b   : > { %10023 = vst [vmem:[#allocation38_spill] sm:$0xff] %v6109_v30  ;;  %v1055_v59 = vadd.f32 1.0, %v5128_v5  ;;  %v929_v20 = vmul.f32 0.7978846, %v865_v51  ;;  %v5130_v38 = vpop.eup %5129  ;;  %v6127_v51 = vmul.f32 %v5718_v7, %v6097_v52  ;;  %v930_v47 = vmul.f32 0.7978846, %v866_v29 }
 0x10c   : > { %v739_v25 = vmul.f32 %v675_v0, %v412_v40  ;;  %v740_v11 = vmul.f32 %v676_v33, %v525_v55  ;;  %4966 = vmatmul.msk.f32.gmra.mxu0 %vm268_vm0, %v246_v54  ;;  %4998 = vmatmul.msk.f32.gmra.mxu1 %vm268_vm0, %v246_v54  ;;  %10026 = vst [vmem:[#allocation39_spill] sm:$0xff] %v6123_v22  ;;  %v1056_v10 = vadd.f32 1.0, %v5130_v38  ;;  %v10033_v33 = vrot.slane %v5973_v16, 1 }
 0x10d   : > { %10027 = vst [vmem:[#allocation40_spill] sm:$0xff] %v6127_v51  ;;  %5131 = vtanh.f32 %v929_v20  ;;  %v6135_v54 = vmul.f32 %v1055_v59, %v6056_v57  ;;  %v10034_v20 = vrot.slane %v5916_v61, 1  ;;  %v6154_v57 = vmul.f32 %v5725_v13, %v6104_v3 }
 0x10e   : > { %v803_v56 = vmul.f32 %v739_v25, %v412_v40  ;;  %v804_v48 = vmul.f32 %v740_v11, %v525_v55  ;;  %10035 = vst [vmem:[#allocation42_spill] sm:$0xff] %v6150_v60  ;;  %v6156_v59 = vmul.f32 0.5, %v412_v40  ;;  %v6158_v38 = vmul.f32 0.5, %v525_v55 }
 0x10f   : > { %10030 = vst [vmem:[#allocation41_spill] sm:$0xff] %v6135_v54  ;;  %v2476_v29 = vsel %vm2421_vm2, %v10034_v20, %v10033_v33  ;;  %v6163_v33 = vsel %vm6130_vm8, %v2221_v41, 0.0  ;;  %5133 = vtanh.f32 %v930_v47  ;;  %v3340_v51 = vmul.f32 %v5718_v7, %v5916_v61 }
 0x110   : > { %10036 = vst [vmem:[#allocation43_spill] sm:$0xff] %v6154_v57  ;;  %v867_v43 = vadd.f32 %v803_v56, %v412_v40  ;;  %v868_v25 = vadd.f32 %v804_v48, %v525_v55  ;;  %v6167_v42 = vsel %vm6137_vm9, %v2476_v29, 0.0  ;;  %v6171_v56 = vmul.f32 %v1056_v10, %v6058_v45 }
 0x111   : > { %v415_v11 = vpop.f32.mrf.mxu0  ;;  %v528_v5 = vpop.f32.mrf.mxu1  ;;  %v2618_v48 = vmul.f32 %v5745_v23, %v5846_v53  ;;  %v6180_v29 = vmul.f32 %v5702_v62, %v6135_v54  ;;  %v2684_v45 = vmul.f32 %v5702_v62, %v5780_v50  ;;  %v6186_v53 = vmul.f32 %v5705_v63, %v6135_v54 }
 0x112   : > { %v677_v20 = vmul.f32 0.044715, %v415_v11  ;;  %v678_v24 = vmul.f32 0.044715, %v528_v5  ;;  %10037 = vst [vmem:[#allocation44_spill] sm:$0xff] %v6171_v56 }
 0x113   : > { %v5132_v60 = vpop.eup %5131  ;;  %v931_v55 = vmul.f32 0.7978846, %v867_v43  ;;  %v932_v22 = vmul.f32 0.7978846, %v868_v25  ;;  %10038 = vst [vmem:[#allocation45_spill] sm:$0xff] %v6180_v29 }
 0x114   : > { %v741_v47 = vmul.f32 %v677_v20, %v415_v11  ;;  %v742_v57 = vmul.f32 %v678_v24, %v528_v5  ;;  %4967 = vmatmul.msk.f32.gmra.mxu0 %vm268_vm0, %v247_v39  ;;  %4999 = vmatmul.msk.f32.gmra.mxu1 %vm268_vm0, %v247_v39  ;;  %v1057_v40 = vadd.f32 1.0, %v5132_v60  ;;  %10039 = vst [vmem:[#allocation46_spill] sm:$0xff] %v6186_v53 }
 0x115   : > { %5135 = vtanh.f32 %v931_v55  ;;  %v2946_v24 = vmul.f32 %v5730_v17, %v5987_v1  ;;  %v6194_v60 = vmul.f32 %v5710_v2, %v6171_v56  ;;  %v2748_v20 = vadd.f32 %v2684_v45, %v2618_v48  ;;  %v5134_v50 = vpop.eup %5133 }
 0x116   : > { %v805_v10 = vmul.f32 %v741_v47, %v415_v11  ;;  %v806_v43 = vmul.f32 %v742_v57, %v528_v5  ;;  %5137 = vtanh.f32 %v932_v22  ;;  %v2814_v55 = vmul.f32 %v5791_v58, %v5903_v12 }
 0x117   : > { %10040 = vst [vmem:[#allocation47_spill] sm:$0xff] %v6194_v60  ;;  %v3012_v57 = vmul.f32 %v5705_v63, %v5840_v44  ;;  %v3142_v47 = vmul.f32 %v5733_v18, %v6009_v35  ;;  %v6203_v39 = vmul.f32 %v1057_v40, %v6099_v46  ;;  %v248_v60 = vld [vmem:[%s5578_s14 + $0xe0] sm:$0xff]  ;;  %v3274_v22 = vmul.f32 %v5762_v36, %v6163_v33 }
 0x118   : > { %v869_v25 = vadd.f32 %v805_v10, %v415_v11  ;;  %v870_v41 = vadd.f32 %v806_v43, %v528_v5  ;;  %v1058_v3 = vadd.f32 1.0, %v5134_v50  ;;  %v3470_v46 = vmul.f32 %v5894_v27, %v6167_v42 }
 0x119   : > { %10041 = vst [vmem:[#allocation48_spill] sm:$0xff] %v6203_v39  ;;  %v418_v29 = vpop.f32.mrf.mxu0  ;;  %v531_v53 = vpop.f32.mrf.mxu1  ;;  %v3076_v12 = vadd.f32 %v3012_v57, %v2946_v24  ;;  %v6214_v40 = vmul.f32 %v5715_v6, %v6171_v56  ;;  %v613_v10 = vmul.f32 0.5, %v415_v11  ;;  %v6218_v24 = vmul.f32 0.5, %v528_v5 }
 0x11a   : > { %v679_v48 = vmul.f32 0.044715, %v418_v29  ;;  %v680_v45 = vmul.f32 0.044715, %v531_v53  ;;  %v933_v52 = vmul.f32 0.7978846, %v869_v25  ;;  %v2878_v57 = vadd.f32 %v2814_v55, %v2748_v20 }
 0x11b   : > { %v5136_v54 = vpop.eup %5135  ;;  %v934_v30 = vmul.f32 0.7978846, %v870_v41  ;;  %10042 = vst [vmem:[#allocation49_spill] sm:$0xff] %v6214_v40  ;;  %v3206_v50 = vadd.f32 %v3142_v47, %v3076_v12  ;;  %v3404_v25 = vadd.f32 %v3340_v51, %v3274_v22  ;;  %v6222_v11 = vmul.f32 %v1058_v3, %v6101_v37 }
 0x11c   : > { %v743_v43 = vmul.f32 %v679_v48, %v418_v29  ;;  %v744_v21 = vmul.f32 %v680_v45, %v531_v53  ;;  %4968 = vmatmul.msk.f32.gmra.mxu0 %vm268_vm0, %v248_v60  ;;  %5000 = vmatmul.msk.f32.gmra.mxu1 %vm268_vm0, %v248_v60  ;;  %v5138_v41 = vpop.eup %5137  ;;  %v1059_v27 = vadd.f32 1.0, %v5136_v54  ;;  %5139 = vtanh.f32 %v933_v52 }
 0x11d   : > { %10043 = vst [vmem:[#allocation50_spill] sm:$0xff] %v6222_v11  ;;  %5141 = vtanh.f32 %v934_v30  ;;  %v3534_v45 = vadd.f32 %v3470_v46, %v3404_v25  ;;  %v6227_v5 = vmul.f32 %v5702_v62, %v6203_v39  ;;  %v6231_v51 = vmul.f32 %v5705_v63, %v6203_v39  ;;  %v249_v30 = vld [vmem:[%s5578_s14 + $0xe8] sm:$0xff] }
 0x11e   : > { %v807_v56 = vmul.f32 %v743_v43, %v418_v29  ;;  %v808_v48 = vmul.f32 %v744_v21, %v531_v53  ;;  %v6233_v54 = vmul.f32 0.5, %v418_v29  ;;  %v1060_v52 = vadd.f32 1.0, %v5138_v41 }
 0x11f   : > { %10044 = vst [vmem:[#allocation51_spill] sm:$0xff] %v6227_v5  ;;  %v3724_v21 = vadd.f32 %v3206_v50, %v2878_v57  ;;  %v6237_v47 = vmul.f32 %v1059_v27, %v6156_v59  ;;  %v6239_v22 = vmul.f32 0.5, %v531_v53  ;;  %v6245_v41 = vmul.f32 %v5710_v2, %v6222_v11 }
 0x120   : > { %10045 = vst [vmem:[#allocation52_spill] sm:$0xff] %v6231_v51  ;;  %v871_v20 = vadd.f32 %v807_v56, %v418_v29  ;;  %v872_v55 = vadd.f32 %v808_v48, %v531_v53  ;;  %v6253_v27 = vmul.f32 %v5715_v6, %v6222_v11  ;;  %v6256_v25 = vmul.f32 %v1060_v52, %v6158_v38 }
 0x121   : > { %v421_v3 = vpop.f32.mrf.mxu0  ;;  %v534_v37 = vpop.f32.mrf.mxu1  ;;  %10046 = vst [vmem:[#allocation53_spill] sm:$0xff] %v6237_v47  ;;  %v6247_v56 = vadd.f32 %v3724_v21, %v3534_v45  ;;  %v10050_v45 = vrot.slane %v5934_v9, 7  ;;  %v6268_v38 = vmul.f32 %v5702_v62, %v6237_v47  ;;  %v6351_v51 = vadd.s32 128, %v5712_v4 }
 0x122   : > { %v681_v12 = vmul.f32 0.044715, %v421_v3  ;;  %v682_v46 = vmul.f32 0.044715, %v534_v37  ;;  %10047 = vst [vmem:[#allocation54_spill] sm:$0xff] %v6245_v41  ;;  %v5140_v29 = vpop.eup %5139  ;;  %v6280_v21 = vmul.f32 0.5, %v534_v37 }
 0x123   : > { %v935_v48 = vmul.f32 0.7978846, %v871_v20  ;;  %v936_v57 = vmul.f32 0.7978846, %v872_v55  ;;  %v5142_v53 = vpop.eup %5141  ;;  %10048 = vst [vmem:[#allocation55_spill] sm:$0xff] %v6253_v27  ;;  %v1061_v43 = vadd.f32 1.0, %v5140_v29  ;;  %v6272_v29 = vmul.f32 %v5705_v63, %v6237_v47 }
 0x124   : > { %v745_v50 = vmul.f32 %v681_v12, %v421_v3  ;;  %v746_v59 = vmul.f32 %v682_v46, %v534_v37  ;;  %4969 = vmatmul.msk.f32.gmra.mxu0 %vm268_vm0, %v249_v30  ;;  %5001 = vmatmul.msk.f32.gmra.mxu1 %vm268_vm0, %v249_v30  ;;  %10049 = vst [vmem:[#allocation56_spill] sm:$0xff] %v6256_v25  ;;  %v10051_v20 = vrot.slane %v5849_v8, 7  ;;  %v1062_v52 = vadd.f32 1.0, %v5142_v53  ;;  %v250_v53 = vld [vmem:[%s5578_s14 + $0xf0] sm:$0xff] }
 0x125   : > { %5143 = vtanh.f32 %v935_v48  ;;  %10052 = vst [vmem:[#allocation57_spill] sm:$0xff] %v6268_v38  ;;  %v6286_v38 = vmul.f32 %v5710_v2, %v6256_v25  ;;  %v6431_v39 = vadd.s32 32, %v5712_v4 }
 0x126   : > { %v2222_v55 = vsel %vm2164_vm1, %v10051_v20, %v10050_v45  ;;  %v809_v30 = vmul.f32 %v745_v50, %v421_v3  ;;  %v810_v12 = vmul.f32 %v746_v59, %v534_v37  ;;  %5145 = vtanh.f32 %v936_v57  ;;  %10053 = vst [vmem:[#allocation58_spill] sm:$0xff] %v6272_v29 }
 0x127   : > { %v4044_v20 = vmul.f32 0.044715, %v6247_v56  ;;  %v6276_v50 = vmul.f32 %v1061_v43, %v613_v10  ;;  %v6278_v59 = vmul.f32 0.5, %v421_v3  ;;  %10055 = vst [vmem:[#allocation60_spill] sm:$0xff] %v6286_v38  ;;  %v10057_v10 = vrot.slane %v5981_v32, 1 }
 0x128   : > { %v873_v60 = vadd.f32 %v809_v30, %v421_v3  ;;  %v874_v45 = vadd.f32 %v810_v12, %v534_v37  ;;  %v6290_v30 = vmul.f32 %v5715_v6, %v6256_v25  ;;  %v10058_v3 = vrot.slane %v5934_v9, 1  ;;  %10066 = vst [vmem:[#allocation67_spill] sm:$0xff] %v6351_v51 }
 0x129   : > { %10054 = vst [vmem:[#allocation59_spill] sm:$0xff] %v6276_v50  ;;  %v424_v46 = vpop.f32.mrf.mxu0  ;;  %v537_v36 = vpop.f32.mrf.mxu1  ;;  %v6299_v43 = vmul.f32 %v1062_v52, %v6218_v24  ;;  %v6302_v57 = vmul.f32 0.5, %v6247_v56  ;;  %v6319_v15 = vmul.f32 %v5702_v62, %v6276_v50 }
 0x12a   : > { %10056 = vst [vmem:[#allocation61_spill] sm:$0xff] %v6290_v30  ;;  %v2477_v37 = vsel %vm2421_vm2, %v10058_v3, %v10057_v10  ;;  %v937_v12 = vmul.f32 0.7978846, %v873_v60  ;;  %v938_v48 = vmul.f32 0.7978846, %v874_v45  ;;  %v4108_v30 = vmul.f32 %v4044_v20, %v6247_v56  ;;  %v251_v20 = vld [vmem:[%s5578_s14 + $0xf8] sm:$0xff] }
 0x12b   : > { %10059 = vst [vmem:[#allocation62_spill] sm:$0xff] %v6299_v43  ;;  %v5144_v38 = vpop.eup %5143  ;;  %v683_v41 = vmul.f32 0.044715, %v424_v46  ;;  %v684_v29 = vmul.f32 0.044715, %v537_v36  ;;  %v6309_v10 = vsel %vm6130_vm8, %v2222_v55, 0.0  ;;  %v6323_v55 = vmul.f32 %v5705_v63, %v6276_v50 }
 0x12c   : > { %4970 = vmatmul.msk.f32.gmra.mxu0 %vm268_vm0, %v250_v53  ;;  %5002 = vmatmul.msk.f32.gmra.mxu1 %vm268_vm0, %v250_v53  ;;  %v5146_v24 = vpop.eup %5145  ;;  %5147 = vtanh.f32 %v937_v12  ;;  %v6315_v45 = vsel %vm6137_vm9, %v2477_v37, 0.0  ;;  %v1063_v3 = vadd.f32 1.0, %v5144_v38  ;;  %10060 = vst [vmem:[#allocation63_spill] sm:$0xff] %v6319_v15  ;;  %v4172_v38 = vmul.f32 %v4108_v30, %v6247_v56  ;;  %v10064_v12 = vld [vmem:[#allocation11_spill] sm:$0xff]  ;;  %s5409_s14 = scalar_lea.hbm %s9813_s4, 512 }
 0x12d   : > { %5149 = vtanh.f32 %v938_v48  ;;  %v747_v53 = vmul.f32 %v683_v41, %v424_v46  ;;  %v748_v5 = vmul.f32 %v684_v29, %v537_v36  ;;  %10061 = vst [vmem:[#allocation64_spill] sm:$0xff] %v6323_v55  ;;  %v1064_v0 = vadd.f32 1.0, %v5146_v24  ;;  %p5411_p1 = scmp.lt.s32.totalorder %s5409_s14, %s5405_s30 }
 0x12e   : > { %v6330_v41 = vmul.f32 %v5710_v2, %v6299_v43  ;;  %v6334_v29 = vmul.f32 %v5715_v6, %v6299_v43  ;;  %v6336_v48 = vmul.f32 0.5, %v424_v46  ;;  %v2619_v24 = vmul.f32 %v10064_v12, %v5898_v26 }
 0x12f   : > { %v811_v37 = vmul.f32 %v747_v53, %v424_v46  ;;  %v812_v60 = vmul.f32 %v748_v5, %v537_v36  ;;  %v6342_v5 = vmul.f32 %v1063_v3, %v6233_v54  ;;  %v6344_v30 = vmul.f32 0.5, %v537_v36  ;;  %p5412_p3 = por %p5411_p1, %p5410_p0 }
 0x130   : > { %10062 = vst [vmem:[#allocation65_spill] sm:$0xff] %v6330_v41  ;;  %v2685_v53 = vmul.f32 %v5710_v2, %v5815_v14  ;;  %v2815_v41 = vmul.f32 %v5860_v28, %v5938_v31  ;;  %v6354_v26 = vmul.f32 %v1064_v0, %v6239_v22  ;;  %v4236_v14 = vadd.f32 %v4172_v38, %v6247_v56 }
 0x131   : > { %10063 = vst [vmem:[#allocation66_spill] sm:$0xff] %v6334_v29  ;;  %v427_v52 = vpop.f32.mrf.mxu0  ;;  %v540_v15 = vpop.f32.mrf.mxu1  ;;  %v875_v55 = vadd.f32 %v811_v37, %v424_v46  ;;  %v876_v27 = vadd.f32 %v812_v60, %v537_v36  ;;  %v2947_v36 = vmul.f32 %v5736_v19, %v6054_v34  ;;  %v6369_v56 = vmul.f32 %v5705_v63, %v6342_v5  ;;  %p5413_p4 = pnand %p5412_p3, %p5408_p13 }
 0x132   : > { %10065 = vst [vmem:[#allocation11_spill] sm:$0xff] %v6342_v5  ;;  %v5148_v29 = vpop.eup %5147  ;;  %v685_v43 = vmul.f32 0.044715, %v427_v52  ;;  %v686_v3 = vmul.f32 0.044715, %v540_v15  ;;  %v2749_v46 = vadd.f32 %v2685_v53, %v2619_v24  ;;  %v6382_v24 = vmul.f32 %v5715_v6, %v6354_v26 }
 0x133   : > { %v5150_v50 = vpop.eup %5149  ;;  %10067 = vst [vmem:[#allocation68_spill] sm:$0xff] %v6354_v26  ;;  %v1065_v54 = vadd.f32 1.0, %v5148_v29  ;;  %v939_v31 = vmul.f32 0.7978846, %v875_v55  ;;  %v6365_v29 = vmul.f32 %v5702_v62, %v6342_v5  ;;  %v4300_v37 = vmul.f32 0.7978846, %v4236_v14 }
 0x134   : > { %4971 = vmatmul.msk.f32.gmra.mxu0 %vm268_vm0, %v251_v20  ;;  %5003 = vmatmul.msk.f32.gmra.mxu1 %vm268_vm0, %v251_v20  ;;  %v749_v40 = vmul.f32 %v685_v43, %v427_v52  ;;  %v1066_v22 = vadd.f32 1.0, %v5150_v50  ;;  %v750_v0 = vmul.f32 %v686_v3, %v540_v15  ;;  %v940_v20 = vmul.f32 0.7978846, %v876_v27  ;;  %10069 = vst [vmem:[#allocation70_spill] sm:$0xff] %v6369_v56 }
 0x135   : > { %10068 = vst [vmem:[#allocation69_spill] sm:$0xff] %v6365_v29  ;;  %5151 = vtanh.f32 %v939_v31  ;;  %v6374_v38 = vmul.f32 %v1065_v54, %v6278_v59  ;;  %v6378_v50 = vmul.f32 %v5710_v2, %v6354_v26  ;;  %v6386_v27 = vmul.f32 0.5, %v540_v15  ;;  %v10080_v54 = vld [vmem:[#allocation22_spill] sm:$0xff] }
 0x136   : > { %v813_v25 = vmul.f32 %v749_v40, %v427_v52  ;;  %10072 = vst [vmem:[#allocation73_spill] sm:$0xff] %v6382_v24  ;;  %v6384_v40 = vmul.f32 0.5, %v427_v52  ;;  %v6389_v31 = vmul.f32 %v1066_v22, %v6280_v21  ;;  %v814_v59 = vmul.f32 %v750_v0, %v540_v15 }
 0x137   : > { %10070 = vst [vmem:[#allocation71_spill] sm:$0xff] %v6374_v38  ;;  %5153 = vtanh.f32 %v940_v20  ;;  %v6393_v56 = vadd.f32 %v2815_v41, %v2749_v46  ;;  %v6398_v21 = vmul.f32 %v5702_v62, %v6374_v38  ;;  %v6402_v22 = vmul.f32 %v5705_v63, %v6374_v38 }
 0x138   : > { %10071 = vst [vmem:[#allocation72_spill] sm:$0xff] %v6378_v50  ;;  %v877_v43 = vadd.f32 %v813_v25, %v427_v52  ;;  %v878_v24 = vadd.f32 %v814_v59, %v540_v15  ;;  %v6420_v15 = vmul.f32 %v5715_v6, %v6389_v31  ;;  %v3341_v5 = vmul.f32 %v5725_v13, %v5934_v9 }
 0x139   : > { %v430_v53 = vpop.f32.mrf.mxu0  ;;  %v543_v3 = vpop.f32.mrf.mxu1  ;;  %10073 = vst [vmem:[#allocation74_spill] sm:$0xff] %v6389_v31 }
 0x13a   : > { %v687_v60 = vmul.f32 0.044715, %v430_v53  ;;  %v688_v55 = vmul.f32 0.044715, %v543_v3  ;;  %v941_v29 = vmul.f32 0.7978846, %v877_v43  ;;  %v6408_v43 = vmul.f32 %v5710_v2, %v6389_v31 }
 0x13b   : > { %v5152_v26 = vpop.eup %5151  ;;  %10074 = vst [vmem:[#allocation75_spill] sm:$0xff] %v6398_v21  ;;  %v942_v0 = vmul.f32 0.7978846, %v878_v24  ;;  %v623_v11 = vmul.f32 0.5, %v430_v53 }
 0x13c   : > { %v751_v25 = vmul.f32 %v687_v60, %v430_v53  ;;  %v752_v52 = vmul.f32 %v688_v55, %v543_v3  ;;  %10075 = vst [vmem:[#allocation76_spill] sm:$0xff] %v6402_v22  ;;  %5155 = vtanh.f32 %v941_v29  ;;  %v1067_v41 = vadd.f32 1.0, %v5152_v26  ;;  %v10077_v26 = vld [vmem:[#allocation33_spill] sm:$0xff] }
 0x13d   : > { %10076 = vst [vmem:[#allocation77_spill] sm:$0xff] %v6408_v43  ;;  %5157 = vtanh.f32 %v942_v0  ;;  %v3013_v60 = vmul.f32 %v5715_v6, %v5849_v8  ;;  %v3275_v55 = vmul.f32 %v5778_v49, %v6309_v10  ;;  %v5154_v59 = vpop.eup %5153  ;;  %v3471_v43 = vmul.f32 %v10080_v54, %v6315_v45 }
 0x13e   : > { %v815_v46 = vmul.f32 %v751_v25, %v430_v53  ;;  %v816_v20 = vmul.f32 %v752_v52, %v543_v3  ;;  %5159 = vtanh.f32 %v4300_v37  ;;  %v10078_v25 = vld [vmem:[#allocation10_spill] sm:$0xff]  ;;  %10079 = vst [vmem:[#allocation33_spill] sm:$0xff] %v6420_v15  ;;  %v1068_v38 = vadd.f32 1.0, %v5154_v59 }
 0x13f   : > { %v3143_v52 = vmul.f32 %v10078_v25, %v10077_v26  ;;  %v3077_v0 = vadd.f32 %v3013_v60, %v2947_v36  ;;  %v3405_v31 = vadd.f32 %v3341_v5, %v3275_v55  ;;  %v624_v36 = vmul.f32 0.5, %v543_v3 }
 0x140   : > { %v879_v14 = vadd.f32 %v815_v46, %v430_v53  ;;  %v880_v29 = vadd.f32 %v816_v20, %v543_v3  ;;  %v6427_v46 = vmul.f32 %v1067_v41, %v6336_v48  ;;  %v6440_v3 = vmul.f32 %v1068_v38, %v6344_v30 }
 0x141   : > { %v433_v24 = vpop.f32.mrf.mxu0  ;;  %v6414_v50 = vpop.f32.mrf.mxu1  ;;  %v3207_v60 = vadd.f32 %v3143_v52, %v3077_v0 }
 0x142   : > { %10081 = vst [vmem:[#allocation10_spill] sm:$0xff] %v6427_v46  ;;  %v943_v20 = vmul.f32 0.7978846, %v879_v14  ;;  %v944_v21 = vmul.f32 0.7978846, %v880_v29  ;;  %v5156_v22 = vpop.eup %5155  ;;  %v3535_v14 = vadd.f32 %v3471_v43, %v3405_v31  ;;  %v9874_v29 = vrot.slane %v6427_v46, 7 }
 0x143   : > { %v689_v37 = vmul.f32 0.044715, %v433_v24  ;;  %v690_v47 = vmul.f32 0.044715, %v6414_v50  ;;  %v1069_v15 = vadd.f32 1.0, %v5156_v22  ;;  %v5158_v49 = vpop.eup %5157  ;;  %v9877_v5 = vrot.slane %v6427_v46, 1 }
 0x144   : > { %5161 = vtanh.f32 %v943_v20  ;;  %v5160_v41 = vpop.eup %5159  ;;  %v1070_v59 = vadd.f32 1.0, %v5158_v49  ;;  %10083 = vst [vmem:[#allocation78_spill] sm:$0xff] %v6440_v3 }
 0x145   : > { %v753_v54 = vmul.f32 %v689_v37, %v433_v24  ;;  %v754_v48 = vmul.f32 %v690_v47, %v6414_v50  ;;  %v6436_v53 = vmul.f32 %v1069_v15, %v6384_v40  ;;  %5163 = vtanh.f32 %v944_v21 }
 0x146   : > { %v6445_v47 = vmul.f32 %v5705_v63, %v6427_v46  ;;  %v10085_v40 = vand.u32 7, %v6351_v51  ;;  %v6455_v21 = vmul.f32 0.5, %v433_v24  ;;  %v6462_v15 = vmul.f32 %v1070_v59, %v6386_v27 }
 0x147   : > { %10082 = vst [vmem:[#allocation22_spill] sm:$0xff] %v6436_v53  ;;  %v817_v22 = vmul.f32 %v753_v54, %v433_v24  ;;  %v818_v55 = vmul.f32 %v754_v48, %v6414_v50  ;;  %v2130_v31 = vrot.slane %v6436_v53, 7  ;;  %v9876_v43 = vrot.slane %v6436_v53, 1 }
 0x148   : > { %10084 = vst [vmem:[#allocation79_spill] sm:$0xff] %v6445_v47  ;;  %vm6451_vm10 = vcmp.gt.s32.totalorder %v10085_v40, 0  ;;  %v4428_v20 = vadd.f32 1.0, %v5160_v41  ;;  %v9878_v41 = vrot.slane %v6440_v3, 7  ;;  %v9880_v59 = vrot.slane %v6440_v3, 1 }
 0x149   : > { %v6457_v30 = vpop.f32.mrf.mxu0  ;;  %v6459_v38 = vpop.f32.mrf.mxu1  ;;  %10088 = vst [vmem:[#allocation80_spill] sm:$0xff] %v6462_v15  ;;  %v881_v52 = vadd.f32 %v817_v22, %v433_v24  ;;  %v882_v0 = vadd.f32 %v818_v55, %v6414_v50  ;;  %v6469_v37 = vsel %vm2164_vm1, %v9874_v29, %v2130_v31  ;;  %v6477_v54 = vsel %vm2421_vm2, %v9877_v5, %v9876_v43 }
 0x14a   : > { %10089 = vst [vmem:[#allocation81_spill] sm:$0xff] %v6469_v37  ;;  %v691_v27 = vmul.f32 0.044715, %v6457_v30  ;;  %v3725_v24 = vadd.f32 %v3207_v60, %v6393_v56  ;;  %v5162_v48 = vpop.eup %5161  ;;  %v2131_v22 = vrot.slane %v6462_v15, 7  ;;  %v9879_v55 = vrot.slane %v6462_v15, 1 }
 0x14b   : > { %10090 = vst [vmem:[#allocation82_spill] sm:$0xff] %v6477_v54  ;;  %v5164_v40 = vpop.eup %5163  ;;  %v1071_v29 = vadd.f32 1.0, %v5162_v48  ;;  %v945_v51 = vmul.f32 0.7978846, %v881_v52  ;;  %v946_v47 = vmul.f32 0.7978846, %v882_v0 }
 0x14c   : > { %v755_v43 = vmul.f32 %v691_v27, %v6457_v30  ;;  %v6490_v56 = vsel %vm2164_vm1, %v9878_v41, %v2131_v22  ;;  %v6498_v60 = vsel %vm2421_vm2, %v9880_v59, %v9879_v55  ;;  %v1072_v5 = vadd.f32 1.0, %v5164_v40 }
 0x14d   : > { %10091 = vst [vmem:[#allocation83_spill] sm:$0xff] %v6490_v56  ;;  %v692_v52 = vmul.f32 0.044715, %v6459_v38  ;;  %v6501_v0 = vmul.f32 %v1071_v29, %v623_v11  ;;  %5165 = vtanh.f32 %v945_v51  ;;  %v6504_v48 = vadd.f32 %v3725_v24, %v3535_v14 }
 0x14e   : > { %10092 = vst [vmem:[#allocation84_spill] sm:$0xff] %v6498_v60  ;;  %v819_v27 = vmul.f32 %v755_v43, %v6457_v30  ;;  %v6506_v41 = vmul.f32 %v1072_v5, %v624_v36  ;;  %v626_v56 = vmul.f32 0.5, %v6414_v50  ;;  %5167 = vtanh.f32 %v946_v47 }
 0x14f   : > { %10093 = vst [vmem:[#allocation85_spill] sm:$0xff] %v6501_v0  ;;  %v756_v37 = vmul.f32 %v692_v52, %v6459_v38  ;;  %v6512_v55 = vmul.f32 %v5715_v6, %v6440_v3  ;;  %v9881_v40 = vrot.slane %v6501_v0, 7  ;;  %v6516_v51 = vmul.f32 %v4428_v20, %v6302_v57 }
 0x150   : > { %10094 = vst [vmem:[#allocation86_spill] sm:$0xff] %v6506_v41  ;;  %v6521_v36 = vmul.f32 %v5705_v63, %v6436_v53  ;;  %v6525_v50 = vmul.f32 %v5718_v7, %v6436_v53  ;;  %v10099_v47 = vrot.slane %v5973_v16, 7  ;;  %v10100_v43 = vrot.slane %v5916_v61, 7 }
 0x151   : > { %10095 = vst [vmem:[#allocation87_spill] sm:$0xff] %v6512_v55  ;;  %v439_v11 = vpop.f32.mrf.mxu0  ;;  %v552_v29 = vpop.f32.mrf.mxu1  ;;  %v2195_v20 = vsel %vm2164_vm1, %v2130_v31, %v9881_v40  ;;  %v883_v24 = vadd.f32 %v819_v27, %v6457_v30  ;;  %v820_v52 = vmul.f32 %v756_v37, %v6459_v38  ;;  %v4045_v59 = vmul.f32 0.044715, %v6504_v48 }
 0x152   : > { %10096 = vst [vmem:[#allocation88_spill] sm:$0xff] %v6516_v51  ;;  %v6534_v57 = vsel %vm2164_vm1, %v10100_v43, %v10099_v47  ;;  %v6545_v14 = vsel %vm6451_vm10, %v2195_v20, 0.0  ;;  %v2714_v5 = vmul.f32 %v5702_v62, %v6501_v0  ;;  %v10102_v47 = vrot.slane %v6506_v41, 7 }
 0x153   : > { %10097 = vst [vmem:[#allocation89_spill] sm:$0xff] %v6521_v36  ;;  %v693_v36 = vmul.f32 0.044715, %v439_v11  ;;  %v5166_v31 = vpop.eup %5165  ;;  %v2648_v27 = vmul.f32 %v5745_v23, %v6545_v14  ;;  %v947_v40 = vmul.f32 0.7978846, %v883_v24  ;;  %v884_v20 = vadd.f32 %v820_v52, %v6459_v38 }
 0x154   : > { %10098 = vst [vmem:[#allocation90_spill] sm:$0xff] %v6525_v50  ;;  %v2196_v43 = vsel %vm2164_vm1, %v2131_v22, %v10102_v47  ;;  %v5168_v55 = vpop.eup %5167  ;;  %v2715_v53 = vmul.f32 %v5710_v2, %v6506_v41  ;;  %v694_v47 = vmul.f32 0.044715, %v552_v29  ;;  %v1073_v54 = vadd.f32 1.0, %v5166_v31 }
 0x155   : > { %10101 = vst [vmem:[#allocation91_spill] sm:$0xff] %v6545_v14  ;;  %v6557_v37 = vsel %vm6451_vm10, %v2196_v43, 0.0  ;;  %v757_v22 = vmul.f32 %v693_v36, %v439_v11  ;;  %v6564_v60 = vadd.f32 %v2714_v5, %v2648_v27  ;;  %5169 = vtanh.f32 %v947_v40 }
 0x156   : > { %10103 = vst [vmem:[#allocation92_spill] sm:$0xff] %v6557_v37  ;;  %v2649_v50 = vmul.f32 %v10064_v12, %v6557_v37  ;;  %v948_v14 = vmul.f32 0.7978846, %v884_v20  ;;  %v627_v24 = vmul.f32 0.5, %v6457_v30  ;;  %v758_v52 = vmul.f32 %v694_v47, %v552_v29 }
 0x157   : > { %10104 = vst [vmem:[#allocation93_spill] sm:$0xff] %v6564_v60  ;;  %v821_v43 = vmul.f32 %v757_v22, %v439_v11  ;;  %v6571_v3 = vmul.f32 %v5715_v6, %v6462_v15  ;;  %v1074_v37 = vadd.f32 1.0, %v5168_v55  ;;  %v6574_v46 = vmul.f32 0.5, %v6459_v38 }
 0x158   : > { %v6566_v49 = vadd.f32 %v2715_v53, %v2649_v50  ;;  %v4109_v31 = vmul.f32 %v4045_v59, %v6504_v48  ;;  %v6579_v53 = vmul.f32 %v5725_v13, %v6462_v15  ;;  %5171 = vtanh.f32 %v948_v14 }
 0x159   : > { %10106 = vst [vmem:[#allocation95_spill] sm:$0xff] %v6571_v3  ;;  %v442_v36 = vpop.f32.mrf.mxu0  ;;  %v555_v5 = vpop.f32.mrf.mxu1  ;;  %v6583_v40 = vmul.f32 0.5, %v6504_v48  ;;  %v6587_v55 = vmul.f32 %v5705_v63, %v6501_v0  ;;  %v6592_v50 = vmul.f32 %v5715_v6, %v6506_v41  ;;  %v6595_v59 = vmul.f32 %v1073_v54, %v6455_v21 }
 0x15a   : > { %10105 = vst [vmem:[#allocation94_spill] sm:$0xff] %v6566_v49  ;;  %v6597_v27 = vmul.f32 0.5, %v439_v11  ;;  %v885_v20 = vadd.f32 %v821_v43, %v439_v11  ;;  %v822_v14 = vmul.f32 %v758_v52, %v552_v29  ;;  %v695_v22 = vmul.f32 0.044715, %v442_v36 }
 0x15b   : > { %10107 = vst [vmem:[#allocation96_spill] sm:$0xff] %v6579_v53  ;;  %v5170_v47 = vpop.eup %5169  ;;  %v6599_v30 = vmul.f32 %v1074_v37, %v626_v56  ;;  %v6601_v49 = vmul.f32 0.5, %v552_v29  ;;  %v696_v60 = vmul.f32 0.044715, %v555_v5  ;;  %v4173_v38 = vmul.f32 %v4109_v31, %v6504_v48 }
 0x15c   : > { %10108 = vst [vmem:[#allocation97_spill] sm:$0xff] %v6587_v55  ;;  %v1075_v55 = vadd.f32 1.0, %v5170_v47  ;;  %v949_v3 = vmul.f32 0.7978846, %v885_v20  ;;  %v886_v53 = vadd.f32 %v822_v14, %v552_v29  ;;  %v10112_v11 = vand.u32 7, %v6431_v39 }
 0x15d   : > { %10109 = vst [vmem:[#allocation98_spill] sm:$0xff] %v6592_v50  ;;  %v759_v50 = vmul.f32 %v695_v22, %v442_v36  ;;  %v760_v15 = vmul.f32 %v696_v60, %v555_v5  ;;  %v6614_v37 = vmul.f32 %v5702_v62, %v6595_v59  ;;  %v6618_v29 = vmul.f32 %v5705_v63, %v6595_v59 }
 0x15e   : > { %10110 = vst [vmem:[#allocation99_spill] sm:$0xff] %v6595_v59  ;;  %vm6608_vm11 = vcmp.gt.s32.totalorder %v10112_v11, 0  ;;  %v5172_v56 = vpop.eup %5171  ;;  %5173 = vtanh.f32 %v949_v3  ;;  %v950_v52 = vmul.f32 0.7978846, %v886_v53  ;;  %v4237_v47 = vadd.f32 %v4173_v38, %v6504_v48 }
 0x15f   : > { %10111 = vst [vmem:[#allocation100_spill] sm:$0xff] %v6599_v30  ;;  %v823_v60 = vmul.f32 %v759_v50, %v442_v36  ;;  %v824_v20 = vmul.f32 %v760_v15, %v555_v5  ;;  %v6625_v54 = vmul.f32 %v5710_v2, %v6599_v30  ;;  %v6629_v21 = vmul.f32 %v5715_v6, %v6599_v30 }
 0x160   : > { %10115 = vst [vmem:[#allocation101_spill] sm:$0xff] %v6614_v37  ;;  %v6631_v3 = vmul.f32 %v1075_v55, %v627_v24  ;;  %v1076_v53 = vadd.f32 1.0, %v5172_v56  ;;  %5175 = vtanh.f32 %v950_v52  ;;  %v10120_v48 = vmov %v10112_v11  ;;  %v10123_v11 = vld [vmem:[#allocation26_spill] sm:$0xff] }
 0x161   : > { %10116 = vst [vmem:[#allocation102_spill] sm:$0xff] %v6618_v29  ;;  %v445_v14 = vpop.f32.mrf.mxu0  ;;  %v558_v22 = vpop.f32.mrf.mxu1  ;;  %v887_v50 = vadd.f32 %v823_v60, %v442_v36  ;;  %v888_v15 = vadd.f32 %v824_v20, %v555_v5  ;;  %vm6635_vm12 = vcmp.lt.s32.totalorder %v10120_v48, 7  ;;  %v10125_v29 = vrot.slane %v5973_v16, 1 }
 0x162   : > { %10117 = vst [vmem:[#allocation103_spill] sm:$0xff] %v6625_v54  ;;  %v697_v31 = vmul.f32 0.044715, %v445_v14  ;;  %v698_v37 = vmul.f32 0.044715, %v558_v22  ;;  %v10124_v54 = vrot.slane %v10123_v11, 1  ;;  %v2686_v59 = vmul.f32 %v5702_v62, %v5840_v44 }
 0x163   : > { %10118 = vst [vmem:[#allocation104_spill] sm:$0xff] %v6629_v21  ;;  %v6645_v55 = vmul.f32 0.5, %v442_v36  ;;  %v6647_v56 = vmul.f32 0.5, %v555_v5  ;;  %v4301_v52 = vmul.f32 0.7978846, %v4237_v47  ;;  %v6652_v39 = vsel %vm6608_vm11, %v6534_v57, 0.0 }
 0x164   : > { %10119 = vst [vmem:[#allocation105_spill] sm:$0xff] %v6631_v3  ;;  %v2474_v24 = vsel %vm2421_vm2, %v10125_v29, %v10124_v54  ;;  %v5174_v60 = vpop.eup %5173  ;;  %v951_v20 = vmul.f32 0.7978846, %v887_v50  ;;  %v952_v48 = vmul.f32 0.7978846, %v888_v15  ;;  %v761_v21 = vmul.f32 %v697_v31, %v445_v14 }
 0x165   : > { %v762_v30 = vmul.f32 %v698_v37, %v558_v22  ;;  %v6657_v36 = vmul.f32 %v1076_v53, %v6574_v46  ;;  %v6661_v5 = vsel %vm6635_vm12, %v2474_v24, 0.0  ;;  %v1077_v54 = vadd.f32 1.0, %v5174_v60 }
 0x166   : > { %5177 = vtanh.f32 %v951_v20  ;;  %v825_v57 = vmul.f32 %v761_v21, %v445_v14  ;;  %v5176_v47 = vpop.eup %5175  ;;  %v6665_v31 = vmul.f32 %v5702_v62, %v6631_v3  ;;  %v6669_v37 = vmul.f32 %v5705_v63, %v6631_v3 }
 0x167   : > { %10126 = vst [vmem:[#allocation26_spill] sm:$0xff] %v6657_v36  ;;  %v826_v29 = vmul.f32 %v762_v30, %v558_v22  ;;  %5179 = vtanh.f32 %v952_v48  ;;  %v6671_v46 = vmul.f32 0.5, %v445_v14  ;;  %v1078_v15 = vadd.f32 1.0, %v5176_v47 }
 0x168   : > { %10127 = vst [vmem:[#allocation106_spill] sm:$0xff] %v6665_v31  ;;  %v889_v24 = vadd.f32 %v825_v57, %v445_v14  ;;  %v2620_v30 = vmul.f32 %v5745_v23, %v5987_v1  ;;  %v6676_v20 = vmul.f32 0.5, %v558_v22  ;;  %5181 = vtanh.f32 %v4301_v52 }
 0x169   : > { %10128 = vst [vmem:[#allocation107_spill] sm:$0xff] %v6669_v37  ;;  %v448_v53 = vpop.f32.mrf.mxu0  ;;  %v561_v50 = vpop.f32.mrf.mxu1  ;;  %v890_v60 = vadd.f32 %v826_v29, %v558_v22  ;;  %v6681_v48 = vmul.f32 %v1077_v54, %v6597_v27  ;;  %v6686_v57 = vmul.f32 %v5710_v2, %v6657_v36  ;;  %v6690_v1 = vmul.f32 %v5715_v6, %v6657_v36 }
 0x16a   : > { %v953_v41 = vmul.f32 0.7978846, %v889_v24  ;;  %v699_v37 = vmul.f32 0.044715, %v448_v53  ;;  %v700_v22 = vmul.f32 0.044715, %v561_v50  ;;  %v6693_v44 = vmul.f32 %v1078_v15, %v6601_v49 }
 0x16b   : > { %10129 = vst [vmem:[#allocation108_spill] sm:$0xff] %v6681_v48  ;;  %v954_v31 = vmul.f32 0.7978846, %v890_v60  ;;  %v2750_v27 = vadd.f32 %v2686_v59, %v2620_v30  ;;  %v2816_v54 = vmul.f32 %v5791_v58, %v6009_v35  ;;  %v2948_v29 = vmul.f32 %v5730_v17, %v6163_v33 }
 0x16c   : > { %10130 = vst [vmem:[#allocation109_spill] sm:$0xff] %v6686_v57  ;;  %v5178_v52 = vpop.eup %5177  ;;  %5183 = vtanh.f32 %v953_v41  ;;  %v763_v60 = vmul.f32 %v699_v37, %v448_v53  ;;  %v764_v21 = vmul.f32 %v700_v22, %v561_v50  ;;  %v6705_v59 = vmul.f32 %v5702_v62, %v6681_v48 }
 0x16d   : > { %10131 = vst [vmem:[#allocation110_spill] sm:$0xff] %v6690_v1  ;;  %v5180_v47 = vpop.eup %5179  ;;  %v1079_v24 = vadd.f32 1.0, %v5178_v52  ;;  %5185 = vtanh.f32 %v954_v31  ;;  %v6701_v1 = vmul.f32 0.5, %v448_v53  ;;  %v6709_v35 = vmul.f32 %v5705_v63, %v6681_v48 }
 0x16e   : > { %10132 = vst [vmem:[#allocation111_spill] sm:$0xff] %v6693_v44  ;;  %v5182_v49 = vpop.eup %5181  ;;  %v827_v15 = vmul.f32 %v763_v60, %v448_v53  ;;  %v828_v41 = vmul.f32 %v764_v21, %v561_v50  ;;  %v1080_v22 = vadd.f32 1.0, %v5180_v47  ;;  %v6711_v52 = vmul.f32 0.5, %v561_v50 }
 0x16f   : > { %10133 = vst [vmem:[#allocation112_spill] sm:$0xff] %v6705_v59  ;;  %v3014_v31 = vmul.f32 %v5705_v63, %v5916_v61  ;;  %v6718_v59 = vmul.f32 %v1079_v24, %v6645_v55  ;;  %v6720_v48 = vadd.f32 %v2816_v54, %v2750_v27  ;;  %v6724_v21 = vmul.f32 %v5710_v2, %v6693_v44 }
 0x170   : > { %10134 = vst [vmem:[#allocation113_spill] sm:$0xff] %v6709_v35  ;;  %v6728_v47 = vmul.f32 %v5715_v6, %v6693_v44  ;;  %v4429_v60 = vadd.f32 1.0, %v5182_v49  ;;  %v891_v0 = vadd.f32 %v827_v15, %v448_v53  ;;  %v892_v57 = vadd.f32 %v828_v41, %v561_v50 }
 0x171   : > { %v451_v37 = vpop.f32.mrf.mxu0  ;;  %v564_v30 = vpop.f32.mrf.mxu1  ;;  %10135 = vst [vmem:[#allocation114_spill] sm:$0xff] %v6718_v59  ;;  %v3078_v35 = vadd.f32 %v3014_v31, %v2948_v29  ;;  %v6731_v55 = vmul.f32 %v1080_v22, %v6647_v56  ;;  %v6736_v24 = vadd.s32 192, %v5712_v4  ;;  %v6744_v56 = vmul.f32 %v5702_v62, %v6718_v59 }
 0x172   : > { %v701_v14 = vmul.f32 0.044715, %v451_v37  ;;  %10136 = vst [vmem:[#allocation115_spill] sm:$0xff] %v6724_v21  ;;  %v5184_v3 = vpop.eup %5183  ;;  %v702_v36 = vmul.f32 0.044715, %v564_v30  ;;  %v6733_v54 = vmul.f32 0.5, %v451_v37  ;;  %v3144_v31 = vmul.f32 %v5733_v18, %v6167_v42 }
 0x173   : > { %10137 = vst [vmem:[#allocation116_spill] sm:$0xff] %v6728_v47  ;;  %v5186_v17 = vpop.eup %5185  ;;  %v1081_v27 = vadd.f32 1.0, %v5184_v3  ;;  %v955_v47 = vmul.f32 0.7978846, %v891_v0  ;;  %v6739_v29 = vmul.f32 0.5, %v564_v30  ;;  %v6750_v0 = vmul.f32 %v5705_v63, %v6718_v59 }
 0x174   : > { %v765_v51 = vmul.f32 %v701_v14, %v451_v37  ;;  %10138 = vst [vmem:[#allocation117_spill] sm:$0xff] %v6731_v55  ;;  %v1082_v50 = vadd.f32 1.0, %v5186_v17  ;;  %v956_v14 = vmul.f32 0.7978846, %v892_v57  ;;  %v766_v15 = vmul.f32 %v702_v36, %v564_v30 }
 0x175   : > { %10139 = vst [vmem:[#allocation118_spill] sm:$0xff] %v6736_v24  ;;  %5187 = vtanh.f32 %v955_v47  ;;  %v6755_v36 = vmul.f32 %v1081_v27, %v6671_v46  ;;  %v6759_v57 = vmul.f32 %v5710_v2, %v6731_v55  ;;  %v3208_v53 = vadd.f32 %v3144_v31, %v3078_v35 }
 0x176   : > { %v829_v49 = vmul.f32 %v765_v51, %v451_v37  ;;  %10140 = vst [vmem:[#allocation119_spill] sm:$0xff] %v6744_v56  ;;  %v6770_v51 = vmul.f32 %v1082_v50, %v6676_v20  ;;  %5189 = vtanh.f32 %v956_v14  ;;  %v830_v46 = vmul.f32 %v766_v15, %v564_v30 }
 0x177   : > { %10141 = vst [vmem:[#allocation120_spill] sm:$0xff] %v6750_v0  ;;  %v6778_v20 = vmul.f32 %v5702_v62, %v6755_v36 }
 0x178   : > { %v893_v3 = vadd.f32 %v829_v49, %v451_v37  ;;  %10142 = vst [vmem:[#allocation121_spill] sm:$0xff] %v6755_v36  ;;  %v6763_v37 = vmul.f32 %v5715_v6, %v6731_v55  ;;  %v6767_v49 = vmul.f32 %v4429_v60, %v6583_v40  ;;  %v894_v47 = vadd.f32 %v830_v46, %v564_v30 }
 0x179   : > { %v454_v41 = vpop.f32.mrf.mxu0  ;;  %v567_v22 = vpop.f32.mrf.mxu1  ;;  %10143 = vst [vmem:[#allocation122_spill] sm:$0xff] %v6759_v57  ;;  %v10147_v57 = vld [vmem:[#allocation12_spill] sm:$0xff]  ;;  %v6782_v60 = vmul.f32 %v5705_v63, %v6755_v36  ;;  %v6788_v30 = vmul.f32 %v5710_v2, %v6770_v51  ;;  %v3726_v36 = vadd.f32 %v3208_v53, %v6720_v48  ;;  %v10154_v53 = vrot.slane %v5981_v32, 7 }
 0x17a   : > { %10144 = vst [vmem:[#allocation123_spill] sm:$0xff] %v6763_v37  ;;  %v957_v21 = vmul.f32 0.7978846, %v893_v3  ;;  %v703_v27 = vmul.f32 0.044715, %v454_v41  ;;  %v3276_v56 = vmul.f32 %v10147_v57, %v6652_v39  ;;  %v6798_v15 = vmul.f32 0.5, %v567_v22 }
 0x17b   : > { %10145 = vst [vmem:[#allocation124_spill] sm:$0xff] %v6767_v49  ;;  %v704_v17 = vmul.f32 0.044715, %v567_v22  ;;  %v5188_v40 = vpop.eup %5187  ;;  %v958_v31 = vmul.f32 0.7978846, %v894_v47  ;;  %v3342_v47 = vmul.f32 %v5718_v7, %v5973_v16  ;;  %v6817_v49 = vmul.f32 %v5710_v2, %v5849_v8 }
 0x17c   : > { %10146 = vst [vmem:[#allocation125_spill] sm:$0xff] %v6770_v51  ;;  %5191 = vtanh.f32 %v957_v21  ;;  %v767_v50 = vmul.f32 %v703_v27, %v454_v41  ;;  %v1083_v3 = vadd.f32 1.0, %v5188_v40  ;;  %v6792_v21 = vmul.f32 %v5715_v6, %v6770_v51  ;;  %v5190_v27 = vpop.eup %5189 }
 0x17d   : > { %10148 = vst [vmem:[#allocation12_spill] sm:$0xff] %v6778_v20  ;;  %v768_v35 = vmul.f32 %v704_v17, %v567_v22  ;;  %5193 = vtanh.f32 %v958_v31  ;;  %v6794_v17 = vmul.f32 0.5, %v454_v41  ;;  %v3406_v51 = vadd.f32 %v3342_v47, %v3276_v56 }
 0x17e   : > { %10149 = vst [vmem:[#allocation126_spill] sm:$0xff] %v6782_v60  ;;  %v831_v46 = vmul.f32 %v767_v50, %v454_v41  ;;  %v6808_v31 = vmul.f32 %v1083_v3, %v6701_v1 }
 0x17f   : > { %10150 = vst [vmem:[#allocation127_spill] sm:$0xff] %v6788_v30  ;;  %v832_v0 = vmul.f32 %v768_v35, %v567_v22 }
 0x180   : > { %10151 = vst [vmem:[#allocation128_spill] sm:$0xff] %v6792_v21  ;;  %v895_v40 = vadd.f32 %v831_v46, %v454_v41  ;;  %v6803_v21 = vld [vmem:[%s9811_s2 + $0x10] ss:$0 sm:$0xff]  ;;  %v1084_v41 = vadd.f32 1.0, %v5190_v27  ;;  %v9918_v27 = vrot.slane %v6808_v31, 1 }
 0x181   : > { %v457_v37 = vpop.f32.mrf.mxu0  ;;  %v570_v20 = vpop.f32.mrf.mxu1  ;;  %v896_v30 = vadd.f32 %v832_v0, %v567_v22  ;;  %v3472_v50 = vmul.f32 %v6803_v21, %v6661_v5  ;;  %10152 = vst [vmem:[#allocation129_spill] sm:$0xff] %v6808_v31  ;;  %v6813_v22 = vmul.f32 %v10064_v12, %v6054_v34 }
 0x182   : > { %v705_v14 = vmul.f32 0.044715, %v457_v37  ;;  %v5192_v35 = vpop.eup %5191  ;;  %v959_v55 = vmul.f32 0.7978846, %v895_v40  ;;  %v706_v44 = vmul.f32 0.044715, %v570_v20 }
 0x183   : > { %v1085_v46 = vadd.f32 1.0, %v5192_v35  ;;  %v960_v0 = vmul.f32 0.7978846, %v896_v30  ;;  %v6822_v56 = vmul.f32 0.5, %v457_v37  ;;  %v3536_v48 = vadd.f32 %v3472_v50, %v3406_v51  ;;  %v5194_v3 = vpop.eup %5193 }
 0x184   : > { %v769_v60 = vmul.f32 %v705_v14, %v457_v37  ;;  %v10155_v14 = vrot.slane %v5934_v9, 7  ;;  %5195 = vtanh.f32 %v959_v55  ;;  %v770_v8 = vmul.f32 %v706_v44, %v570_v20 }
 0x185   : > { %v6820_v1 = vmul.f32 %v1085_v46, %v6733_v54  ;;  %v6833_v54 = vmul.f32 %v1084_v41, %v6711_v52  ;;  %v1086_v35 = vadd.f32 1.0, %v5194_v3  ;;  %5197 = vtanh.f32 %v960_v0 }
 0x186   : > { %v833_v59 = vmul.f32 %v769_v60, %v457_v37  ;;  %v2220_v34 = vsel %vm2164_vm1, %v10155_v14, %v10154_v53  ;;  %v9917_v60 = vrot.slane %v6808_v31, 7  ;;  %v834_v53 = vmul.f32 %v770_v8, %v570_v20 }
 0x187   : > { %10153 = vst [vmem:[#allocation130_spill] sm:$0xff] %v6820_v1  ;;  %v2146_v51 = vrot.slane %v6820_v1, 7  ;;  %v9916_v47 = vrot.slane %v6820_v1, 1  ;;  %v10159_v52 = vand.u32 7, %v6736_v24  ;;  %v6861_v0 = vmul.f32 %v5705_v63, %v6808_v31 }
 0x188   : > { %v897_v30 = vadd.f32 %v833_v59, %v457_v37  ;;  %10156 = vst [vmem:[#allocation131_spill] sm:$0xff] %v6833_v54  ;;  %v6857_v37 = vmul.f32 0.5, %v570_v20  ;;  %v6864_v14 = vmul.f32 %v1086_v35, %v6739_v29  ;;  %v898_v3 = vadd.f32 %v834_v53, %v570_v20 }
 0x189   : > { %v460_v40 = vpop.f32.mrf.mxu0  ;;  %v573_v50 = vpop.f32.mrf.mxu1  ;;  %v6841_v44 = vsel %vm2164_vm1, %v9917_v60, %v2146_v51  ;;  %v6849_v59 = vsel %vm2421_vm2, %v9918_v27, %v9916_v47  ;;  %vm6853_vm13 = vcmp.gt.s32.totalorder %v10159_v52, 0  ;;  %10162 = vst [vmem:[#allocation134_spill] sm:$0xff] %v6861_v0  ;;  %v6870_v52 = vsel %vm6608_vm11, %v2220_v34, 0.0 }
 0x18a   : > { %v961_v46 = vmul.f32 0.7978846, %v897_v30  ;;  %10157 = vst [vmem:[#allocation132_spill] sm:$0xff] %v6841_v44  ;;  %v707_v41 = vmul.f32 0.044715, %v460_v40  ;;  %v6866_v30 = vadd.f32 %v3726_v36, %v3536_v48  ;;  %v5196_v60 = vpop.eup %5195  ;;  %v9920_v27 = vrot.slane %v6833_v54, 7 }
 0x18b   : > { %10158 = vst [vmem:[#allocation133_spill] sm:$0xff] %v6849_v59  ;;  %v708_v47 = vmul.f32 0.044715, %v573_v50  ;;  %v9922_v24 = vrot.slane %v6833_v54, 1  ;;  %v2147_v0 = vrot.slane %v6864_v14, 7  ;;  %v9921_v29 = vrot.slane %v6864_v14, 1 }
 0x18c   : > { %10163 = vst [vmem:[#allocation135_spill] sm:$0xff] %v6864_v14  ;;  %5199 = vtanh.f32 %v961_v46  ;;  %v771_v8 = vmul.f32 %v707_v41, %v460_v40  ;;  %v1087_v35 = vadd.f32 1.0, %v5196_v60  ;;  %v962_v20 = vmul.f32 0.7978846, %v898_v3  ;;  %v5198_v46 = vpop.eup %5197 }
 0x18d   : > { %v772_v48 = vmul.f32 %v708_v47, %v573_v50  ;;  %v6878_v53 = vmul.f32 %v5715_v6, %v6833_v54  ;;  %v6884_v43 = vsel %vm2164_vm1, %v9920_v27, %v2147_v0  ;;  %v6892_v34 = vsel %vm2421_vm2, %v9922_v24, %v9921_v29 }
 0x18e   : > { %v835_v36 = vmul.f32 %v771_v8, %v460_v40  ;;  %10165 = vst [vmem:[#allocation137_spill] sm:$0xff] %v6884_v43  ;;  %v6895_v60 = vmul.f32 0.5, %v6866_v30  ;;  %v6898_v47 = vmul.f32 %v1087_v35, %v6794_v17  ;;  %v1088_v41 = vadd.f32 1.0, %v5198_v46 }
 0x18f   : > { %10164 = vst [vmem:[#allocation136_spill] sm:$0xff] %v6878_v53  ;;  %5201 = vtanh.f32 %v962_v20  ;;  %v6902_v53 = vmul.f32 %v5705_v63, %v6820_v1  ;;  %v836_v43 = vmul.f32 %v772_v48, %v573_v50  ;;  %v4046_v29 = vmul.f32 0.044715, %v6866_v30 }
 0x190   : > { %10166 = vst [vmem:[#allocation138_spill] sm:$0xff] %v6892_v34  ;;  %v899_v3 = vadd.f32 %v835_v36, %v460_v40  ;;  %v6907_v34 = vmul.f32 %v5718_v7, %v6820_v1  ;;  %v9928_v17 = vrot.slane %v6898_v47, 7  ;;  %v643_v35 = vmul.f32 0.5, %v460_v40 }
 0x191   : > { %10167 = vst [vmem:[#allocation139_spill] sm:$0xff] %v6898_v47  ;;  %v463_v8 = vpop.f32.mrf.mxu0  ;;  %v576_v27 = vpop.f32.mrf.mxu1  ;;  %v6910_v20 = vmul.f32 0.5, %v573_v50  ;;  %v6913_v36 = vmul.f32 %v1088_v41, %v6798_v15  ;;  %v900_v59 = vadd.f32 %v836_v43, %v573_v50  ;;  %v10173_v54 = vrot.slane %v5981_v32, 1 }
 0x192   : > { %10168 = vst [vmem:[#allocation140_spill] sm:$0xff] %v6902_v53  ;;  %v709_v44 = vmul.f32 0.044715, %v463_v8  ;;  %v5200_v24 = vpop.eup %5199  ;;  %v963_v46 = vmul.f32 0.7978846, %v899_v3  ;;  %v10171_v53 = vld [vmem:[#allocation28_spill] sm:$0xff]  ;;  %v6927_v40 = vmul.f32 %v5725_v13, %v6864_v14  ;;  %v2179_v15 = vsel %vm2164_vm1, %v2146_v51, %v9928_v17 }
 0x193   : > { %10169 = vst [vmem:[#allocation141_spill] sm:$0xff] %v6907_v34  ;;  %v10172_v48 = vrot.slane %v10171_v53, 1  ;;  %v6923_v34 = vmul.f32 %v5715_v6, %v6864_v14  ;;  %v6935_v43 = vsel %vm6853_vm13, %v2179_v15, 0.0  ;;  %v1089_v41 = vadd.f32 1.0, %v5200_v24 }
 0x194   : > { %10170 = vst [vmem:[#allocation142_spill] sm:$0xff] %v6913_v36  ;;  %v773_v50 = vmul.f32 %v709_v44, %v463_v8  ;;  %v4110_v3 = vmul.f32 %v4046_v29, %v6866_v30  ;;  %5203 = vtanh.f32 %v963_v46  ;;  %v710_v14 = vmul.f32 0.044715, %v576_v27 }
 0x195   : > { %v2475_v31 = vsel %vm2421_vm2, %v10173_v54, %v10172_v48  ;;  %10174 = vst [vmem:[#allocation143_spill] sm:$0xff] %v6923_v34  ;;  %v9931_v54 = vrot.slane %v6913_v36, 7  ;;  %v5202_v48 = vpop.eup %5201  ;;  %v2664_v34 = vmul.f32 %v5745_v23, %v6935_v43  ;;  %v964_v44 = vmul.f32 0.7978846, %v900_v59 }
 0x196   : > { %10175 = vst [vmem:[#allocation144_spill] sm:$0xff] %v6927_v40  ;;  %v2730_v40 = vmul.f32 %v5702_v62, %v6898_v47  ;;  %v837_v15 = vmul.f32 %v773_v50, %v463_v8  ;;  %v6949_v24 = vsel %vm6635_vm12, %v2475_v31, 0.0  ;;  %v6957_v46 = vmul.f32 0.5, %v463_v8 }
 0x197   : > { %10176 = vst [vmem:[#allocation145_spill] sm:$0xff] %v6935_v43  ;;  %v2180_v51 = vsel %vm2164_vm1, %v2147_v0, %v9931_v54  ;;  %v1090_v43 = vadd.f32 1.0, %v5202_v48  ;;  %v2731_v59 = vmul.f32 %v5710_v2, %v6913_v36  ;;  %v6964_v38 = vmul.f32 %v1089_v41, %v6822_v56 }
 0x198   : > { %v6951_v29 = vadd.f32 %v2730_v40, %v2664_v34  ;;  %v6955_v17 = vsel %vm6853_vm13, %v2180_v51, 0.0  ;;  %v6966_v31 = vmul.f32 0.5, %v576_v27  ;;  %5205 = vtanh.f32 %v964_v44 }
 0x199   : > { %10178 = vst [vmem:[#allocation147_spill] sm:$0xff] %v6955_v17  ;;  %v466_v1 = vpop.f32.mrf.mxu0  ;;  %v579_v53 = vpop.f32.mrf.mxu1  ;;  %v2665_v0 = vmul.f32 %v10064_v12, %v6955_v17  ;;  %v901_v34 = vadd.f32 %v837_v15, %v463_v8  ;;  %v774_v40 = vmul.f32 %v710_v14, %v576_v27  ;;  %v6971_v50 = vmul.f32 %v5705_v63, %v6898_v47 }
 0x19a   : > { %10177 = vst [vmem:[#allocation146_spill] sm:$0xff] %v6951_v29  ;;  %v4174_v54 = vmul.f32 %v4110_v3, %v6866_v30  ;;  %v5204_v29 = vpop.eup %5203  ;;  %v6978_v56 = vmul.f32 %v1090_v43, %v6857_v37  ;;  %v711_v55 = vmul.f32 0.044715, %v466_v1  ;;  %v6982_v14 = vmul.f32 %v5715_v6, %v6913_v36 }
 0x19b   : > { %10179 = vst [vmem:[#allocation148_spill] sm:$0xff] %v6964_v38  ;;  %v6974_v51 = vadd.f32 %v2731_v59, %v2665_v0  ;;  %v965_v41 = vmul.f32 0.7978846, %v901_v34  ;;  %v838_v17 = vmul.f32 %v774_v40, %v576_v27  ;;  %v1091_v44 = vadd.f32 1.0, %v5204_v29 }
 0x19c   : > { %10180 = vst [vmem:[#allocation149_spill] sm:$0xff] %v6971_v50  ;;  %v712_v15 = vmul.f32 0.044715, %v579_v53  ;;  %v775_v3 = vmul.f32 %v711_v55, %v466_v1  ;;  %v6988_v37 = vmul.f32 %v5702_v62, %v6964_v38  ;;  %v6992_v43 = vmul.f32 %v5705_v63, %v6964_v38 }
 0x19d   : > { %10181 = vst [vmem:[#allocation150_spill] sm:$0xff] %v6974_v51  ;;  %5207 = vtanh.f32 %v965_v41  ;;  %v902_v59 = vadd.f32 %v838_v17, %v576_v27  ;;  %v6994_v34 = vmul.f32 %v1091_v44, %v643_v35  ;;  %v6997_v51 = vmul.f32 0.5, %v466_v1 }
 0x19e   : > { %10182 = vst [vmem:[#allocation151_spill] sm:$0xff] %v6978_v56  ;;  %v776_v40 = vmul.f32 %v712_v15, %v579_v53  ;;  %v5206_v48 = vpop.eup %5205  ;;  %v839_v41 = vmul.f32 %v775_v3, %v466_v1  ;;  %v7002_v0 = vmul.f32 %v5710_v2, %v6978_v56  ;;  %v4238_v35 = vadd.f32 %v4174_v54, %v6866_v30 }
 0x19f   : > { %10183 = vst [vmem:[#allocation152_spill] sm:$0xff] %v6982_v14  ;;  %v966_v8 = vmul.f32 0.7978846, %v902_v59  ;;  %v7008_v44 = vmul.f32 %v5715_v6, %v6978_v56  ;;  %v1092_v15 = vadd.f32 1.0, %v5206_v48  ;;  %v10189_v3 = vrot.slane %v6964_v38, 7 }
 0x1a0   : > { %10184 = vst [vmem:[#allocation153_spill] sm:$0xff] %v6988_v37  ;;  %v2152_v37 = vrot.slane %v6994_v34, 7  ;;  %v903_v59 = vadd.f32 %v839_v41, %v466_v1  ;;  %v7016_v29 = vmul.f32 0.5, %v579_v53  ;;  %v7023_v48 = vadd.f32 %v6817_v49, %v6813_v22 }
 0x1a1   : > { %10185 = vst [vmem:[#allocation154_spill] sm:$0xff] %v6992_v43  ;;  %v469_v27 = vpop.f32.mrf.mxu0  ;;  %v582_v17 = vpop.f32.mrf.mxu1  ;;  %5209 = vtanh.f32 %v966_v8  ;;  %v7019_v30 = vmul.f32 %v1092_v15, %v6910_v20  ;;  %v7034_v20 = vmul.f32 %v5736_v19, %v6309_v10  ;;  %v7038_v15 = vmul.f32 %v5715_v6, %v5934_v9 }
 0x1a2   : > { %10186 = vst [vmem:[#allocation155_spill] sm:$0xff] %v6994_v34  ;;  %v7014_v55 = vsel %vm2164_vm1, %v10189_v3, %v2152_v37  ;;  %v713_v43 = vmul.f32 0.044715, %v469_v27  ;;  %v967_v54 = vmul.f32 0.7978846, %v903_v59 }
 0x1a3   : > { %10187 = vst [vmem:[#allocation156_spill] sm:$0xff] %v7002_v0  ;;  %v840_v0 = vmul.f32 %v776_v40, %v579_v53  ;;  %v5208_v14 = vpop.eup %5207  ;;  %v714_v50 = vmul.f32 0.044715, %v582_v17  ;;  %v2153_v3 = vrot.slane %v7019_v30, 7  ;;  %v7030_v40 = vmul.f32 %v5860_v28, %v10077_v26 }
 0x1a4   : > { %10188 = vst [vmem:[#allocation157_spill] sm:$0xff] %v7008_v44  ;;  %v1093_v1 = vadd.f32 1.0, %v5208_v14  ;;  %v777_v41 = vmul.f32 %v713_v43, %v469_v27  ;;  %v7025_v44 = vmul.f32 0.7978846, %v4238_v35  ;;  %5211 = vtanh.f32 %v967_v54 }
 0x1a5   : > { %10190 = vst [vmem:[#allocation158_spill] sm:$0xff] %v7014_v55  ;;  %v904_v8 = vadd.f32 %v840_v0, %v579_v53  ;;  %v7046_v26 = vmul.f32 %v5702_v62, %v6994_v34  ;;  %v10194_v0 = vrot.slane %v6978_v56, 7  ;;  %v778_v59 = vmul.f32 %v714_v50, %v582_v17 }
 0x1a6   : > { %10191 = vst [vmem:[#allocation159_spill] sm:$0xff] %v7019_v30  ;;  %v7042_v22 = vmul.f32 %v1093_v1, %v6957_v46  ;;  %v841_v35 = vmul.f32 %v777_v41, %v469_v27  ;;  %v7056_v46 = vmul.f32 %v5705_v63, %v6994_v34  ;;  %v7060_v54 = vmul.f32 %v5718_v7, %v6994_v34 }
 0x1a7   : > { %v968_v53 = vmul.f32 0.7978846, %v904_v8  ;;  %v5210_v14 = vpop.eup %5209  ;;  %10193 = vst [vmem:[#allocation161_spill] sm:$0xff] %v7046_v26  ;;  %v7052_v43 = vsel %vm2164_vm1, %v10194_v0, %v2153_v3  ;;  %v7063_v8 = vmul.f32 0.5, %v469_v27  ;;  %v842_v41 = vmul.f32 %v778_v59, %v582_v17 }
 0x1a8   : > { %10192 = vst [vmem:[#allocation160_spill] sm:$0xff] %v7042_v22  ;;  %v2154_v1 = vrot.slane %v7042_v22, 7  ;;  %v1094_v26 = vadd.f32 1.0, %v5210_v14  ;;  %v905_v0 = vadd.f32 %v841_v35, %v469_v27  ;;  %v7072_v56 = vadd.s32 240, %v5712_v4 }
 0x1a9   : > { %10195 = vst [vmem:[#allocation162_spill] sm:$0xff] %v7052_v43  ;;  %v472_v55 = vpop.f32.mrf.mxu0  ;;  %v585_v49 = vpop.f32.mrf.mxu1  ;;  %5213 = vtanh.f32 %v968_v53  ;;  %v7065_v43 = vmul.f32 0.5, %v582_v17  ;;  %v7080_v27 = vmul.f32 %v5710_v2, %v7019_v30  ;;  %v906_v35 = vadd.f32 %v842_v41, %v582_v17 }
 0x1aa   : > { %10196 = vst [vmem:[#allocation163_spill] sm:$0xff] %v7056_v46  ;;  %v7069_v50 = vsel %vm2164_vm1, %v2152_v37, %v2154_v1  ;;  %v715_v46 = vmul.f32 0.044715, %v472_v55  ;;  %v7076_v34 = vmul.f32 %v1094_v26, %v6966_v31  ;;  %v969_v38 = vmul.f32 0.7978846, %v905_v0  ;;  %v5212_v53 = vpop.eup %5211 }
 0x1ab   : > { %10197 = vst [vmem:[#allocation164_spill] sm:$0xff] %v7060_v54  ;;  %v716_v14 = vmul.f32 0.044715, %v585_v49  ;;  %v7084_v37 = vmul.f32 %v5715_v6, %v7019_v30  ;;  %v7093_v0 = vadd.s32 248, %v5712_v4  ;;  %v7097_v54 = vmul.f32 %v5702_v62, %v7042_v22 }
 0x1ac   : > { %10198 = vst [vmem:[#allocation165_spill] sm:$0xff] %v7069_v50  ;;  %v779_v59 = vmul.f32 %v715_v46, %v472_v55  ;;  %v7088_v50 = vmul.f32 %v5725_v13, %v7019_v30  ;;  %v2155_v26 = vrot.slane %v7076_v34, 7  ;;  %5215 = vtanh.f32 %v969_v38 }
 0x1ad   : > { %10199 = vst [vmem:[#allocation166_spill] sm:$0xff] %v7072_v56  ;;  %v7101_v46 = vmul.f32 %v5705_v63, %v7042_v22  ;;  %v7111_v36 = vmul.f32 %v5718_v7, %v7042_v22 }
 0x1ae   : > { %10200 = vst [vmem:[#allocation167_spill] sm:$0xff] %v7076_v34  ;;  %v7105_v41 = vsel %vm2164_vm1, %v2153_v3, %v2155_v26  ;;  %v843_v31 = vmul.f32 %v779_v59, %v472_v55  ;;  %v4583_v59 = vld [vmem:[%s9812_s3 + $0xf8] sm:$0xff] }
 0x1af   : > { %10201 = vst [vmem:[#allocation168_spill] sm:$0xff] %v7080_v27  ;;  %v1095_v27 = vadd.f32 1.0, %v5212_v53  ;;  %v5214_v17 = vpop.eup %5213  ;;  %4697 = vmatpush.msrb.mxu1 %v4583_v59  ;;  %5027 = vmatpush.msra.mxu3 %v4583_v59 }
 0x1b0   : > { %10202 = vst [vmem:[#allocation169_spill] sm:$0xff] %v7084_v37  ;;  %v970_v37 = vmul.f32 0.7978846, %v906_v35  ;;  %v1096_v53 = vadd.f32 1.0, %v5214_v17  ;;  %v7116_v35 = vmul.f32 0.5, %v472_v55 }
 0x1b1   : > { %10203 = vst [vmem:[#allocation170_spill] sm:$0xff] %v7088_v50  ;;  %v780_v50 = vmul.f32 %v716_v14, %v585_v49  ;;  %v7107_v30 = vpop.f32.mrf.mxu0  ;;  %v7114_v38 = vmul.f32 %v1095_v27, %v6997_v51  ;;  %v4567_v14 = vld [vmem:[%s9812_s3 + $0x78] sm:$0xff]  ;;  %v7126_v51 = vmul.f32 0.5, %v585_v49  ;;  %v4582_v27 = vld [vmem:[%s9812_s3 + $0xf0] sm:$0xff] }
 0x1b2   : > { %10204 = vst [vmem:[#allocation171_spill] sm:$0xff] %v7093_v0  ;;  %5217 = vtanh.f32 %v970_v37  ;;  %v717_v3 = vmul.f32 0.044715, %v7107_v30  ;;  %4584 = vmatpush.msrb.mxu0 %v4567_v14  ;;  %5011 = vmatpush.msra.mxu2 %v4567_v14  ;;  %v5216_v37 = vpop.eup %5215 }
 0x1b3   : > { %10205 = vst [vmem:[#allocation172_spill] sm:$0xff] %v7097_v54  ;;  %v907_v54 = vadd.f32 %v843_v31, %v472_v55  ;;  %v7132_v55 = vmul.f32 %v5710_v2, %v7076_v34  ;;  %4698 = vmatpush.msrb.mxu1 %v4582_v27  ;;  %5028 = vmatpush.msra.mxu3 %v4582_v27  ;;  %v1097_v14 = vadd.f32 1.0, %v5216_v37  ;;  %v4580_v27 = vld [vmem:[%s9812_s3 + $0xe0] sm:$0xff] }
 0x1b4   : > { %10206 = vst [vmem:[#allocation173_spill] sm:$0xff] %v7101_v46  ;;  %v844_v46 = vmul.f32 %v780_v50, %v585_v49  ;;  %v7135_v50 = vmul.f32 %v1096_v53, %v7016_v29  ;;  %v10213_v29 = vrot.slane %v7114_v38, 7  ;;  %v7159_v53 = vmul.f32 %v5725_v13, %v7076_v34 }
 0x1b5   : > { %10207 = vst [vmem:[#allocation174_spill] sm:$0xff] %v7105_v41  ;;  %v971_v31 = vmul.f32 0.7978846, %v907_v54  ;;  %v781_v54 = vmul.f32 %v717_v3, %v7107_v30  ;;  %v7164_v41 = vmul.f32 0.5, %v7107_v30  ;;  %v4581_v3 = vld [vmem:[%s9812_s3 + $0xe8] sm:$0xff]  ;;  %v7196_v22 = vmul.f32 %v5705_v63, %v7114_v38 }
 0x1b6   : > { %10208 = vst [vmem:[#allocation175_spill] sm:$0xff] %v7111_v36  ;;  %v908_v17 = vadd.f32 %v844_v46, %v585_v49  ;;  %v4566_v36 = vld [vmem:[%s9812_s3 + $0x70] sm:$0xff]  ;;  %v7152_v49 = vsel %vm2164_vm1, %v2154_v1, %v10213_v29  ;;  %v7155_v46 = vpop.f32.mrf.mxu1  ;;  %v2157_v59 = vrot.slane %v7135_v50, 7  ;;  %v4565_v1 = vld [vmem:[%s9812_s3 + $0x68] sm:$0xff]  ;;  %4699 = vmatpush.msrb.mxu1 %v4581_v3  ;;  %5029 = vmatpush.msra.mxu3 %v4581_v3 }
 0x1b7   : > { %10209 = vst [vmem:[#allocation176_spill] sm:$0xff] %v7114_v38  ;;  %4585 = vmatpush.msrb.mxu0 %v4566_v36  ;;  %5012 = vmatpush.msra.mxu2 %v4566_v36  ;;  %5219 = vtanh.f32 %v971_v31  ;;  %v4564_v36 = vld [vmem:[%s9812_s3 + $0x60] sm:$0xff]  ;;  %v718_v37 = vmul.f32 0.044715, %v7155_v46  ;;  %v4563_v31 = vld [vmem:[%s9812_s3 + $0x58] sm:$0xff] }
 0x1b8   : > { %10210 = vst [vmem:[#allocation177_spill] sm:$0xff] %v7132_v55  ;;  %v7146_v55 = vmul.f32 %v5715_v6, %v7076_v34  ;;  %v5218_v29 = vpop.eup %5217  ;;  %4700 = vmatpush.msrb.mxu1 %v4580_v27  ;;  %5030 = vmatpush.msra.mxu3 %v4580_v27  ;;  %v4577_v27 = vld [vmem:[%s9812_s3 + $0xc8] sm:$0xff] }
 0x1b9   : > { %10211 = vst [vmem:[#allocation178_spill] sm:$0xff] %v7135_v50  ;;  %4586 = vmatpush.msrb.mxu0 %v4565_v1  ;;  %v1098_v34 = vadd.f32 1.0, %v5218_v29  ;;  %5013 = vmatpush.msra.mxu2 %v4565_v1  ;;  %v782_v29 = vmul.f32 %v718_v37, %v7155_v46  ;;  %v2881_v37 = vadd.f32 %v7030_v40, %v7023_v48 }
 0x1ba   : > { %10212 = vst [vmem:[#allocation179_spill] sm:$0xff] %v7146_v55  ;;  %v7174_v55 = vmul.f32 %v5702_v62, %v7114_v38 }
 0x1bb   : > { %10214 = vst [vmem:[#allocation180_spill] sm:$0xff] %v7152_v49  ;;  %v972_v49 = vmul.f32 0.7978846, %v908_v17  ;;  %v4579_v17 = vld [vmem:[%s9812_s3 + $0xd8] sm:$0xff]  ;;  %4587 = vmatpush.msrb.mxu0 %v4564_v36  ;;  %v7206_v1 = vmul.f32 %v1098_v34, %v7065_v43  ;;  %5014 = vmatpush.msra.mxu2 %v4564_v36  ;;  %v7220_v34 = vmul.f32 %v5710_v2, %v7135_v50  ;;  %v7224_v43 = vmul.f32 0.5, %v7155_v46  ;;  %v4561_v36 = vld [vmem:[%s9812_s3 + $0x48] sm:$0xff] }
 0x1bc   : > { %10215 = vst [vmem:[#allocation181_spill] sm:$0xff] %v7159_v53  ;;  %v7184_v53 = vsel %vm2164_vm1, %v2155_v26, %v2157_v59  ;;  %v7200_v26 = vmul.f32 %v5718_v7, %v7114_v38  ;;  %4701 = vmatpush.msrb.mxu1 %v4579_v17  ;;  %5031 = vmatpush.msra.mxu3 %v4579_v17 }
 0x1bd   : > { %10216 = vst [vmem:[#allocation182_spill] sm:$0xff] %v7174_v55  ;;  %v845_v55 = vmul.f32 %v781_v54, %v7107_v30  ;;  %v7203_v54 = vmul.f32 %v1097_v14, %v7063_v8  ;;  %5221 = vtanh.f32 %v972_v49  ;;  %v4578_v8 = vld [vmem:[%s9812_s3 + $0xd0] sm:$0xff]  ;;  %4588 = vmatpush.msrb.mxu0 %v4563_v31  ;;  %5015 = vmatpush.msra.mxu2 %v4563_v31  ;;  %v5220_v49 = vpop.eup %5219 }
 0x1be   : > { %10217 = vst [vmem:[#allocation183_spill] sm:$0xff] %v7184_v53  ;;  %5223 = vtanh.f32 %v7025_v44  ;;  %v7232_v44 = vmul.f32 %v5725_v13, %v7135_v50  ;;  %4702 = vmatpush.msrb.mxu1 %v4578_v8  ;;  %v1099_v40 = vadd.f32 1.0, %v5220_v49  ;;  %5032 = vmatpush.msra.mxu3 %v4578_v8  ;;  %v7276_v8 = vld [vmem:[%s9811_s2 + $0x18] ss:$0 sm:$0xff] }
 0x1bf   : > { %10218 = vst [vmem:[#allocation184_spill] sm:$0xff] %v7196_v22  ;;  %v909_v3 = vadd.f32 %v845_v55, %v7107_v30  ;;  %v4562_v22 = vld [vmem:[%s9812_s3 + $0x50] sm:$0xff]  ;;  %v9947_v30 = vrot.slane %v7203_v54, 7  ;;  %v7228_v55 = vmul.f32 %v5715_v6, %v7135_v50  ;;  %v3473_v49 = vmul.f32 %v7276_v8, %v6949_v24 }
 0x1c0   : > { %10219 = vst [vmem:[#allocation185_spill] sm:$0xff] %v7200_v26  ;;  %4589 = vmatpush.msrb.mxu0 %v4562_v22  ;;  %v846_v26 = vmul.f32 %v782_v29, %v7155_v46  ;;  %5016 = vmatpush.msra.mxu2 %v4562_v22  ;;  %v3343_v22 = vmul.f32 %v5725_v13, %v5981_v32 }
 0x1c1   : > { %10220 = vst [vmem:[#allocation186_spill] sm:$0xff] %v7203_v54  ;;  %v973_v14 = vmul.f32 0.7978846, %v909_v3  ;;  %v4560_v3 = vld [vmem:[%s9812_s3 + $0x40] sm:$0xff]  ;;  %4703 = vmatpush.msrb.mxu1 %v4577_v27  ;;  %v7281_v17 = vmul.f32 %v1099_v40, %v7116_v35  ;;  %5033 = vmatpush.msra.mxu3 %v4577_v27  ;;  %v7292_v50 = vmul.f32 %v5702_v62, %v7203_v54  ;;  %v10236_v40 = vand.u32 7, %v5712_v4  ;;  %v4574_v27 = vld [vmem:[%s9812_s3 + $0xb0] sm:$0xff] }
 0x1c2   : > { %10221 = vst [vmem:[#allocation187_spill] sm:$0xff] %v7206_v1  ;;  %4590 = vmatpush.msrb.mxu0 %v4561_v36  ;;  %5017 = vmatpush.msra.mxu2 %v4561_v36  ;;  %v7296_v35 = vmul.f32 %v5705_v63, %v7203_v54  ;;  %v7311_v36 = vmul.f32 %v5715_v6, %v7206_v1 }
 0x1c3   : > { %10222 = vst [vmem:[#allocation188_spill] sm:$0xff] %v7220_v34  ;;  %v10225_v34 = vrot.slane %v7114_v38, 7  ;;  %5225 = vtanh.f32 %v973_v14  ;;  %vm7316_vm14 = vcmp.gt.s32.totalorder %v10236_v40, 0 }
 0x1c4   : > { %10223 = vst [vmem:[#allocation189_spill] sm:$0xff] %v7228_v55  ;;  %v3079_v55 = vadd.f32 %v7038_v15, %v7034_v20  ;;  %v3145_v20 = vmul.f32 %v10078_v25, %v6315_v45  ;;  %v5222_v15 = vpop.eup %5221  ;;  %4591 = vmatpush.msrb.mxu0 %v4560_v3  ;;  %5018 = vmatpush.msra.mxu2 %v4560_v3 }
 0x1c5   : > { %10224 = vst [vmem:[#allocation190_spill] sm:$0xff] %v7232_v44  ;;  %v7249_v31 = vsel %vm2164_vm1, %v10225_v34, %v9947_v30  ;;  %v10227_v44 = vrot.slane %v7206_v1, 7  ;;  %v4576_v34 = vld [vmem:[%s9812_s3 + $0xc0] sm:$0xff]  ;;  %v1100_v14 = vadd.f32 1.0, %v5222_v15  ;;  %v910_v30 = vadd.f32 %v846_v26, %v7155_v46 }
 0x1c6   : > { %10226 = vst [vmem:[#allocation191_spill] sm:$0xff] %v7249_v31  ;;  %v4575_v31 = vld [vmem:[%s9812_s3 + $0xb8] sm:$0xff]  ;;  %v3209_v53 = vadd.f32 %v3145_v20, %v3079_v55  ;;  %v7300_v46 = vmul.f32 %v5718_v7, %v7203_v54  ;;  %4704 = vmatpush.msrb.mxu1 %v4576_v34  ;;  %v7303_v26 = vadd.s32 40, %v5712_v4  ;;  %v7307_v55 = vmul.f32 %v5710_v2, %v7206_v1 }
 0x1c7   : > { %v7258_v48 = vsel %vm2164_vm1, %v2157_v59, %v10227_v44  ;;  %v10229_v59 = vld [vmem:[#allocation15_spill] sm:$0xff]  ;;  %v5224_v44 = vpop.eup %5223  ;;  %10231 = vst [vmem:[#allocation193_spill] sm:$0xff] %v7292_v50  ;;  %v10239_v15 = vand.u32 7, %v7093_v0  ;;  %5034 = vmatpush.msra.mxu3 %v4576_v34  ;;  %v974_v0 = vmul.f32 0.7978846, %v910_v30  ;;  %v4573_v30 = vld [vmem:[%s9812_s3 + $0xa8] sm:$0xff]  ;;  %v7356_v34 = vmul.f32 %v5702_v62, %v7281_v17 }
 0x1c8   : > { %10228 = vst [vmem:[#allocation192_spill] sm:$0xff] %v7258_v48  ;;  %v3277_v29 = vmul.f32 %v10229_v59, %v6870_v52  ;;  %v4559_v48 = vld [vmem:[%s9812_s3 + $0x38] sm:$0xff]  ;;  %4705 = vmatpush.msrb.mxu1 %v4575_v31  ;;  %v4430_v3 = vadd.f32 1.0, %v5224_v44  ;;  %v3727_v44 = vadd.f32 %v3209_v53, %v2881_v37  ;;  %v7370_v53 = vmul.f32 %v5705_v63, %v7281_v17 }
 0x1c9   : > { %10230 = vst [vmem:[#allocation15_spill] sm:$0xff] %v7281_v17  ;;  %vm7322_vm15 = vcmp.gt.s32.totalorder %v10239_v15, 0  ;;  %v7337_v15 = vmul.f32 %v1100_v14, %v7126_v51  ;;  %4592 = vmatpush.msrb.mxu0 %v4559_v48  ;;  %5019 = vmatpush.msra.mxu2 %v4559_v48  ;;  %v4557_v51 = vld [vmem:[%s9812_s3 + $0x28] sm:$0xff]  ;;  %v5226_v14 = vpop.eup %5225  ;;  %v10248_v48 = vrot.slane %v10123_v11, 7  ;;  %5227 = vtanh.f32 %v974_v0 }
 0x1ca   : > { %10232 = vst [vmem:[#allocation194_spill] sm:$0xff] %v7296_v35  ;;  %v3407_v40 = vadd.f32 %v3343_v22, %v3277_v29  ;;  %v10244_v35 = vrot.slane %v7281_v17, 7  ;;  %5035 = vmatpush.msra.mxu3 %v4575_v31  ;;  %4706 = vmatpush.msrb.mxu1 %v4574_v27  ;;  %v1243_v31 = vand.u32 7, %v7303_v26  ;;  %v1101_v37 = vadd.f32 1.0, %v5226_v14  ;;  %v4572_v26 = vld [vmem:[%s9812_s3 + $0xa0] sm:$0xff] }
 0x1cb   : > { %10233 = vst [vmem:[#allocation195_spill] sm:$0xff] %v7300_v46  ;;  %v10245_v46 = vrot.slane %v7203_v54, 7  ;;  %v10252_v0 = vrot.slane %v7206_v1, 7  ;;  %v10255_v14 = vmov 0 }
 0x1cc   : > { %10234 = vst [vmem:[#allocation196_spill] sm:$0xff] %v7307_v55  ;;  %v4558_v55 = vld [vmem:[%s9812_s3 + $0x30] sm:$0xff]  ;;  %v3537_v22 = vadd.f32 %v3473_v49, %v3407_v40  ;;  %5036 = vmatpush.msra.mxu3 %v4574_v27  ;;  %v4556_v49 = vld [vmem:[%s9812_s3 + $0x20] sm:$0xff]  ;;  %v10254_v27 = vand.u32 7, %v7072_v56  ;;  %4707 = vmatpush.msrb.mxu1 %v4573_v30  ;;  %vm7423_vm4 = vcmp.gt.s32.totalorder %v1243_v31, 0  ;;  %vm7445_vm5 = vcmp.lt.s32.totalorder %v1243_v31, 7 }
 0x1cd   : > { %10235 = vst [vmem:[#allocation197_spill] sm:$0xff] %v7311_v36  ;;  %v7334_v36 = vmul.f32 %v5725_v13, %v7206_v1  ;;  %v7346_v29 = vsel %vm2164_vm1, %v10245_v46, %v10244_v35  ;;  %v9951_v35 = vrot.slane %v7337_v15, 7  ;;  %4593 = vmatpush.msrb.mxu0 %v4558_v55  ;;  %v10249_v46 = vrot.slane %v5973_v16, 7  ;;  %5020 = vmatpush.msra.mxu2 %v4558_v55  ;;  %v10270_v56 = vld [vmem:[#allocation13_spill] sm:$0xff] }
 0x1ce   : > { %10243 = vst [vmem:[#allocation199_spill] sm:$0xff] %v7337_v15  ;;  %v7378_v40 = vadd.f32 %v3727_v44, %v3537_v22  ;;  %vm7395_vm3 = vcmp.lt.s32.totalorder %v10254_v27, 7  ;;  %v7400_v22 = vmul.f32 %v4430_v3, %v6895_v60  ;;  %5037 = vmatpush.msra.mxu3 %v4573_v30  ;;  %v4555_v27 = vld [vmem:[%s9812_s3 + $0x18] sm:$0xff]  ;;  %v7417_v3 = vmul.f32 %v5715_v6, %v7337_v15 }
 0x1cf   : > { %10242 = vst [vmem:[#allocation198_spill] sm:$0xff] %v7334_v36  ;;  %v7391_v55 = vsel %vm2164_vm1, %v10252_v0, %v9951_v35  ;;  %v10256_v14 = vsel %vm7395_vm3, 4294967295, %v10255_v14  ;;  %4594 = vmatpush.msrb.mxu0 %v4557_v51  ;;  %v1165_v0 = vmul.f32 %v1101_v37, %v7164_v41  ;;  %5021 = vmatpush.msra.mxu2 %v4557_v51  ;;  %v4571_v35 = vld [vmem:[%s9812_s3 + $0x98] sm:$0xff]  ;;  %v10271_v1 = vrot.slane %v10270_v56, 7 }
 0x1d0   : > { %10246 = vst [vmem:[#allocation200_spill] sm:$0xff] %v7346_v29  ;;  %v7366_v29 = vsel %vm2164_vm1, %v10249_v46, %v10248_v48  ;;  %v7383_v46 = vmul.f32 %v5718_v7, %v7281_v17  ;;  %v7405_v48 = vmul.f32 %v5710_v2, %v7337_v15  ;;  %v4047_v60 = vmul.f32 0.044715, %v7378_v40  ;;  %4708 = vmatpush.msrb.mxu1 %v4572_v26 }
 0x1d1   : > { %10247 = vst [vmem:[#allocation201_spill] sm:$0xff] %v7356_v34  ;;  %v7421_v44 = vmul.f32 %v5725_v13, %v7337_v15  ;;  %4595 = vmatpush.msrb.mxu0 %v4556_v49  ;;  %v2622_v51 = vmul.f32 %v5745_v23, %v6163_v33  ;;  %v2162_v30 = vrot.slane %v1165_v0, 7  ;;  %v2419_v37 = vrot.slane %v1165_v0, 1  ;;  %5022 = vmatpush.msra.mxu2 %v4556_v49  ;;  %v10264_v34 = vld [vmem:[#allocation31_spill] sm:$0xff]  ;;  %v4570_v49 = vld [vmem:[%s9812_s3 + $0x90] sm:$0xff] }
 0x1d2   : > { %10250 = vst [vmem:[#allocation202_spill] sm:$0xff] %v7370_v53  ;;  %5038 = vmatpush.msra.mxu3 %v4572_v26  ;;  %v10266_v53 = vrot.slane %v10123_v11, 1  ;;  %v3070_v33 = vmul.f32 %v5705_v63, %v1165_v0  ;;  %4709 = vmatpush.msrb.mxu1 %v4571_v35  ;;  %v4111_v26 = vmul.f32 %v4047_v60, %v7378_v40  ;;  %v10272_v31 = vrot.slane %v7281_v17, 1 }
 0x1d3   : > { %10251 = vst [vmem:[#allocation203_spill] sm:$0xff] %v7383_v46  ;;  %4596 = vmatpush.msrb.mxu0 %v4555_v27  ;;  %v2227_v54 = vsel %vm2164_vm1, %v2162_v30, %v10271_v1  ;;  %v3396_v38 = vmul.f32 %v5718_v7, %v1165_v0  ;;  %5023 = vmatpush.msra.mxu2 %v4555_v27  ;;  %v4569_v1 = vld [vmem:[%s9812_s3 + $0x88] sm:$0xff] }
 0x1d4   : > { %10253 = vst [vmem:[#allocation204_spill] sm:$0xff] %v7391_v55  ;;  %v2688_v55 = vmul.f32 %v5702_v62, %v5916_v61  ;;  %v10269_v61 = vrot.slane %v7281_v17, 7  ;;  %v2422_v60 = vsel %vm2421_vm2, %v10272_v31, %v2419_v37  ;;  %5039 = vmatpush.msra.mxu3 %v4571_v35  ;;  %v10273_v0 = vld [vmem:[#allocation9_spill] sm:$0xff]  ;;  %4710 = vmatpush.msrb.mxu1 %v4570_v49 }
 0x1d5   : > { %10257 = vst [vmem:[#allocation205_spill] sm:$0xff] %v10256_v14  ;;  %v3147_v46 = vmul.f32 %v10078_v25, %v6949_v24 }
 0x1d6   : > { %10258 = vst [vmem:[#allocation206_spill] sm:$0xff] %v7400_v22  ;;  %v2165_v36 = vsel %vm2164_vm1, %v10269_v61, %v2162_v30  ;;  %v2293_v61 = vsel %vm7316_vm14, %v2227_v54, 0.0  ;;  %v7476_v30 = vadd.f32 %v2688_v55, %v2622_v51  ;;  %v4552_v54 = vld [vmem:[%s9812_s3] sm:$0xff]  ;;  %5040 = vmatpush.msra.mxu3 %v4570_v49  ;;  %4711 = vmatpush.msrb.mxu1 %v4569_v1 }
 0x1d7   : > { %10259 = vst [vmem:[#allocation207_spill] sm:$0xff] %v7405_v48  ;;  %v4554_v48 = vld [vmem:[%s9812_s3 + $0x10] sm:$0xff]  ;;  %v2355_v47 = vsel %vm7322_vm15, %v2165_v36, 0.0  ;;  %v2942_v27 = vmul.f32 %v10273_v0, %v2293_v61  ;;  %v7485_v36 = vmul.f32 0.5, %v7378_v40  ;;  %v4568_v55 = vld [vmem:[%s9812_s3 + $0x80] sm:$0xff]  ;;  %v2616_v51 = vmul.f32 %v5745_v23, %v2293_v61 }
 0x1d8   : > { %10260 = vst [vmem:[#allocation208_spill] sm:$0xff] %v7417_v3  ;;  %v10265_v3 = vrot.slane %v10264_v34, 1  ;;  %4597 = vmatpush.msrb.mxu0 %v4554_v48  ;;  %v3004_v31 = vmul.f32 %v10273_v0, %v2355_v47  ;;  %v3330_v17 = vmul.f32 %v10147_v57, %v2355_v47  ;;  %5024 = vmatpush.msra.mxu2 %v4554_v48  ;;  %v7496_v48 = vsel %vm7423_vm4, %v7366_v29, 0.0 }
 0x1d9   : > { %10261 = vst [vmem:[#allocation209_spill] sm:$0xff] %v7421_v44  ;;  %v4175_v47 = vmul.f32 %v4111_v26, %v7378_v40  ;;  %v10277_v61 = vrot.slane %v10270_v56, 1  ;;  %5041 = vmatpush.msra.mxu3 %v4569_v1  ;;  %4712 = vmatpush.msrb.mxu1 %v4568_v55  ;;  %v10281_v56 = vld [vmem:[#allocation17_spill] sm:$0xff] }
 0x1da   : > { %v2472_v44 = vsel %vm2421_vm2, %v10266_v53, %v10265_v3  ;;  %v7451_v53 = vmul.f32 %v5791_v58, %v6167_v42  ;;  %v5228_v3 = vpop.eup %5227  ;;  %v4553_v42 = vld [vmem:[%s9812_s3 + $0x8] sm:$0xff]  ;;  %v7500_v58 = vadd.f32 %v3396_v38, %v3330_v17  ;;  %v2950_v38 = vmul.f32 %v10273_v0, %v6652_v39 }
 0x1db   : > { %v1102_v22 = vadd.f32 1.0, %v5228_v3  ;;  %4598 = vmatpush.msrb.mxu0 %v4553_v42  ;;  %v7498_v3 = vadd.f32 %v3070_v33, %v3004_v31  ;;  %5025 = vmatpush.msra.mxu2 %v4553_v42  ;;  %v7505_v49 = vsel %vm7445_vm5, %v2472_v44, 0.0  ;;  %v7511_v26 = vsel %vm2421_vm2, %v2419_v37, %v10277_v61  ;;  %v10280_v44 = vld [vmem:[#allocation21_spill] sm:$0xff]  ;;  %v10283_v31 = vld [vmem:[#allocation14_spill] sm:$0xff] }
 0x1dc   : > { %10275 = vst [vmem:[#allocation13_spill] sm:$0xff] %v7500_v58  ;;  %v7517_v17 = vsel %vm7395_vm3, %v2422_v60, 0.0  ;;  %v2746_v42 = vadd.f32 %v10281_v56, %v2616_v51  ;;  %v4239_v37 = vadd.f32 %v4175_v47, %v7378_v40  ;;  %v10285_v60 = vrot.slane %v7337_v15, 1  ;;  %5042 = vmatpush.msra.mxu3 %v4568_v55 }
 0x1dd   : > { %v1166_v35 = vmul.f32 %v1102_v22, %v7224_v43  ;;  %10274 = vst [vmem:[#allocation31_spill] sm:$0xff] %v7498_v3  ;;  %v10276_v43 = vld [vmem:[#allocation18_spill] sm:$0xff]  ;;  %4599 = vmatpush.msrb.mxu0 %v4552_v54  ;;  %5026 = vmatpush.msra.mxu2 %v4552_v54  ;;  %v10289_v55 = vrot.slane %v10283_v31, 1 }
 0x1de   : > { %v3072_v22 = vadd.f32 %v10276_v43, %v2942_v27  ;;  %10278 = vst [vmem:[#allocation9_spill] sm:$0xff] %v7511_v26  ;;  %v10282_v27 = vrot.slane %v7337_v15, 7  ;;  %v10284_v43 = vrot.slane %v10283_v31, 7  ;;  %v10294_v26 = vld [vmem:[#allocation29_spill] sm:$0xff]  ;;  %v10295_v31 = vld [vmem:[#allocation19_spill] sm:$0xff] }
 0x1df   : > { %v2163_v29 = vrot.slane %v1166_v35, 7  ;;  %v2420_v62 = vrot.slane %v1166_v35, 1  ;;  %10279 = vst [vmem:[#allocation18_spill] sm:$0xff] %v7517_v17  ;;  %v3071_v54 = vmul.f32 %v5715_v6, %v1166_v35  ;;  %v3397_v47 = vmul.f32 %v5725_v13, %v1166_v35 }
 0x1e0   : > { %v3202_v33 = vadd.f32 %v10280_v44, %v3072_v22  ;;  %v10287_v44 = vld [vmem:[#allocation23_spill] sm:$0xff]  ;;  %v4303_v35 = vmul.f32 0.7978846, %v4239_v37  ;;  %v3016_v37 = vmul.f32 %v5705_v63, %v5973_v16 }
 0x1e1   : > { %v2166_v1 = vsel %vm2164_vm1, %v10282_v27, %v2163_v29  ;;  %v2228_v61 = vsel %vm2164_vm1, %v2163_v29, %v10284_v43  ;;  %v7534_v22 = vsel %vm2421_vm2, %v10285_v60, %v2420_v62  ;;  %v10288_v60 = vld [vmem:[#allocation27_spill] sm:$0xff]  ;;  %v7551_v20 = vsel %vm2421_vm2, %v2420_v62, %v10289_v55  ;;  %v10296_v62 = vld [vmem:[#allocation24_spill] sm:$0xff] }
 0x1e2   : > { %10286 = vst [vmem:[#allocation21_spill] sm:$0xff] %v7534_v22  ;;  %v2294_v40 = vsel %vm7316_vm14, %v2228_v61, 0.0  ;;  %v2356_v51 = vsel %vm7322_vm15, %v2166_v1, 0.0  ;;  %v3912_v56 = vadd.f32 %v10287_v44, %v3202_v33  ;;  %v2876_v3 = vadd.f32 %v10288_v60, %v2746_v42  ;;  %v10293_v44 = vld [vmem:[#allocation20_spill] sm:$0xff] }
 0x1e3   : > { %v2943_v29 = vmul.f32 %v5736_v19, %v2294_v40  ;;  %v3005_v27 = vmul.f32 %v5736_v19, %v2356_v51  ;;  %v3331_v43 = vmul.f32 %v10229_v59, %v2356_v51  ;;  %10290 = vst [vmem:[#allocation17_spill] sm:$0xff] %v7551_v20  ;;  %v2617_v1 = vmul.f32 %v10064_v12, %v2294_v40  ;;  %v10297_v20 = vld [vmem:[#allocation32_spill] sm:$0xff] }
 0x1e4   : > { %v4040_v50 = vmul.f32 0.044715, %v3912_v56  ;;  %v3722_v51 = vadd.f32 %v10294_v26, %v2876_v3  ;;  %v7560_v17 = vmul.f32 0.5, %v3912_v56  ;;  %5229 = vtanh.f32 %v4303_v35  ;;  %v10300_v35 = vld [vmem:[#allocation37_spill] sm:$0xff]  ;;  %v10302_v22 = vld [vmem:[#allocation28_spill] sm:$0xff] }
 0x1e5   : > { %v7554_v61 = vadd.f32 %v3071_v54, %v3005_v27  ;;  %v7556_v33 = vadd.f32 %v3397_v47, %v3331_v43  ;;  %v3073_v58 = vadd.f32 %v10293_v44, %v2943_v29  ;;  %v2747_v60 = vadd.f32 %v10295_v31, %v2617_v1  ;;  %v10298_v47 = vld [vmem:[#allocation30_spill] sm:$0xff]  ;;  %v10299_v27 = vld [vmem:[#allocation25_spill] sm:$0xff] }
 0x1e6   : > { %v4104_v42 = vmul.f32 %v4040_v50, %v3912_v56  ;;  %v3914_v15 = vadd.f32 %v3722_v51, %v10297_v20  ;;  %v3146_v54 = vmul.f32 %v5733_v18, %v6661_v5  ;;  %v3278_v3 = vmul.f32 %v10147_v57, %v7496_v48 }
 0x1e7   : > { %10291 = vst [vmem:[#allocation14_spill] sm:$0xff] %v7554_v61  ;;  %v3203_v55 = vadd.f32 %v10296_v62, %v3073_v58  ;;  %v2877_v29 = vadd.f32 %v10298_v47, %v2747_v60  ;;  %v3344_v26 = vmul.f32 %v5718_v7, %v10123_v11  ;;  %v2882_v20 = vadd.f32 %v7451_v53, %v7476_v30 }
 0x1e8   : > { %10292 = vst [vmem:[#allocation23_spill] sm:$0xff] %v7556_v33  ;;  %v4168_v40 = vmul.f32 %v4104_v42, %v3912_v56  ;;  %v4042_v58 = vmul.f32 0.044715, %v3914_v15  ;;  %v3080_v50 = vadd.f32 %v3016_v37, %v2950_v38  ;;  %v3474_v42 = vmul.f32 %v6803_v21, %v7505_v49 }
 0x1e9   : > { %v3913_v43 = vadd.f32 %v10299_v27, %v3203_v55  ;;  %v3723_v44 = vadd.f32 %v10300_v35, %v2877_v29  ;;  %v3408_v51 = vadd.f32 %v3344_v26, %v3278_v3  ;;  %v7580_v60 = vmul.f32 0.5, %v3914_v15  ;;  %v10301_v55 = vld [vmem:[#allocation38_spill] sm:$0xff] }
 0x1ea   : > { %v4232_v1 = vadd.f32 %v4168_v40, %v3912_v56  ;;  %v4106_v62 = vmul.f32 %v4042_v58, %v3914_v15  ;;  %v3210_v47 = vadd.f32 %v3146_v54, %v3080_v50  ;;  %v5230_v61 = vpop.eup %5229  ;;  %v10303_v53 = vrot.slane %v10302_v22, 7 }
 0x1eb   : > { %v4041_v31 = vmul.f32 0.044715, %v3913_v43  ;;  %v3915_v27 = vadd.f32 %v3723_v44, %v10301_v55  ;;  %v3538_v14 = vadd.f32 %v3474_v42, %v3408_v51  ;;  %v10304_v30 = vrot.slane %v5981_v32, 7  ;;  %v10305_v44 = vld [vmem:[#allocation34_spill] sm:$0xff] }
 0x1ec   : > { %v4296_v33 = vmul.f32 0.7978846, %v4232_v1  ;;  %v4170_v37 = vmul.f32 %v4106_v62, %v3914_v15  ;;  %v4431_v21 = vadd.f32 1.0, %v5230_v61  ;;  %v3728_v40 = vadd.f32 %v3210_v47, %v2882_v20 }
 0x1ed   : > { %v2218_v38 = vsel %vm2164_vm1, %v10304_v30, %v10303_v53  ;;  %v4105_v56 = vmul.f32 %v4041_v31, %v3913_v43  ;;  %v7589_v29 = vmul.f32 0.5, %v3913_v43  ;;  %v7591_v54 = vmul.f32 0.5, %v3915_v27 }
 0x1ee   : > { %5231 = vtanh.f32 %v4296_v33  ;;  %v4043_v3 = vmul.f32 0.044715, %v3915_v27  ;;  %v4234_v58 = vadd.f32 %v4170_v37, %v3914_v15  ;;  %v3920_v50 = vadd.f32 %v3728_v40, %v3538_v14 }
 0x1ef   : > { %v4169_v26 = vmul.f32 %v4105_v56, %v3913_v43  ;;  %v7595_v1 = vsel %vm7423_vm4, %v2218_v38, 0.0  ;;  %v10306_v51 = vrot.slane %v10305_v44, 1  ;;  %v10307_v42 = vrot.slane %v10302_v22, 1 }
 0x1f0   : > { %v4107_v35 = vmul.f32 %v4043_v3, %v3915_v27  ;;  %v2623_v33 = vmul.f32 %v10064_v12, %v6309_v10  ;;  %v2689_v20 = vmul.f32 %v5710_v2, %v5934_v9  ;;  %v4298_v14 = vmul.f32 0.7978846, %v4234_v58 }
 0x1f1   : > { %v2473_v61 = vsel %vm2421_vm2, %v10307_v42, %v10306_v51  ;;  %v4233_v15 = vadd.f32 %v4169_v26, %v3913_v43  ;;  %v7608_v41 = vmul.f32 %v4431_v21, %v7485_v36  ;;  %v4048_v31 = vmul.f32 0.044715, %v3920_v50 }
 0x1f2   : > { %v4171_v62 = vmul.f32 %v4107_v35, %v3915_v27  ;;  %v7612_v47 = vsel %vm7445_vm5, %v2473_v61, 0.0  ;;  %v2753_v55 = vadd.f32 %v2689_v20, %v2623_v33  ;;  %v2819_v53 = vmul.f32 %v5860_v28, %v6315_v45 }
 0x1f3   : > { %v4297_v30 = vmul.f32 0.7978846, %v4233_v15  ;;  %5233 = vtanh.f32 %v4298_v14  ;;  %v4112_v10 = vmul.f32 %v4048_v31, %v3920_v50  ;;  %v2951_v9 = vmul.f32 %v5736_v19, %v6870_v52  ;;  %v10310_v14 = vld [vmem:[#allocation35_spill] sm:$0xff] }
 0x1f4   : > { %v5232_v43 = vpop.eup %5231  ;;  %v4235_v38 = vadd.f32 %v4171_v62, %v3915_v27  ;;  %v2883_v36 = vadd.f32 %v2819_v53, %v2753_v55  ;;  %v3017_v56 = vmul.f32 %v5715_v6, %v5981_v32  ;;  %v3279_v45 = vmul.f32 %v10229_v59, %v7595_v1 }
 0x1f5   : > { %v4424_v37 = vadd.f32 1.0, %v5232_v43  ;;  %5235 = vtanh.f32 %v4297_v30  ;;  %v4176_v21 = vmul.f32 %v4112_v10, %v3920_v50  ;;  %v3345_v26 = vmul.f32 %v5725_v13, %v10302_v22 }
 0x1f6   : > { %v4299_v40 = vmul.f32 0.7978846, %v4235_v38  ;;  %v3081_v3 = vadd.f32 %v3017_v56, %v2951_v9  ;;  %v3475_v27 = vmul.f32 %v7276_v8, %v7612_v47  ;;  %v1178_v51 = vadd.s32 48, %v5712_v4  ;;  %v10313_v9 = vld [vmem:[#allocation8_spill] sm:$0xff] }
 0x1f7   : > { %v4488_v58 = vmul.f32 %v4424_v37, %v7560_v17  ;;  %v4240_v35 = vadd.f32 %v4176_v21, %v3920_v50  ;;  %v10308_v42 = vrot.slane %v10264_v34, 7  ;;  %v10309_v61 = vrot.slane %v10123_v11, 7  ;;  %v10314_v37 = vld [vmem:[#allocation16_spill] sm:$0xff] }
 0x1f8   : > { %5237 = vtanh.f32 %v4299_v40  ;;  %v3211_v20 = vadd.f32 %v3147_v46, %v3081_v3  ;;  %v3409_v15 = vadd.f32 %v3345_v26, %v3279_v45  ;;  %v10311_v31 = vrot.slane %v10310_v14, 1 }
 0x1f9   : > { %v2215_v33 = vsel %vm2164_vm1, %v10309_v61, %v10308_v42  ;;  %v10312_v62 = vrot.slane %v10264_v34, 1  ;;  %v5234_v55 = vpop.eup %5233  ;;  %4600 = vmatmul.f32.vlgmr.msrb.gmra.mxu0 %v4488_v58  ;;  %v4304_v53 = vmul.f32 0.7978846, %v4240_v35  ;;  %v1250_v30 = vand.u32 7, %v1178_v51 }
 0x1fa   : > { %v2624_v10 = vmul.f32 %v5745_v23, %v6652_v39  ;;  %v2690_v43 = vmul.f32 %v10313_v9, %v5973_v16  ;;  %v4426_v38 = vadd.f32 1.0, %v5234_v55  ;;  %v3539_v56 = vadd.f32 %v3475_v27, %v3409_v15 }
 0x1fb   : > { %v2470_v17 = vsel %vm2421_vm2, %v10312_v62, %v10311_v31  ;;  %v3729_v46 = vadd.f32 %v3211_v20, %v2883_v36  ;;  %v2820_v21 = vmul.f32 %v10314_v37, %v6661_v5  ;;  %v5236_v45 = vpop.eup %5235  ;;  %5239 = vtanh.f32 %v4304_v53 }
 0x1fc   : > { %vm7648_vm6 = vcmp.gt.s32.totalorder %v1250_v30, 0  ;;  %vm7652_vm7 = vcmp.lt.s32.totalorder %v1250_v30, 7  ;;  %v2754_v39 = vadd.f32 %v2690_v43, %v2624_v10  ;;  %v4425_v26 = vadd.f32 1.0, %v5236_v45  ;;  %v10321_v43 = vld [vmem:[#allocation36_spill] sm:$0xff] }
 0x1fd   : > { %v4490_v16 = vmul.f32 %v4426_v38, %v7580_v60  ;;  %v3921_v58 = vadd.f32 %v3729_v46, %v3539_v56  ;;  %v7659_v36 = vsel %vm7648_vm6, %v2215_v33, 0.0  ;;  %v3984_v5 = vmul.f32 0.5, %v3920_v50 }
 0x1fe   : > { %v7663_v27 = vsel %vm7652_vm7, %v2470_v17, 0.0  ;;  %v2952_v35 = vmul.f32 %v10273_v0, %v7496_v48  ;;  %v3018_v51 = vmul.f32 %v5705_v63, %v10123_v11  ;;  %v5238_v42 = vpop.eup %5237  ;;  %v4489_v61 = vmul.f32 %v4425_v26, %v7589_v29  ;;  %v7679_v29 = vld [vmem:[%s9811_s2 + $0x10] ss:$0 sm:$0xff] }
 0x1ff   : > { %4603 = vmatmul.f32.vlgmr.msra.gmra.mxu2 %v4490_v16  ;;  %v4049_v60 = vmul.f32 0.044715, %v3921_v58  ;;  %v2884_v20 = vadd.f32 %v2820_v21, %v2754_v39  ;;  %v3148_v33 = vmul.f32 %v5733_v18, %v7505_v49  ;;  %v4427_v50 = vadd.f32 1.0, %v5238_v42 }
 0x200   : > { %v3082_v15 = vadd.f32 %v3018_v51, %v2952_v35  ;;  %v3280_v31 = vmul.f32 %v10147_v57, %v7659_v36  ;;  %v3346_v62 = vmul.f32 %v5718_v7, %v10264_v34  ;;  %4713 = vmatmul.f32.vlgmr.msrb.gmra.mxu1 %v4489_v61  ;;  %v3476_v55 = vmul.f32 %v7679_v29, %v7663_v27 }
 0x201   : > { %v4113_v17 = vmul.f32 %v4049_v60, %v3921_v58  ;;  %v10319_v53 = vrot.slane %v10305_v44, 7  ;;  %v10320_v30 = vrot.slane %v10302_v22, 7  ;;  %v10322_v38 = vrot.slane %v10321_v43, 1  ;;  %v5240_v21 = vpop.eup %5239 }
 0x202   : > { %v10323_v56 = vrot.slane %v10305_v44, 1  ;;  %v4491_v45 = vmul.f32 %v4427_v50, %v7591_v54  ;;  %v3212_v39 = vadd.f32 %v3148_v33, %v3082_v15  ;;  %v3410_v26 = vadd.f32 %v3346_v62, %v3280_v31  ;;  %v10324_v62 = vld [vmem:[#allocation88_spill] sm:$0xff] }
 0x203   : > { %v2216_v10 = vsel %vm2164_vm1, %v10320_v30, %v10319_v53  ;;  %v4432_v35 = vadd.f32 1.0, %v5240_v21  ;;  %v4177_v51 = vmul.f32 %v4113_v17, %v3921_v58  ;;  %v2625_v61 = vmul.f32 %v10064_v12, %v6870_v52 }
 0x204   : > { %v2471_v46 = vsel %vm2421_vm2, %v10323_v56, %v10322_v38  ;;  %v7698_v16 = vsel %vm7648_vm6, %v2216_v10, 0.0  ;;  %4716 = vmatmul.f32.vlgmr.msra.gmra.mxu3 %v4491_v45  ;;  %v3540_v60 = vadd.f32 %v3476_v55, %v3410_v26  ;;  %v3730_v53 = vadd.f32 %v3212_v39, %v2884_v20 }
 0x205   : > { %v7702_v42 = vsel %vm7652_vm7, %v2471_v46, 0.0  ;;  %v2691_v54 = vmul.f32 %v5710_v2, %v5981_v32  ;;  %v2821_v40 = vmul.f32 %v5860_v28, %v6949_v24  ;;  %v7710_v33 = vmul.f32 0.5, %v3921_v58 }
 0x206   : > { %v4241_v50 = vadd.f32 %v4177_v51, %v3921_v58  ;;  %v2953_v3 = vmul.f32 %v5736_v19, %v7595_v1  ;;  %v3019_v15 = vmul.f32 %v5715_v6, %v10302_v22  ;;  %v3922_v31 = vadd.f32 %v3730_v53, %v3540_v60  ;;  %v10327_v60 = vld [vmem:[#allocation41_spill] sm:$0xff] }
 0x207   : > { %v2755_v52 = vadd.f32 %v2691_v54, %v2625_v61  ;;  %v3149_v20 = vmul.f32 %v10078_v25, %v7612_v47  ;;  %v3281_v32 = vmul.f32 %v10229_v59, %v7698_v16  ;;  %4606 = vmatmul.f32.gmra.mxu2 %v10324_v62  ;;  %v3347_v58 = vmul.f32 %v5725_v13, %v10305_v44 }
 0x208   : > { %v4305_v24 = vmul.f32 0.7978846, %v4241_v50  ;;  %v3083_v17 = vadd.f32 %v3019_v15, %v2953_v3  ;;  %v3477_v55 = vmul.f32 %v7276_v8, %v7702_v42  ;;  %v7725_v30 = vmul.f32 %v4432_v35, %v3984_v5 }
 0x209   : > { %v4050_v10 = vmul.f32 0.044715, %v3922_v31  ;;  %v2885_v38 = vadd.f32 %v2821_v40, %v2755_v52  ;;  %v1179_v56 = vadd.s32 56, %v5712_v4  ;;  %v3411_v21 = vadd.f32 %v3347_v58, %v3281_v32  ;;  %v10330_v52 = vld [vmem:[#allocation124_spill] sm:$0xff] }
 0x20a   : > { %5241 = vtanh.f32 %v4305_v24  ;;  %v3213_v46 = vadd.f32 %v3149_v20, %v3083_v17  ;;  %v10325_v45 = vrot.slane %v10310_v14, 7  ;;  %v10326_v39 = vrot.slane %v10264_v34, 7 }
 0x20b   : > { %v4114_v51 = vmul.f32 %v4050_v10, %v3922_v31  ;;  %v1257_v61 = vand.u32 7, %v1179_v56  ;;  %v10328_v53 = vrot.slane %v10327_v60, 1  ;;  %v10329_v5 = vrot.slane %v10310_v14, 1 }
 0x20c   : > { %v2213_v26 = vsel %vm2164_vm1, %v10326_v39, %v10325_v45  ;;  %v2626_v54 = vmul.f32 %v5745_v23, %v7496_v48  ;;  %v3541_v40 = vadd.f32 %v3477_v55, %v3411_v21  ;;  %v3731_v50 = vadd.f32 %v3213_v46, %v2885_v38  ;;  %4719 = vmatmul.f32.gmra.mxu3 %v10330_v52  ;;  %v10335_v46 = vld [vmem:[#allocation206_spill] sm:$0xff] }
 0x20d   : > { %v2468_v35 = vsel %vm2421_vm2, %v10329_v5, %v10328_v53  ;;  %v2692_v3 = vmul.f32 %v10313_v9, %v10123_v11  ;;  %v2822_v15 = vmul.f32 %v10314_v37, %v7505_v49  ;;  %v4178_v20 = vmul.f32 %v4114_v51, %v3922_v31  ;;  %v10336_v5 = vld [vmem:[#allocation40_spill] sm:$0xff] }
 0x20e   : > { %vm7747_vm8 = vcmp.gt.s32.totalorder %v1257_v61, 0  ;;  %vm7751_vm9 = vcmp.lt.s32.totalorder %v1257_v61, 7  ;;  %v2954_v48 = vmul.f32 %v10273_v0, %v7659_v36  ;;  %v3923_v24 = vadd.f32 %v3731_v50, %v3541_v40 }
 0x20f   : > { %v2307_v11 = vsel %vm7747_vm8, %v2213_v26, 0.0  ;;  %v2564_v49 = vsel %vm7751_vm9, %v2468_v35, 0.0  ;;  %v2756_v17 = vadd.f32 %v2692_v3, %v2626_v54  ;;  %v4242_v58 = vadd.f32 %v4178_v20, %v3922_v31  ;;  %4609 = vmatmul.f32.gmra.mxu2 %v10335_v46  ;;  %v10339_v3 = vld [vmem:[#allocation44_spill] sm:$0xff] }
 0x210   : > { %v3020_v55 = vmul.f32 %v5705_v63, %v10264_v34  ;;  %v3150_v10 = vmul.f32 %v5733_v18, %v7663_v27  ;;  %v3282_v38 = vmul.f32 %v10147_v57, %v2307_v11  ;;  %v5242_v56 = vpop.eup %5241  ;;  %v3986_v21 = vmul.f32 0.5, %v3922_v31 }
 0x211   : > { %v7767_v45 = vmul.f32 0.5, %v3923_v24  ;;  %v4051_v39 = vmul.f32 0.044715, %v3923_v24  ;;  %v3478_v26 = vmul.f32 %v7679_v29, %v2564_v49  ;;  %v4306_v51 = vmul.f32 0.7978846, %v4242_v58 }
 0x212   : > { %v2886_v61 = vadd.f32 %v2822_v15, %v2756_v17  ;;  %v3084_v53 = vadd.f32 %v3020_v55, %v2954_v48  ;;  %v3412_v35 = vadd.f32 %v10336_v5, %v3282_v38  ;;  %v10337_v54 = vrot.slane %v10321_v43, 7 }
 0x213   : > { %v4115_v63 = vmul.f32 %v4051_v39, %v3923_v24  ;;  %v10338_v40 = vrot.slane %v10305_v44, 7  ;;  %v10340_v31 = vrot.slane %v10339_v3, 1  ;;  %v10341_v52 = vrot.slane %v10321_v43, 1 }
 0x214   : > { %v2627_v15 = vmul.f32 %v10064_v12, %v7595_v1  ;;  %v4433_v48 = vadd.f32 1.0, %v5242_v56  ;;  %5243 = vtanh.f32 %v4306_v51  ;;  %v3214_v17 = vadd.f32 %v3150_v10, %v3084_v53  ;;  %4722 = vmatmul.f32.gmra.mxu3 %v7608_v41 }
 0x215   : > { %v2214_v50 = vsel %vm2164_vm1, %v10338_v40, %v10337_v54  ;;  %v2469_v20 = vsel %vm2421_vm2, %v10341_v52, %v10340_v31  ;;  %v3542_v58 = vadd.f32 %v3478_v26, %v3412_v35  ;;  %v4179_v55 = vmul.f32 %v4115_v63, %v3923_v24 }
 0x216   : > { %v2308_v38 = vsel %vm7747_vm8, %v2214_v50, 0.0  ;;  %v2565_v46 = vsel %vm7751_vm9, %v2469_v20, 0.0  ;;  %v2693_v39 = vmul.f32 %v5710_v2, %v10302_v22  ;;  %v3732_v5 = vadd.f32 %v3214_v17, %v2886_v61 }
 0x217   : > { %v2823_v1 = vmul.f32 %v5860_v28, %v7612_v47  ;;  %v2955_v10 = vmul.f32 %v5736_v19, %v7698_v16  ;;  %v3021_v56 = vmul.f32 %v5715_v6, %v10305_v44  ;;  %v4243_v32 = vadd.f32 %v4179_v55, %v3923_v24  ;;  %4612 = vmatmul.f32.gmra.mxu2 %v7725_v30  ;;  %v10342_v6 = vld [vmem:[#allocation43_spill] sm:$0xff] }
 0x218   : > { %v2757_v26 = vadd.f32 %v2693_v39, %v2627_v15  ;;  %v3151_v62 = vmul.f32 %v10078_v25, %v7702_v42  ;;  %v3283_v51 = vmul.f32 %v10229_v59, %v2308_v38  ;;  %v3924_v22 = vadd.f32 %v3732_v5, %v3542_v58 }
 0x219   : > { %v3085_v53 = vadd.f32 %v3021_v56, %v2955_v10  ;;  %v3479_v41 = vmul.f32 %v7276_v8, %v2565_v46  ;;  %v2628_v47 = vmul.f32 %v5745_v23, %v7659_v36  ;;  %v4497_v61 = vmul.f32 %v4433_v48, %v7710_v33 }
 0x21a   : > { %v4307_v35 = vmul.f32 0.7978846, %v4243_v32  ;;  %v3413_v24 = vadd.f32 %v10342_v6, %v3283_v51  ;;  %v2694_v63 = vmul.f32 %v10313_v9, %v10264_v34  ;;  %v5244_v54 = vpop.eup %5243  ;;  %v4052_v40 = vmul.f32 0.044715, %v3924_v22 }
 0x21b   : > { %v2887_v50 = vadd.f32 %v2823_v1, %v2757_v26  ;;  %v3215_v31 = vadd.f32 %v3151_v62, %v3085_v53  ;;  %v2824_v52 = vmul.f32 %v10314_v37, %v7663_v27  ;;  %v4434_v20 = vadd.f32 1.0, %v5244_v54  ;;  %v10343_v1 = vld [vmem:[#allocation39_spill] sm:$0xff] }
 0x21c   : > { %5245 = vtanh.f32 %v4307_v35  ;;  %v3543_v36 = vadd.f32 %v3479_v41, %v3413_v24  ;;  %v2758_v15 = vadd.f32 %v2694_v63, %v2628_v47  ;;  %v4116_v30 = vmul.f32 %v4052_v40, %v3924_v22  ;;  %4725 = vmatmul.f32.gmra.mxu3 %v4497_v61  ;;  %v10344_v47 = vld [vmem:[#allocation42_spill] sm:$0xff] }
 0x21d   : > { %v3733_v17 = vadd.f32 %v3215_v31, %v2887_v50  ;;  %v2956_v33 = vmul.f32 %v10273_v0, %v2307_v11  ;;  %v3152_v48 = vmul.f32 %v5733_v18, %v2564_v49  ;;  %v4498_v58 = vmul.f32 %v4434_v20, %v3986_v21 }
 0x21e   : > { %v7813_v55 = vmul.f32 0.5, %v3924_v22  ;;  %v2888_v34 = vadd.f32 %v2824_v52, %v2758_v15  ;;  %v2629_v39 = vmul.f32 %v10064_v12, %v7698_v16  ;;  %v4180_v5 = vmul.f32 %v4116_v30, %v3924_v22 }
 0x21f   : > { %v3925_v27 = vadd.f32 %v3733_v17, %v3543_v36  ;;  %v3086_v10 = vadd.f32 %v10343_v1, %v2956_v33  ;;  %v2695_v56 = vmul.f32 %v5710_v2, %v10305_v44  ;;  %v2825_v11 = vmul.f32 %v5860_v28, %v7702_v42  ;;  %4615 = vmatmul.f32.gmra.mxu2 %v4498_v58  ;;  %v10353_v17 = vld [vmem:[#allocation48_spill] sm:$0xff] }
 0x220   : > { %v2957_v49 = vmul.f32 %v5736_v19, %v2308_v38  ;;  %v3153_v21 = vmul.f32 %v10078_v25, %v2565_v46  ;;  %v1180_v32 = vadd.s32 64, %v5712_v4  ;;  %v4244_v26 = vadd.f32 %v4180_v5, %v3924_v22  ;;  %v10358_v5 = vld [vmem:[#allocation53_spill] sm:$0xff] }
 0x221   : > { %v4053_v62 = vmul.f32 0.044715, %v3925_v27  ;;  %v3216_v16 = vadd.f32 %v3152_v48, %v3086_v10  ;;  %v2759_v51 = vadd.f32 %v2695_v56, %v2629_v39  ;;  %v7825_v41 = vmul.f32 0.5, %v3925_v27 }
 0x222   : > { %v5246_v53 = vpop.eup %5245  ;;  %v3087_v61 = vadd.f32 %v10344_v47, %v2957_v49  ;;  %v1181_v44 = vadd.s32 72, %v5712_v4  ;;  %v1264_v35 = vand.u32 7, %v1180_v32  ;;  %v4308_v6 = vmul.f32 0.7978846, %v4244_v26 }
 0x223   : > { %v4435_v42 = vadd.f32 1.0, %v5246_v53  ;;  %v4117_v38 = vmul.f32 %v4053_v62, %v3925_v27  ;;  %v3734_v24 = vadd.f32 %v3216_v16, %v2888_v34  ;;  %v2889_v46 = vadd.f32 %v2825_v11, %v2759_v51 }
 0x224   : > { %v3217_v63 = vadd.f32 %v3153_v21, %v3087_v61  ;;  %v1271_v54 = vand.u32 7, %v1181_v44  ;;  %vm7829_vm10 = vcmp.gt.s32.totalorder %v1264_v35, 0  ;;  %5247 = vtanh.f32 %v4308_v6 }
 0x225   : > { %v4499_v40 = vmul.f32 %v4435_v42, %v7767_v45  ;;  %v4181_v50 = vmul.f32 %v4117_v38, %v3925_v27  ;;  %vm7834_vm11 = vcmp.lt.s32.totalorder %v1264_v35, 7  ;;  %v4054_v52 = vmul.f32 0.044715, %v3734_v24 }
 0x226   : > { %v3735_v20 = vadd.f32 %v3217_v63, %v2889_v46  ;;  %vm7838_vm12 = vcmp.gt.s32.totalorder %v1271_v54, 0  ;;  %vm7842_vm13 = vcmp.lt.s32.totalorder %v1271_v54, 7  ;;  %v10354_v45 = vrot.slane %v10353_v17, 7  ;;  %v10363_v54 = vld [vmem:[#allocation46_spill] sm:$0xff] }
 0x227   : > { %4728 = vmatmul.f32.gmra.mxu3 %v4499_v40  ;;  %v4245_v30 = vadd.f32 %v4181_v50, %v3925_v27  ;;  %v10355_v33 = vrot.slane %v10327_v60, 7  ;;  %v10357_v34 = vrot.slane %v10310_v14, 7  ;;  %v10359_v1 = vrot.slane %v10358_v5, 1 }
 0x228   : > { %v10360_v10 = vrot.slane %v10353_v17, 1  ;;  %v7864_v56 = vmul.f32 0.5, %v3734_v24  ;;  %v4118_v11 = vmul.f32 %v4054_v52, %v3734_v24  ;;  %v4055_v49 = vmul.f32 0.044715, %v3735_v20 }
 0x229   : > { %v2209_v48 = vsel %vm2164_vm1, %v10355_v33, %v10354_v45  ;;  %v10356_v58 = vmov %v10355_v33  ;;  %v4309_v32 = vmul.f32 0.7978846, %v4245_v30  ;;  %v10362_v62 = vrot.slane %v10327_v60, 1  ;;  %v10364_v30 = vld [vmem:[#allocation50_spill] sm:$0xff] }
 0x22a   : > { %v2211_v39 = vsel %vm2164_vm1, %v10357_v34, %v10356_v58  ;;  %v2464_v27 = vsel %vm2421_vm2, %v10360_v10, %v10359_v1  ;;  %v7870_v14 = vsel %vm7838_vm12, %v2209_v48, 0.0  ;;  %v10361_v26 = vmov %v10360_v10  ;;  %v5248_v35 = vpop.eup %5247 }
 0x22b   : > { %v2309_v21 = vsel %vm7829_vm10, %v2211_v39, 0.0  ;;  %v2466_v16 = vsel %vm2421_vm2, %v10362_v62, %v10361_v26  ;;  %v7880_v51 = vsel %vm7842_vm13, %v2464_v27, 0.0  ;;  %v4182_v53 = vmul.f32 %v4118_v11, %v3734_v24  ;;  %v10369_v26 = vld [vmem:[#allocation56_spill] sm:$0xff] }
 0x22c   : > { %v4119_v47 = vmul.f32 %v4055_v49, %v3735_v20  ;;  %v2566_v61 = vsel %vm7834_vm11, %v2466_v16, 0.0  ;;  %v2958_v44 = vmul.f32 %v10273_v0, %v2309_v21  ;;  %5249 = vtanh.f32 %v4309_v32 }
 0x22d   : > { %v3154_v42 = vmul.f32 %v5733_v18, %v2566_v61  ;;  %v3286_v60 = vmul.f32 %v10147_v57, %v7870_v14  ;;  %v3352_v6 = vmul.f32 %v5718_v7, %v10353_v17  ;;  %v4436_v38 = vadd.f32 1.0, %v5248_v35 }
 0x22e   : > { %v4246_v46 = vadd.f32 %v4182_v53, %v3734_v24  ;;  %v4183_v63 = vmul.f32 %v4119_v47, %v3735_v20  ;;  %v3088_v40 = vadd.f32 %v10363_v54, %v2958_v44  ;;  %v3482_v52 = vmul.f32 %v7679_v29, %v7880_v51  ;;  %v10374_v54 = vld [vmem:[#allocation49_spill] sm:$0xff] }
 0x22f   : > { %v3416_v50 = vadd.f32 %v3352_v6, %v3286_v60  ;;  %v10365_v45 = vrot.slane %v10364_v30, 7  ;;  %v10366_v33 = vrot.slane %v10339_v3, 7  ;;  %v10368_v34 = vrot.slane %v10321_v43, 7 }
 0x230   : > { %v4500_v39 = vmul.f32 %v4436_v38, %v7813_v55  ;;  %v4310_v1 = vmul.f32 0.7978846, %v4246_v46  ;;  %v4247_v10 = vadd.f32 %v4183_v63, %v3735_v20  ;;  %v3218_v27 = vadd.f32 %v3154_v42, %v3088_v40 }
 0x231   : > { %v2210_v48 = vsel %vm2164_vm1, %v10366_v33, %v10365_v45  ;;  %v10367_v58 = vmov %v10366_v33  ;;  %v3546_v11 = vadd.f32 %v3482_v52, %v3416_v50  ;;  %v10370_v62 = vrot.slane %v10369_v26, 1 }
 0x232   : > { %v2212_v24 = vsel %vm2164_vm1, %v10368_v34, %v10367_v58  ;;  %v7912_v32 = vsel %vm7838_vm12, %v2210_v48, 0.0  ;;  %v10371_v43 = vrot.slane %v10364_v30, 1  ;;  %4618 = vmatmul.f32.gmra.mxu2 %v4500_v39  ;;  %5251 = vtanh.f32 %v4310_v1  ;;  %v5250_v44 = vpop.eup %5249 }
 0x233   : > { %v7908_v49 = vsel %vm7829_vm10, %v2212_v24, 0.0  ;;  %v4311_v55 = vmul.f32 0.7978846, %v4247_v10  ;;  %v10373_v22 = vrot.slane %v10339_v3, 1  ;;  %v7930_v35 = vadd.f32 %v3546_v11, %v3218_v27  ;;  %v10377_v24 = vld [vmem:[#allocation59_spill] sm:$0xff] }
 0x234   : > { %v2465_v16 = vsel %vm2421_vm2, %v10371_v43, %v10370_v62  ;;  %v10372_v53 = vmov %v10371_v43  ;;  %v2959_v60 = vmul.f32 %v5736_v19, %v7908_v49  ;;  %v3287_v6 = vmul.f32 %v10229_v59, %v7912_v32 }
 0x235   : > { %v2467_v47 = vsel %vm2421_vm2, %v10373_v22, %v10372_v53  ;;  %v7928_v36 = vsel %vm7842_vm13, %v2465_v16, 0.0  ;;  %v4437_v3 = vadd.f32 1.0, %v5250_v44  ;;  %5253 = vtanh.f32 %v4311_v55  ;;  %v10380_v55 = vld [vmem:[#allocation45_spill] sm:$0xff] }
 0x236   : > { %v2567_v42 = vsel %vm7834_vm11, %v2467_v47, 0.0  ;;  %v3353_v15 = vmul.f32 %v5725_v13, %v10364_v30  ;;  %v3991_v46 = vmul.f32 0.5, %v3735_v20  ;;  %v4056_v63 = vmul.f32 0.044715, %v7930_v35 }
 0x237   : > { %v3155_v38 = vmul.f32 %v10078_v25, %v2567_v42  ;;  %v3089_v40 = vadd.f32 %v10374_v54, %v2959_v60  ;;  %v3483_v31 = vmul.f32 %v7276_v8, %v7928_v36  ;;  %v4501_v50 = vmul.f32 %v4437_v3, %v7825_v41  ;;  %v10385_v60 = vld [vmem:[#allocation52_spill] sm:$0xff]  ;;  %v10386_v54 = vld [vmem:[#allocation21_spill] sm:$0xff] }
 0x238   : > { %v3417_v52 = vadd.f32 %v3353_v15, %v3287_v6  ;;  %v1182_v45 = vadd.s32 80, %v5712_v4  ;;  %v10375_v33 = vrot.slane %v10358_v5, 7  ;;  %v10376_v48 = vrot.slane %v10353_v17, 7  ;;  %v5252_v10 = vpop.eup %5251 }
 0x239   : > { %v4120_v20 = vmul.f32 %v4056_v63, %v7930_v35  ;;  %v3219_v34 = vadd.f32 %v3155_v38, %v3089_v40  ;;  %v10378_v39 = vrot.slane %v10377_v24, 1  ;;  %v10379_v1 = vrot.slane %v10358_v5, 1  ;;  %4731 = vmatmul.f32.gmra.mxu3 %v4501_v50 }
 0x23a   : > { %v2207_v58 = vsel %vm2164_vm1, %v10376_v48, %v10375_v33  ;;  %v2632_v41 = vmul.f32 %v5745_v23, %v2309_v21  ;;  %v3547_v27 = vadd.f32 %v3483_v31, %v3417_v52  ;;  %v1278_v11 = vand.u32 7, %v1182_v45 }
 0x23b   : > { %v2462_v8 = vsel %vm2421_vm2, %v10379_v1, %v10378_v39  ;;  %v2828_v17 = vmul.f32 %v10314_v37, %v2566_v61  ;;  %v2960_v62 = vmul.f32 %v10273_v0, %v7870_v14  ;;  %v4438_v43 = vadd.f32 1.0, %v5252_v10  ;;  %v5254_v47 = vpop.eup %5253  ;;  %v10393_v61 = vld [vmem:[#allocation47_spill] sm:$0xff] }
 0x23c   : > { %v4184_v16 = vmul.f32 %v4120_v20, %v7930_v35  ;;  %v2762_v53 = vadd.f32 %v10380_v55, %v2632_v41  ;;  %v3156_v22 = vmul.f32 %v5733_v18, %v7880_v51  ;;  %v7968_v44 = vadd.f32 %v3547_v27, %v3219_v34  ;;  %v10390_v27 = vld [vmem:[#allocation62_spill] sm:$0xff] }
 0x23d   : > { %vm7970_vm14 = vcmp.gt.s32.totalorder %v1278_v11, 0  ;;  %vm7974_vm15 = vcmp.lt.s32.totalorder %v1278_v11, 7  ;;  %v3090_v6 = vadd.f32 %v10385_v60, %v2960_v62  ;;  %v4502_v3 = vmul.f32 %v4438_v43, %v7864_v56 }
 0x23e   : > { %v4439_v38 = vadd.f32 1.0, %v5254_v47  ;;  %v4248_v15 = vadd.f32 %v4184_v16, %v7930_v35  ;;  %v7983_v63 = vsel %vm7970_vm14, %v2207_v58, 0.0  ;;  %v7988_v31 = vsel %vm7395_vm3, %v10386_v54, 0.0 }
 0x23f   : > { %v4057_v50 = vmul.f32 0.044715, %v7968_v44  ;;  %v7993_v52 = vsel %vm7974_vm15, %v2462_v8, 0.0  ;;  %v2892_v45 = vadd.f32 %v2828_v17, %v2762_v53  ;;  %4621 = vmatmul.f32.gmra.mxu2 %v4502_v3  ;;  %v3220_v48 = vadd.f32 %v3156_v22, %v3090_v6 }
 0x240   : > { %v4503_v56 = vmul.f32 %v4439_v38, %v3991_v46  ;;  %v4312_v33 = vmul.f32 0.7978846, %v4248_v15  ;;  %v3288_v58 = vmul.f32 %v10147_v57, %v7983_v63  ;;  %v3354_v34 = vmul.f32 %v5718_v7, %v10358_v5 }
 0x241   : > { %v4121_v20 = vmul.f32 %v4057_v50, %v7968_v44  ;;  %v3484_v39 = vmul.f32 %v7679_v29, %v7993_v52  ;;  %v10388_v1 = vrot.slane %v10369_v26, 7  ;;  %v10389_v8 = vrot.slane %v10364_v30, 7 }
 0x242   : > { %5255 = vtanh.f32 %v4312_v33  ;;  %v3738_v41 = vadd.f32 %v3220_v48, %v2892_v45  ;;  %v10391_v11 = vrot.slane %v10390_v27, 1  ;;  %v10392_v17 = vrot.slane %v10369_v26, 1  ;;  %4734 = vmatmul.f32.gmra.mxu3 %v4503_v56 }
 0x243   : > { %v2208_v46 = vsel %vm2164_vm1, %v10389_v8, %v10388_v1  ;;  %v4185_v43 = vmul.f32 %v4121_v20, %v7968_v44  ;;  %v3418_v30 = vadd.f32 %v3354_v34, %v3288_v58  ;;  %v2633_v55 = vmul.f32 %v10064_v12, %v7908_v49  ;;  %v10394_v49 = vld [vmem:[#allocation55_spill] sm:$0xff] }
 0x244   : > { %v8010_v10 = vsel %vm7970_vm14, %v2208_v46, 0.0  ;;  %v2463_v62 = vsel %vm2421_vm2, %v10392_v17, %v10391_v11  ;;  %v2829_v53 = vmul.f32 %v5860_v28, %v2567_v42  ;;  %v2961_v22 = vmul.f32 %v5736_v19, %v7912_v32  ;;  %v8040_v42 = vld [vmem:[%s9811_s2 + $0x18] ss:$0 sm:$0xff] }
 0x245   : > { %v8021_v16 = vsel %vm7974_vm15, %v2463_v62, 0.0  ;;  %v3157_v47 = vmul.f32 %v10078_v25, %v7928_v36  ;;  %v3289_v21 = vmul.f32 %v10229_v59, %v8010_v10  ;;  %v4249_v60 = vadd.f32 %v4185_v43, %v7968_v44  ;;  %v10397_v8 = vld [vmem:[#allocation11_spill] sm:$0xff] }
 0x246   : > { %v3548_v6 = vadd.f32 %v3484_v39, %v3418_v30  ;;  %v2763_v3 = vadd.f32 %v10393_v61, %v2633_v55  ;;  %v3355_v38 = vmul.f32 %v5725_v13, %v10369_v26  ;;  %v3091_v15 = vadd.f32 %v10394_v49, %v2961_v22 }
 0x247   : > { %v3485_v54 = vmul.f32 %v8040_v42, %v8021_v16  ;;  %v1183_v40 = vadd.s32 88, %v5712_v4  ;;  %v10395_v50 = vrot.slane %v10377_v24, 7  ;;  %v10396_v45 = vrot.slane %v10358_v5, 7 }
 0x248   : > { %v4313_v33 = vmul.f32 0.7978846, %v4249_v60  ;;  %v8051_v48 = vadd.f32 %v3738_v41, %v3548_v6  ;;  %v2893_v58 = vadd.f32 %v2829_v53, %v2763_v3  ;;  %v3419_v20 = vadd.f32 %v3355_v38, %v3289_v21  ;;  %v5256_v34 = vpop.eup %5255  ;;  %v10404_v6 = vld [vmem:[#allocation51_spill] sm:$0xff] }
 0x249   : > { %v2205_v56 = vsel %vm2164_vm1, %v10396_v45, %v10395_v50  ;;  %v3221_v39 = vadd.f32 %v3157_v47, %v3091_v15  ;;  %v1285_v1 = vand.u32 7, %v1183_v40  ;;  %v10398_v46 = vrot.slane %v10397_v8, 1 }
 0x24a   : > { %v10399_v11 = vrot.slane %v10377_v24, 1  ;;  %v2634_v5 = vmul.f32 %v5745_v23, %v7870_v14  ;;  %v3992_v62 = vmul.f32 0.5, %v7930_v35  ;;  %v4440_v43 = vadd.f32 1.0, %v5256_v34 }
 0x24b   : > { %5257 = vtanh.f32 %v4313_v33  ;;  %v4058_v41 = vmul.f32 0.044715, %v8051_v48  ;;  %v3549_v30 = vadd.f32 %v3485_v54, %v3419_v20  ;;  %v3739_v55 = vadd.f32 %v3221_v39, %v2893_v58 }
 0x24c   : > { %v2460_v17 = vsel %vm2421_vm2, %v10399_v11, %v10398_v46  ;;  %vm8063_vm3 = vcmp.gt.s32.totalorder %v1285_v1, 0  ;;  %vm8067_vm4 = vcmp.lt.s32.totalorder %v1285_v1, 7  ;;  %v4504_v47 = vmul.f32 %v4440_v43, %v3992_v62 }
 0x24d   : > { %v4122_v21 = vmul.f32 %v4058_v41, %v8051_v48  ;;  %v8074_v14 = vsel %vm8063_vm3, %v2205_v56, 0.0  ;;  %v8078_v35 = vsel %vm8067_vm4, %v2460_v17, 0.0  ;;  %v8080_v60 = vadd.f32 %v3739_v55, %v3549_v30  ;;  %v10405_v56 = vld [vmem:[#allocation58_spill] sm:$0xff]  ;;  %v10408_v30 = vld [vmem:[#allocation68_spill] sm:$0xff] }
 0x24e   : > { %v2764_v61 = vadd.f32 %v10404_v6, %v2634_v5  ;;  %v2830_v3 = vmul.f32 %v10314_v37, %v7880_v51  ;;  %v2962_v38 = vmul.f32 %v10273_v0, %v7983_v63  ;;  %4624 = vmatmul.f32.gmra.mxu2 %v4504_v47  ;;  %v3158_v15 = vmul.f32 %v5733_v18, %v7993_v52 }
 0x24f   : > { %v4186_v49 = vmul.f32 %v4122_v21, %v8051_v48  ;;  %v3290_v54 = vmul.f32 %v10147_v57, %v8074_v14  ;;  %v3356_v40 = vmul.f32 %v5718_v7, %v10377_v24  ;;  %v3993_v50 = vmul.f32 0.5, %v7968_v44 }
 0x250   : > { %v4059_v45 = vmul.f32 0.044715, %v8080_v60  ;;  %v2894_v51 = vadd.f32 %v2830_v3, %v2764_v61  ;;  %v3092_v33 = vadd.f32 %v10405_v56, %v2962_v38  ;;  %v3486_v39 = vmul.f32 %v7679_v29, %v8078_v35  ;;  %v10411_v38 = vld [vmem:[#allocation54_spill] sm:$0xff] }
 0x251   : > { %v5258_v58 = vpop.eup %5257  ;;  %v4250_v20 = vadd.f32 %v4186_v49, %v8051_v48  ;;  %v3420_v34 = vadd.f32 %v3356_v40, %v3290_v54  ;;  %v10406_v1 = vrot.slane %v10390_v27, 7  ;;  %v10407_v46 = vrot.slane %v10369_v26, 7 }
 0x252   : > { %v4441_v44 = vadd.f32 1.0, %v5258_v58  ;;  %v4123_v17 = vmul.f32 %v4059_v45, %v8080_v60  ;;  %v3222_v5 = vadd.f32 %v3158_v15, %v3092_v33  ;;  %v10409_v55 = vrot.slane %v10408_v30, 1 }
 0x253   : > { %v2206_v11 = vsel %vm2164_vm1, %v10407_v46, %v10406_v1  ;;  %v4314_v43 = vmul.f32 0.7978846, %v4250_v20  ;;  %v3550_v41 = vadd.f32 %v3486_v39, %v3420_v34  ;;  %v10410_v47 = vrot.slane %v10390_v27, 1 }
 0x254   : > { %v8109_v62 = vsel %vm8063_vm3, %v2206_v11, 0.0  ;;  %v2635_v21 = vmul.f32 %v10064_v12, %v7912_v32  ;;  %v4505_v6 = vmul.f32 %v4441_v44, %v3993_v50  ;;  %v4187_v61 = vmul.f32 %v4123_v17, %v8080_v60 }
 0x255   : > { %v2461_v26 = vsel %vm2421_vm2, %v10410_v47, %v10409_v55  ;;  %v3740_v3 = vadd.f32 %v3222_v5, %v2894_v51  ;;  %5259 = vtanh.f32 %v4314_v43  ;;  %v2831_v15 = vmul.f32 %v5860_v28, %v7928_v36  ;;  %v10412_v51 = vld [vmem:[#allocation61_spill] sm:$0xff]  ;;  %v10415_v5 = vld [vmem:[#allocation71_spill] sm:$0xff] }
 0x256   : > { %v8122_v53 = vsel %vm8067_vm4, %v2461_v26, 0.0  ;;  %v2765_v49 = vadd.f32 %v10411_v38, %v2635_v21  ;;  %v2963_v54 = vmul.f32 %v5736_v19, %v8010_v10  ;;  %4737 = vmatmul.f32.gmra.mxu3 %v4505_v6  ;;  %v4251_v32 = vadd.f32 %v4187_v61, %v8080_v60 }
 0x257   : > { %v8130_v40 = vadd.f32 %v3740_v3, %v3550_v41  ;;  %v3159_v50 = vmul.f32 %v10078_v25, %v8021_v16  ;;  %v3291_v22 = vmul.f32 %v10229_v59, %v8109_v62  ;;  %v3357_v36 = vmul.f32 %v5725_v13, %v10390_v27 }
 0x258   : > { %v2895_v45 = vadd.f32 %v2831_v15, %v2765_v49  ;;  %v3093_v56 = vadd.f32 %v10412_v51, %v2963_v54  ;;  %v3487_v33 = vmul.f32 %v8040_v42, %v8122_v53  ;;  %v3994_v58 = vmul.f32 0.5, %v8051_v48 }
 0x259   : > { %v4315_v20 = vmul.f32 0.7978846, %v4251_v32  ;;  %v4060_v34 = vmul.f32 0.044715, %v8130_v40  ;;  %v1184_v39 = vadd.s32 96, %v5712_v4  ;;  %v3421_v46 = vadd.f32 %v3357_v36, %v3291_v22 }
 0x25a   : > { %v3223_v1 = vadd.f32 %v3159_v50, %v3093_v56  ;;  %v10413_v11 = vrot.slane %v10397_v8, 7  ;;  %v10414_v44 = vrot.slane %v10377_v24, 7  ;;  %v10416_v43 = vrot.slane %v10415_v5, 1  ;;  %v10422_v50 = vld [vmem:[#allocation57_spill] sm:$0xff]  ;;  %v10423_v56 = vld [vmem:[#allocation64_spill] sm:$0xff] }
 0x25b   : > { %v10417_v41 = vrot.slane %v10397_v8, 1  ;;  %5261 = vtanh.f32 %v4315_v20  ;;  %v4124_v55 = vmul.f32 %v4060_v34, %v8130_v40  ;;  %v1292_v47 = vand.u32 7, %v1184_v39  ;;  %v5260_v21 = vpop.eup %5259 }
 0x25c   : > { %v2203_v17 = vsel %vm2164_vm1, %v10414_v44, %v10413_v11  ;;  %v2636_v26 = vmul.f32 %v5745_v23, %v7983_v63  ;;  %v3551_v6 = vadd.f32 %v3487_v33, %v3421_v46  ;;  %v3741_v24 = vadd.f32 %v3223_v1, %v2895_v45 }
 0x25d   : > { %v2458_v48 = vsel %vm2421_vm2, %v10417_v41, %v10416_v43  ;;  %v2832_v61 = vmul.f32 %v10314_v37, %v7993_v52  ;;  %v2964_v3 = vmul.f32 %v10273_v0, %v8074_v14  ;;  %v4442_v38 = vadd.f32 1.0, %v5260_v21 }
 0x25e   : > { %v4188_v49 = vmul.f32 %v4124_v55, %v8130_v40  ;;  %vm8164_vm5 = vcmp.gt.s32.totalorder %v1292_v47, 0  ;;  %vm8168_vm6 = vcmp.lt.s32.totalorder %v1292_v47, 7  ;;  %v8172_v63 = vadd.f32 %v3741_v24, %v3551_v6  ;;  %v10426_v47 = vld [vmem:[#allocation74_spill] sm:$0xff] }
 0x25f   : > { %v8176_v32 = vsel %vm8164_vm5, %v2203_v17, 0.0  ;;  %v8180_v52 = vsel %vm8168_vm6, %v2458_v48, 0.0  ;;  %v2766_v22 = vadd.f32 %v10422_v50, %v2636_v26  ;;  %v4506_v45 = vmul.f32 %v4442_v38, %v3994_v58 }
 0x260   : > { %v4252_v51 = vadd.f32 %v4188_v49, %v8130_v40  ;;  %v3094_v36 = vadd.f32 %v10423_v56, %v2964_v3  ;;  %v3160_v33 = vmul.f32 %v5733_v18, %v8078_v35  ;;  %v3995_v20 = vmul.f32 0.5, %v8080_v60 }
 0x261   : > { %v4061_v34 = vmul.f32 0.044715, %v8172_v63  ;;  %v2896_v39 = vadd.f32 %v2832_v61, %v2766_v22  ;;  %v3292_v1 = vmul.f32 %v10147_v57, %v8176_v32  ;;  %v5262_v46 = vpop.eup %5261  ;;  %4627 = vmatmul.f32.gmra.mxu2 %v4506_v45  ;;  %v3358_v58 = vmul.f32 %v5718_v7, %v10397_v8 }
 0x262   : > { %v4316_v11 = vmul.f32 0.7978846, %v4252_v51  ;;  %v3224_v44 = vadd.f32 %v3160_v33, %v3094_v36  ;;  %v3488_v17 = vmul.f32 %v7679_v29, %v8180_v52  ;;  %v4443_v43 = vadd.f32 1.0, %v5262_v46  ;;  %v10429_v36 = vld [vmem:[#allocation60_spill] sm:$0xff] }
 0x263   : > { %v4125_v41 = vmul.f32 %v4061_v34, %v8172_v63  ;;  %v10424_v60 = vrot.slane %v10408_v30, 7  ;;  %v10425_v48 = vrot.slane %v10390_v27, 7  ;;  %v10427_v26 = vrot.slane %v10426_v47, 1 }
 0x264   : > { %v10428_v21 = vrot.slane %v10408_v30, 1  ;;  %5263 = vtanh.f32 %v4316_v11  ;;  %v3422_v24 = vadd.f32 %v3358_v58, %v3292_v1  ;;  %v3742_v61 = vadd.f32 %v3224_v44, %v2896_v39 }
 0x265   : > { %v2204_v55 = vsel %vm2164_vm1, %v10425_v48, %v10424_v60  ;;  %v4507_v38 = vmul.f32 %v4443_v43, %v3995_v20  ;;  %v4189_v27 = vmul.f32 %v4125_v41, %v8172_v63  ;;  %v2637_v50 = vmul.f32 %v10064_v12, %v8010_v10 }
 0x266   : > { %v2459_v6 = vsel %vm2421_vm2, %v10428_v21, %v10427_v26  ;;  %v8210_v3 = vsel %vm8164_vm5, %v2204_v55, 0.0  ;;  %v3552_v22 = vadd.f32 %v3488_v17, %v3422_v24  ;;  %v2833_v45 = vmul.f32 %v5860_v28, %v8021_v16  ;;  %v10430_v16 = vld [vmem:[#allocation66_spill] sm:$0xff] }
 0x267   : > { %v8215_v49 = vsel %vm8168_vm6, %v2459_v6, 0.0  ;;  %v2965_v51 = vmul.f32 %v5736_v19, %v8109_v62  ;;  %v3161_v15 = vmul.f32 %v10078_v25, %v8122_v53  ;;  %4740 = vmatmul.f32.gmra.mxu3 %v4507_v38  ;;  %v4253_v56 = vadd.f32 %v4189_v27, %v8172_v63  ;;  %v10433_v24 = vld [vmem:[#allocation10_spill] sm:$0xff] }
 0x268   : > { %v2767_v54 = vadd.f32 %v10429_v36, %v2637_v50  ;;  %v3293_v33 = vmul.f32 %v10229_v59, %v8210_v3  ;;  %v3359_v10 = vmul.f32 %v5725_v13, %v10408_v30  ;;  %v8231_v20 = vadd.f32 %v3742_v61, %v3552_v22 }
 0x269   : > { %v3095_v34 = vadd.f32 %v10430_v16, %v2965_v51  ;;  %v3489_v39 = vmul.f32 %v8040_v42, %v8215_v49  ;;  %v1185_v1 = vadd.s32 104, %v5712_v4  ;;  %v4317_v46 = vmul.f32 0.7978846, %v4253_v56  ;;  %v10440_v16 = vld [vmem:[#allocation63_spill] sm:$0xff] }
 0x26a   : > { %v2897_v11 = vadd.f32 %v2833_v45, %v2767_v54  ;;  %v3423_v44 = vadd.f32 %v3359_v10, %v3293_v33  ;;  %v10431_v58 = vrot.slane %v10415_v5, 7  ;;  %v10432_v17 = vrot.slane %v10397_v8, 7  ;;  %v5264_v41 = vpop.eup %5263 }
 0x26b   : > { %v3996_v60 = vmul.f32 0.5, %v8130_v40  ;;  %v4062_v48 = vmul.f32 0.044715, %v8231_v20  ;;  %v3225_v55 = vadd.f32 %v3161_v15, %v3095_v34  ;;  %v1299_v26 = vand.u32 7, %v1185_v1 }
 0x26c   : > { %v2201_v43 = vsel %vm2164_vm1, %v10432_v17, %v10431_v58  ;;  %v4444_v21 = vadd.f32 1.0, %v5264_v41  ;;  %5265 = vtanh.f32 %v4317_v46  ;;  %v3553_v6 = vadd.f32 %v3489_v39, %v3423_v44  ;;  %v10441_v44 = vld [vmem:[#allocation70_spill] sm:$0xff] }
 0x26d   : > { %v10434_v61 = vrot.slane %v10433_v24, 1  ;;  %v10435_v38 = vrot.slane %v10415_v5, 1  ;;  %v4126_v27 = vmul.f32 %v4062_v48, %v8231_v20  ;;  %v3743_v50 = vadd.f32 %v3225_v55, %v2897_v11 }
 0x26e   : > { %vm8252_vm7 = vcmp.gt.s32.totalorder %v1299_v26, 0  ;;  %vm8256_vm8 = vcmp.lt.s32.totalorder %v1299_v26, 7  ;;  %v4508_v45 = vmul.f32 %v4444_v21, %v3996_v60  ;;  %v2638_v56 = vmul.f32 %v5745_v23, %v8074_v14 }
 0x26f   : > { %v2456_v8 = vsel %vm2421_vm2, %v10435_v38, %v10434_v61  ;;  %v8262_v51 = vsel %vm8252_vm7, %v2201_v43, 0.0  ;;  %v4190_v36 = vmul.f32 %v4126_v27, %v8231_v20  ;;  %v8271_v54 = vadd.f32 %v3743_v50, %v3553_v6  ;;  %v10444_v27 = vld [vmem:[#allocation78_spill] sm:$0xff] }
 0x270   : > { %v8266_v15 = vsel %vm8256_vm8, %v2456_v8, 0.0  ;;  %v2834_v33 = vmul.f32 %v10314_v37, %v8078_v35  ;;  %v2966_v10 = vmul.f32 %v10273_v0, %v8176_v32  ;;  %4630 = vmatmul.f32.gmra.mxu2 %v4508_v45  ;;  %v2768_v34 = vadd.f32 %v10440_v16, %v2638_v56  ;;  %v10447_v16 = vld [vmem:[#allocation65_spill] sm:$0xff] }
 0x271   : > { %v3162_v39 = vmul.f32 %v5733_v18, %v8180_v52  ;;  %v3294_v1 = vmul.f32 %v10147_v57, %v8262_v51  ;;  %v3360_v14 = vmul.f32 %v5718_v7, %v10415_v5  ;;  %v3997_v46 = vmul.f32 0.5, %v8172_v63 }
 0x272   : > { %v4254_v11 = vadd.f32 %v4190_v36, %v8231_v20  ;;  %v4063_v35 = vmul.f32 0.044715, %v8271_v54  ;;  %v3096_v58 = vadd.f32 %v10441_v44, %v2966_v10  ;;  %v5266_v17 = vpop.eup %5265  ;;  %v2898_v43 = vadd.f32 %v2834_v33, %v2768_v34 }
 0x273   : > { %v3424_v41 = vadd.f32 %v3360_v14, %v3294_v1  ;;  %v3490_v60 = vmul.f32 %v7679_v29, %v8266_v15  ;;  %v10442_v48 = vrot.slane %v10426_v47, 7  ;;  %v10443_v55 = vrot.slane %v10408_v30, 7 }
 0x274   : > { %v4445_v63 = vadd.f32 1.0, %v5266_v17  ;;  %v4318_v21 = vmul.f32 0.7978846, %v4254_v11  ;;  %v4127_v6 = vmul.f32 %v4063_v35, %v8271_v54  ;;  %v3226_v61 = vadd.f32 %v3162_v39, %v3096_v58  ;;  %v10448_v35 = vld [vmem:[#allocation73_spill] sm:$0xff] }
 0x275   : > { %v2202_v26 = vsel %vm2164_vm1, %v10443_v55, %v10442_v48  ;;  %v3554_v38 = vadd.f32 %v3490_v60, %v3424_v41  ;;  %v10445_v50 = vrot.slane %v10444_v27, 1  ;;  %v10446_v45 = vrot.slane %v10426_v47, 1 }
 0x276   : > { %v8299_v8 = vsel %vm8252_vm7, %v2202_v26, 0.0  ;;  %v2639_v56 = vmul.f32 %v10064_v12, %v8109_v62  ;;  %v4509_v36 = vmul.f32 %v4445_v63, %v3997_v46  ;;  %5267 = vtanh.f32 %v4318_v21 }
 0x277   : > { %v2457_v30 = vsel %vm2421_vm2, %v10446_v45, %v10445_v50  ;;  %v4191_v33 = vmul.f32 %v4127_v6, %v8271_v54  ;;  %v3744_v10 = vadd.f32 %v3226_v61, %v2898_v43  ;;  %v2835_v39 = vmul.f32 %v5860_v28, %v8122_v53 }
 0x278   : > { %v8312_v22 = vsel %vm8256_vm8, %v2457_v30, 0.0  ;;  %v2769_v34 = vadd.f32 %v10447_v16, %v2639_v56  ;;  %v2967_v1 = vmul.f32 %v5736_v19, %v8210_v3  ;;  %4743 = vmatmul.f32.gmra.mxu3 %v4509_v36  ;;  %v3163_v46 = vmul.f32 %v10078_v25, %v8215_v49  ;;  %v10451_v36 = vld [vmem:[#allocation69_spill] sm:$0xff] }
 0x279   : > { %v4255_v62 = vadd.f32 %v4191_v33, %v8271_v54  ;;  %v8320_v14 = vadd.f32 %v3744_v10, %v3554_v38  ;;  %v3295_v40 = vmul.f32 %v10229_v59, %v8299_v8  ;;  %v3361_v53 = vmul.f32 %v5725_v13, %v10426_v47 }
 0x27a   : > { %v2899_v11 = vadd.f32 %v2835_v39, %v2769_v34  ;;  %v3097_v44 = vadd.f32 %v10448_v35, %v2967_v1  ;;  %v3491_v58 = vmul.f32 %v8040_v42, %v8312_v22  ;;  %v3998_v17 = vmul.f32 0.5, %v8231_v20  ;;  %v10456_v1 = vld [vmem:[#allocation82_spill] sm:$0xff] }
 0x27b   : > { %v4319_v43 = vmul.f32 0.7978846, %v4255_v62  ;;  %v4064_v41 = vmul.f32 0.044715, %v8320_v14  ;;  %v1186_v60 = vadd.s32 112, %v5712_v4  ;;  %v3425_v55 = vadd.f32 %v3361_v53, %v3295_v40 }
 0x27c   : > { %v3227_v48 = vadd.f32 %v3163_v46, %v3097_v44  ;;  %v10449_v26 = vrot.slane %v10433_v24, 7  ;;  %v10450_v63 = vrot.slane %v10415_v5, 7  ;;  %v2640_v6 = vmul.f32 %v5745_v23, %v8176_v32  ;;  %v5268_v61 = vpop.eup %5267 }
 0x27d   : > { %5269 = vtanh.f32 %v4319_v43  ;;  %v4128_v20 = vmul.f32 %v4064_v41, %v8320_v14  ;;  %v1306_v38 = vand.u32 7, %v1186_v60  ;;  %v2836_v50 = vmul.f32 %v10314_v37, %v8180_v52 }
 0x27e   : > { %v2199_v21 = vsel %vm2164_vm1, %v10450_v63, %v10449_v26  ;;  %v4446_v45 = vadd.f32 1.0, %v5268_v61  ;;  %v3555_v30 = vadd.f32 %v3491_v58, %v3425_v55  ;;  %v3745_v56 = vadd.f32 %v3227_v48, %v2899_v11  ;;  %v10457_v11 = vld [vmem:[#allocation76_spill] sm:$0xff] }
 0x27f   : > { %v2770_v33 = vadd.f32 %v10451_v36, %v2640_v6  ;;  %v4192_v5 = vmul.f32 %v4128_v20, %v8320_v14  ;;  %vm8347_vm9 = vcmp.gt.s32.totalorder %v1306_v38, 0  ;;  %vm8351_vm10 = vcmp.lt.s32.totalorder %v1306_v38, 7 }
 0x280   : > { %v2968_v16 = vmul.f32 %v10273_v0, %v8262_v51  ;;  %v4510_v34 = vmul.f32 %v4446_v45, %v3998_v17  ;;  %v8357_v52 = vadd.f32 %v3745_v56, %v3555_v30  ;;  %v8361_v39 = vsel %vm8347_vm9, %v2199_v21, 0.0 }
 0x281   : > { %v8366_v62 = vsel %vm8351_vm10, %v10456_v1, 0.0  ;;  %v4256_v46 = vadd.f32 %v4192_v5, %v8320_v14  ;;  %v2900_v40 = vadd.f32 %v2836_v50, %v2770_v33  ;;  %v3164_v44 = vmul.f32 %v5733_v18, %v8266_v15  ;;  %v10460_v50 = vld [vmem:[#allocation84_spill] sm:$0xff] }
 0x282   : > { %v3098_v35 = vadd.f32 %v10457_v11, %v2968_v16  ;;  %4633 = vmatmul.f32.gmra.mxu2 %v4510_v34  ;;  %v3999_v53 = vmul.f32 0.5, %v8271_v54  ;;  %v4065_v58 = vmul.f32 0.044715, %v8357_v52  ;;  %v3296_v17 = vmul.f32 %v10147_v57, %v8361_v39  ;;  %v10461_v33 = vld [vmem:[#allocation72_spill] sm:$0xff] }
 0x283   : > { %v3362_v43 = vmul.f32 %v5718_v7, %v10433_v24  ;;  %v5270_v41 = vpop.eup %5269  ;;  %v4320_v60 = vmul.f32 0.7978846, %v4256_v46  ;;  %v3492_v55 = vmul.f32 %v7679_v29, %v8366_v62  ;;  %v10458_v26 = vrot.slane %v10444_v27, 7 }
 0x284   : > { %v3228_v48 = vadd.f32 %v3164_v44, %v3098_v35  ;;  %v10459_v63 = vrot.slane %v10426_v47, 7  ;;  %v4447_v21 = vadd.f32 1.0, %v5270_v41  ;;  %v4129_v6 = vmul.f32 %v4065_v58, %v8357_v52  ;;  %v10463_v44 = vld [vmem:[#allocation85_spill] sm:$0xff]  ;;  %v10465_v58 = vld [vmem:[#allocation22_spill] sm:$0xff] }
 0x285   : > { %v3426_v61 = vadd.f32 %v3362_v43, %v3296_v17  ;;  %5271 = vtanh.f32 %v4320_v60  ;;  %v8394_v29 = vsel %vm8351_vm10, %v10460_v50, 0.0  ;;  %v2641_v47 = vmul.f32 %v10064_v12, %v8210_v3 }
 0x286   : > { %v2200_v54 = vsel %vm2164_vm1, %v10459_v63, %v10458_v26  ;;  %v3746_v38 = vadd.f32 %v3228_v48, %v2900_v40  ;;  %v4511_v45 = vmul.f32 %v4447_v21, %v3999_v53  ;;  %v4193_v30 = vmul.f32 %v4129_v6, %v8357_v52  ;;  %v10462_v40 = vld [vmem:[#allocation33_spill] sm:$0xff] }
 0x287   : > { %v8389_v20 = vsel %vm8347_vm9, %v2200_v54, 0.0  ;;  %v3556_v56 = vadd.f32 %v3492_v55, %v3426_v61  ;;  %v2837_v36 = vmul.f32 %v5860_v28, %v8215_v49  ;;  %v2771_v5 = vadd.f32 %v10461_v33, %v2641_v47 }
 0x288   : > { %v2969_v10 = vmul.f32 %v5736_v19, %v8299_v8  ;;  %v3165_v32 = vmul.f32 %v10078_v25, %v8312_v22  ;;  %v3297_v16 = vmul.f32 %v10229_v59, %v8389_v20  ;;  %4746 = vmatmul.f32.gmra.mxu3 %v4511_v45  ;;  %v4257_v3 = vadd.f32 %v4193_v30, %v8357_v52  ;;  %v10471_v30 = vld [vmem:[#allocation75_spill] sm:$0xff] }
 0x289   : > { %v8409_v34 = vadd.f32 %v3746_v38, %v3556_v56  ;;  %v3363_v1 = vmul.f32 %v5725_v13, %v10444_v27  ;;  %v3493_v49 = vmul.f32 %v8040_v42, %v8394_v29  ;;  %v2901_v46 = vadd.f32 %v2837_v36, %v2771_v5 }
 0x28a   : > { %v3099_v11 = vadd.f32 %v10462_v40, %v2969_v10  ;;  %v1187_v35 = vadd.s32 120, %v5712_v4  ;;  %v10464_v53 = vrot.slane %v10463_v44, 1  ;;  %v10466_v17 = vrot.slane %v10465_v58, 1  ;;  %v8457_v40 = vld [vmem:[%s9811_s2 + $0x10] ss:$0 sm:$0xff] }
 0x28b   : > { %v4000_v41 = vmul.f32 0.5, %v8320_v14  ;;  %v4321_v60 = vmul.f32 0.7978846, %v4257_v3  ;;  %v4066_v48 = vmul.f32 0.044715, %v8409_v34  ;;  %v3427_v55 = vadd.f32 %v3363_v1, %v3297_v16  ;;  %v5272_v26 = vpop.eup %5271 }
 0x28c   : > { %v2452_v43 = vsel %vm2421_vm2, %v10466_v17, %v10464_v53  ;;  %v3229_v63 = vadd.f32 %v3165_v32, %v3099_v11  ;;  %v1313_v54 = vand.u32 7, %v1187_v35  ;;  %v2642_v21 = vmul.f32 %v5745_v23, %v8262_v51  ;;  %v10473_v53 = vld [vmem:[#allocation79_spill] sm:$0xff] }
 0x28d   : > { %v2838_v6 = vmul.f32 %v10314_v37, %v8266_v15  ;;  %v4448_v61 = vadd.f32 1.0, %v5272_v26  ;;  %5273 = vtanh.f32 %v4321_v60  ;;  %v4130_v38 = vmul.f32 %v4066_v48, %v8409_v34  ;;  %v10472_v15 = vld [vmem:[#allocation81_spill] sm:$0xff]  ;;  %v10474_v17 = vld [vmem:[#allocation83_spill] sm:$0xff]  ;;  %v10477_v60 = vld [vmem:[#allocation80_spill] sm:$0xff] }
 0x28e   : > { %v3557_v50 = vadd.f32 %v3493_v49, %v3427_v55  ;;  %v3747_v47 = vadd.f32 %v3229_v63, %v2901_v46  ;;  %vm8430_vm11 = vcmp.gt.s32.totalorder %v1313_v54, 0  ;;  %vm8434_vm12 = vcmp.lt.s32.totalorder %v1313_v54, 7  ;;  %v10479_v54 = vld [vmem:[#allocation90_spill] sm:$0xff] }
 0x28f   : > { %v2772_v56 = vadd.f32 %v10471_v30, %v2642_v21  ;;  %v4512_v51 = vmul.f32 %v4448_v61, %v4000_v41  ;;  %v4194_v36 = vmul.f32 %v4130_v38, %v8409_v34  ;;  %v2323_v33 = vsel %vm8430_vm11, %v10472_v15, 0.0 }
 0x290   : > { %v2580_v5 = vsel %vm8434_vm12, %v2452_v43, 0.0  ;;  %v8445_v10 = vadd.f32 %v3747_v47, %v3557_v50  ;;  %v2970_v16 = vmul.f32 %v10273_v0, %v8361_v39  ;;  %v3166_v3 = vmul.f32 %v5733_v18, %v8366_v62 }
 0x291   : > { %v2902_v32 = vadd.f32 %v2838_v6, %v2772_v56  ;;  %4636 = vmatmul.f32.gmra.mxu2 %v4512_v51  ;;  %v4001_v1 = vmul.f32 0.5, %v8357_v52  ;;  %v4258_v49 = vadd.f32 %v4194_v36, %v8409_v34  ;;  %v3298_v46 = vmul.f32 %v10147_v57, %v2323_v33  ;;  %v10475_v52 = vld [vmem:[#allocation86_spill] sm:$0xff]  ;;  %v10480_v56 = vld [vmem:[#allocation77_spill] sm:$0xff] }
 0x292   : > { %v3494_v11 = vmul.f32 %v8457_v40, %v2580_v5  ;;  %v4067_v35 = vmul.f32 0.044715, %v8445_v10  ;;  %v3100_v58 = vadd.f32 %v10473_v53, %v2970_v16  ;;  %v2324_v43 = vsel %vm8430_vm11, %v10474_v17, 0.0  ;;  %v10482_v17 = vld [vmem:[#allocation96_spill] sm:$0xff] }
 0x293   : > { %v10476_v41 = vrot.slane %v10475_v52, 1  ;;  %v10478_v48 = vrot.slane %v10477_v60, 1  ;;  %v5274_v26 = vpop.eup %5273  ;;  %v4322_v63 = vmul.f32 0.7978846, %v4258_v49  ;;  %v3428_v21 = vadd.f32 %v10479_v54, %v3298_v46  ;;  %v10481_v46 = vld [vmem:[#allocation87_spill] sm:$0xff] }
 0x294   : > { %v2643_v61 = vmul.f32 %v10064_v12, %v8299_v8  ;;  %v4449_v38 = vadd.f32 1.0, %v5274_v26  ;;  %v4131_v50 = vmul.f32 %v4067_v35, %v8445_v10  ;;  %v3230_v47 = vadd.f32 %v3166_v3, %v3100_v58 }
 0x295   : > { %v2453_v55 = vsel %vm2421_vm2, %v10478_v48, %v10476_v41  ;;  %v2839_v14 = vmul.f32 %v5860_v28, %v8312_v22  ;;  %5275 = vtanh.f32 %v4322_v63  ;;  %v3558_v30 = vadd.f32 %v3494_v11, %v3428_v21 }
 0x296   : > { %v2581_v6 = vsel %vm8434_vm12, %v2453_v55, 0.0  ;;  %v2773_v51 = vadd.f32 %v10480_v56, %v2643_v61  ;;  %v2971_v36 = vmul.f32 %v5736_v19, %v8389_v20  ;;  %v4513_v15 = vmul.f32 %v4449_v38, %v4001_v1 }
 0x297   : > { %v4195_v45 = vmul.f32 %v4131_v50, %v8445_v10  ;;  %v3748_v16 = vadd.f32 %v3230_v47, %v2902_v32  ;;  %v3167_v8 = vmul.f32 %v10078_v25, %v8394_v29  ;;  %v3299_v35 = vmul.f32 %v10229_v59, %v2324_v43 }
 0x298   : > { %v2903_v49 = vadd.f32 %v2839_v14, %v2773_v51  ;;  %v3101_v3 = vadd.f32 %v10481_v46, %v2971_v36  ;;  %v3495_v22 = vmul.f32 %v8040_v42, %v2581_v6  ;;  %4749 = vmatmul.f32.gmra.mxu3 %v4513_v15  ;;  %v2644_v1 = vmul.f32 %v5745_v23, %v8361_v39  ;;  %v10483_v39 = vld [vmem:[#allocation89_spill] sm:$0xff] }
 0x299   : > { %v4259_v11 = vadd.f32 %v4195_v45, %v8445_v10  ;;  %v3940_v53 = vadd.f32 %v3748_v16, %v3558_v30  ;;  %v2710_v32 = vmul.f32 %v10313_v9, %v10433_v24  ;;  %v3429_v41 = vadd.f32 %v10482_v17, %v3299_v35  ;;  %v10485_v17 = vld [vmem:[#allocation67_spill] sm:$0xff] }
 0x29a   : > { %v3231_v58 = vadd.f32 %v3167_v8, %v3101_v3  ;;  %v2840_v60 = vmul.f32 %v10314_v37, %v8366_v62  ;;  %v2972_v48 = vmul.f32 %v10273_v0, %v2323_v33  ;;  %v4002_v55 = vmul.f32 0.5, %v8409_v34  ;;  %v10484_v3 = vld [vmem:[#allocation95_spill] sm:$0xff] }
 0x29b   : > { %v4323_v26 = vmul.f32 0.7978846, %v4259_v11  ;;  %v4068_v63 = vmul.f32 0.044715, %v3940_v53  ;;  %v2774_v54 = vadd.f32 %v2710_v32, %v2644_v1  ;;  %v5276_v21 = vpop.eup %5275  ;;  %v3559_v61 = vadd.f32 %v3495_v22, %v3429_v41 }
 0x29c   : > { %v3749_v38 = vadd.f32 %v3231_v58, %v2903_v49  ;;  %v3102_v50 = vadd.f32 %v10483_v39, %v2972_v48  ;;  %v3168_v24 = vmul.f32 %v5733_v18, %v2580_v5  ;;  %v4450_v47 = vadd.f32 1.0, %v5276_v21 }
 0x29d   : > { %5277 = vtanh.f32 %v4323_v26  ;;  %v4132_v14 = vmul.f32 %v4068_v63, %v3940_v53  ;;  %v2904_v30 = vadd.f32 %v2840_v60, %v2774_v54  ;;  %v2645_v33 = vmul.f32 %v10064_v12, %v8389_v20  ;;  %v10489_v26 = vld [vmem:[#allocation99_spill] sm:$0xff] }
 0x29e   : > { %v3941_v56 = vadd.f32 %v3749_v38, %v3559_v61  ;;  %v3232_v62 = vadd.f32 %v3168_v24, %v3102_v50  ;;  %v2711_v34 = vmul.f32 %v5710_v2, %v10444_v27  ;;  %v4514_v51 = vmul.f32 %v4450_v47, %v4002_v55 }
 0x29f   : > { %v4196_v36 = vmul.f32 %v4132_v14, %v3940_v53  ;;  %v2841_v15 = vmul.f32 %v5860_v28, %v8394_v29  ;;  %v2973_v45 = vmul.f32 %v5736_v19, %v2324_v43  ;;  %v4003_v5 = vmul.f32 0.5, %v8445_v10 }
 0x2a0   : > { %v4069_v16 = vmul.f32 0.044715, %v3941_v56  ;;  %v8508_v8 = vadd.f32 %v3232_v62, %v2904_v30  ;;  %v2775_v49 = vadd.f32 %v2711_v34, %v2645_v33  ;;  %4639 = vmatmul.f32.gmra.mxu2 %v4514_v51  ;;  %v3169_v35 = vmul.f32 %v10078_v25, %v2581_v6  ;;  %v10496_v62 = vld [vmem:[#allocation105_spill] sm:$0xff] }
 0x2a1   : > { %v4260_v46 = vadd.f32 %v4196_v36, %v3940_v53  ;;  %v3103_v20 = vadd.f32 %v10484_v3, %v2973_v45  ;;  %v1189_v27 = vadd.s32 136, %v5712_v4  ;;  %v4004_v22 = vmul.f32 0.5, %v3940_v53  ;;  %v10501_v3 = vld [vmem:[#allocation91_spill] sm:$0xff] }
 0x2a2   : > { %v4133_v11 = vmul.f32 %v4069_v16, %v3941_v56  ;;  %v4070_v29 = vmul.f32 0.044715, %v8508_v8  ;;  %v2905_v1 = vadd.f32 %v2841_v15, %v2775_v49  ;;  %v10486_v41 = vand.u32 7, %v10485_v17 }
 0x2a3   : > { %v5278_v43 = vpop.eup %5277  ;;  %v4324_v32 = vmul.f32 0.7978846, %v4260_v46  ;;  %v3233_v10 = vadd.f32 %v3169_v35, %v3103_v20  ;;  %v1327_v58 = vand.u32 7, %v1189_v27  ;;  %v10490_v53 = vrot.slane %v10489_v26, 7 }
 0x2a4   : > { %vm8516_vm13 = vcmp.lt.s32.totalorder %v10486_v41, 7  ;;  %v4451_v48 = vadd.f32 1.0, %v5278_v43  ;;  %v4197_v55 = vmul.f32 %v4133_v11, %v3941_v56  ;;  %v4134_v6 = vmul.f32 %v4070_v29, %v8508_v8 }
 0x2a5   : > { %v10491_v63 = vrot.slane %v10463_v44, 7  ;;  %5279 = vtanh.f32 %v4324_v32  ;;  %v8527_v21 = vadd.f32 %v3233_v10, %v2905_v1  ;;  %vm8529_vm14 = vcmp.gt.s32.totalorder %v1327_v58, 0  ;;  %v10502_v32 = vld [vmem:[#allocation97_spill] sm:$0xff] }
 0x2a6   : > { %vm8533_vm15 = vcmp.lt.s32.totalorder %v1327_v58, 7  ;;  %v4515_v39 = vmul.f32 %v4451_v48, %v4003_v5  ;;  %v4261_v50 = vadd.f32 %v4197_v55, %v3941_v56  ;;  %v4198_v24 = vmul.f32 %v4134_v6, %v8508_v8  ;;  %v10503_v58 = vld [vmem:[#allocation100_spill] sm:$0xff]  ;;  %v10506_v55 = vld [vmem:[#allocation26_spill] sm:$0xff] }
 0x2a7   : > { %v2193_v54 = vsel %vm2164_vm1, %v10491_v63, %v10490_v53  ;;  %v4005_v14 = vmul.f32 0.5, %v3941_v56  ;;  %v4071_v30 = vmul.f32 0.044715, %v8527_v21  ;;  %v10497_v33 = vrot.slane %v10496_v62, 1 }
 0x2a8   : > { %v8540_v47 = vsel %vm8529_vm14, %v2193_v54, 0.0  ;;  %v10498_v34 = vrot.slane %v10489_v26, 1  ;;  %v10500_v15 = vrot.slane %v10463_v44, 1  ;;  %4752 = vmatmul.f32.gmra.mxu3 %v4515_v39  ;;  %v4325_v5 = vmul.f32 0.7978846, %v4261_v50 }
 0x2a9   : > { %v4262_v56 = vadd.f32 %v4198_v24, %v8508_v8  ;;  %v4135_v46 = vmul.f32 %v4071_v30, %v8527_v21  ;;  %v2974_v20 = vmul.f32 %v10273_v0, %v10501_v3  ;;  %v3302_v35 = vmul.f32 %v10147_v57, %v8540_v47 }
 0x2aa   : > { %v2448_v51 = vsel %vm2421_vm2, %v10498_v34, %v10497_v33  ;;  %v10499_v36 = vmov %v10498_v34  ;;  %5281 = vtanh.f32 %v4325_v5  ;;  %v3368_v11 = vmul.f32 %v5718_v7, %v10489_v26 }
 0x2ab   : > { %v2450_v45 = vsel %vm2421_vm2, %v10500_v15, %v10499_v36  ;;  %v8560_v49 = vsel %vm8533_vm15, %v2448_v51, 0.0  ;;  %v4326_v27 = vmul.f32 0.7978846, %v4262_v56  ;;  %v5280_v1 = vpop.eup %5279  ;;  %v4199_v43 = vmul.f32 %v4135_v46, %v8527_v21  ;;  %v4601_v15 = vpop.f32.mrf.mxu0  ;;  %v10511_v46 = vld [vmem:[#allocation92_spill] sm:$0xff] }
 0x2ac   : > { %v2582_v16 = vsel %vm8516_vm13, %v2450_v45, 0.0  ;;  %v3498_v29 = vmul.f32 %v8457_v40, %v8560_v49  ;;  %v3104_v10 = vadd.f32 %v10502_v32, %v2974_v20  ;;  %v10504_v17 = vrot.slane %v10503_v58, 7  ;;  %v4714_v45 = vpop.f32.mrf.mxu1 }
 0x2ad   : > { %v3170_v44 = vmul.f32 %v5733_v18, %v2582_v16  ;;  %v10505_v41 = vrot.slane %v10475_v52, 7  ;;  %v10507_v6 = vrot.slane %v10506_v55, 1  ;;  %v10508_v53 = vrot.slane %v10503_v58, 1 }
 0x2ae   : > { %v4452_v54 = vadd.f32 1.0, %v5280_v1  ;;  %5283 = vtanh.f32 %v4326_v27  ;;  %v3432_v39 = vadd.f32 %v3368_v11, %v3302_v35  ;;  %v4263_v24 = vadd.f32 %v4199_v43, %v8527_v21  ;;  %v10512_v27 = vld [vmem:[#allocation98_spill] sm:$0xff] }
 0x2af   : > { %v2194_v48 = vsel %vm2164_vm1, %v10505_v41, %v10504_v17  ;;  %v2449_v63 = vsel %vm2421_vm2, %v10508_v53, %v10507_v6  ;;  %v3234_v30 = vadd.f32 %v3170_v44, %v3104_v10  ;;  %v10509_v33 = vmov %v10508_v53 }
 0x2b0   : > { %v8588_v50 = vsel %vm8529_vm14, %v2194_v48, 0.0  ;;  %v10510_v34 = vrot.slane %v10475_v52, 1  ;;  %v8599_v36 = vsel %vm8533_vm15, %v2449_v63, 0.0  ;;  %v4516_v5 = vmul.f32 %v4452_v54, %v4004_v22  ;;  %v5282_v35 = vpop.eup %5281 }
 0x2b1   : > { %v3562_v61 = vadd.f32 %v3498_v29, %v3432_v39  ;;  %v2975_v3 = vmul.f32 %v5736_v19, %v10511_v46  ;;  %v4327_v20 = vmul.f32 0.7978846, %v4263_v24  ;;  %v3303_v44 = vmul.f32 %v10229_v59, %v8588_v50 }
 0x2b2   : > { %v2451_v51 = vsel %vm2421_vm2, %v10510_v34, %v10509_v33  ;;  %v3369_v38 = vmul.f32 %v5725_v13, %v10503_v58  ;;  %4642 = vmatmul.f32.gmra.mxu2 %v4516_v5  ;;  %v3499_v11 = vmul.f32 %v8040_v42, %v8599_v36  ;;  %v4715_v29 = vadd.f32 %v4714_v45, %v4601_v15  ;;  %v10515_v33 = vld [vmem:[#allocation108_spill] sm:$0xff] }
 0x2b3   : > { %v2583_v56 = vsel %vm8516_vm13, %v2451_v51, 0.0  ;;  %v8610_v22 = vadd.f32 %v3562_v61, %v3234_v30  ;;  %v3105_v60 = vadd.f32 %v10512_v27, %v2975_v3  ;;  %v4453_v1 = vadd.f32 1.0, %v5282_v35 }
 0x2b4   : > { %v3171_v52 = vmul.f32 %v10078_v25, %v2583_v56  ;;  %5285 = vtanh.f32 %v4327_v20  ;;  %v3433_v43 = vadd.f32 %v3369_v38, %v3303_v44  ;;  %v1190_v32 = vadd.s32 144, %v5712_v4  ;;  %v5284_v10 = vpop.eup %5283  ;;  %4810 = vst.msk [vmem:[%s8620_s29] sm:$0xff] %vm268_vm0, %v4715_v29 }
 0x2b5   : > { %v4006_v17 = vmul.f32 0.5, %v8508_v8  ;;  %v4072_v41 = vmul.f32 0.044715, %v8610_v22  ;;  %v10513_v6 = vrot.slane %v10496_v62, 7  ;;  %v10514_v53 = vrot.slane %v10489_v26, 7 }
 0x2b6   : > { %v3235_v48 = vadd.f32 %v3171_v52, %v3105_v60  ;;  %v4517_v54 = vmul.f32 %v4453_v1, %v4005_v14  ;;  %v4454_v39 = vadd.f32 1.0, %v5284_v10  ;;  %v3563_v24 = vadd.f32 %v3499_v11, %v3433_v43  ;;  %v10522_v52 = vld [vmem:[#allocation93_spill] sm:$0xff]  ;;  %v10523_v60 = vld [vmem:[#allocation102_spill] sm:$0xff] }
 0x2b7   : > { %v2191_v63 = vsel %vm2164_vm1, %v10514_v53, %v10513_v6  ;;  %v1334_v8 = vand.u32 7, %v1190_v32  ;;  %v4136_v30 = vmul.f32 %v4072_v41, %v8610_v22  ;;  %v10516_v34 = vrot.slane %v10515_v33, 1 }
 0x2b8   : > { %v10517_v51 = vrot.slane %v10496_v62, 1  ;;  %v2844_v45 = vmul.f32 %v10314_v37, %v2582_v16  ;;  %v2976_v26 = vmul.f32 %v10273_v0, %v8540_v47  ;;  %4755 = vmatmul.f32.gmra.mxu3 %v4517_v54  ;;  %v4518_v5 = vmul.f32 %v4454_v39, %v4006_v17 }
 0x2b9   : > { %v8640_v14 = vadd.f32 %v3563_v24, %v3235_v48  ;;  %vm8642_vm3 = vcmp.gt.s32.totalorder %v1334_v8, 0  ;;  %vm8646_vm4 = vcmp.lt.s32.totalorder %v1334_v8, 7  ;;  %v4200_v3 = vmul.f32 %v4136_v30, %v8610_v22 }
 0x2ba   : > { %v2446_v15 = vsel %vm2421_vm2, %v10517_v51, %v10516_v34  ;;  %v8653_v16 = vsel %vm8642_vm3, %v2191_v63, 0.0  ;;  %v2908_v44 = vadd.f32 %v2844_v45, %v10522_v52  ;;  %v5286_v38 = vpop.eup %5285  ;;  %v4007_v35 = vmul.f32 0.5, %v8527_v21  ;;  %4645 = vmatmul.f32.gmra.mxu2 %v4518_v5  ;;  %v10526_v34 = vld [vmem:[#allocation111_spill] sm:$0xff]  ;;  %v4717_v52 = vpop.f32.mrf.mxu3 }
 0x2bb   : > { %v8657_v20 = vsel %vm8646_vm4, %v2446_v15, 0.0  ;;  %v4073_v27 = vmul.f32 0.044715, %v8640_v14  ;;  %v3106_v11 = vadd.f32 %v10523_v60, %v2976_v26  ;;  %v3172_v29 = vmul.f32 %v5733_v18, %v8560_v49  ;;  %v10530_v60 = vld [vmem:[#allocation104_spill] sm:$0xff] }
 0x2bc   : > { %v4455_v1 = vadd.f32 1.0, %v5286_v38  ;;  %v4264_v43 = vadd.f32 %v4200_v3, %v8610_v22  ;;  %v3304_v32 = vmul.f32 %v10147_v57, %v8653_v16  ;;  %v3370_v10 = vmul.f32 %v5718_v7, %v10496_v62  ;;  %v4604_v3 = vpop.f32.mrf.mxu2  ;;  %v10529_v38 = vld [vmem:[#allocation94_spill] sm:$0xff] }
 0x2bd   : > { %v4137_v17 = vmul.f32 %v4073_v27, %v8640_v14  ;;  %v3236_v21 = vadd.f32 %v3172_v29, %v3106_v11  ;;  %v3500_v41 = vmul.f32 %v8457_v40, %v8657_v20  ;;  %v10524_v48 = vrot.slane %v10506_v55, 7 }
 0x2be   : > { %v10525_v6 = vrot.slane %v10503_v58, 7  ;;  %v4519_v63 = vmul.f32 %v4455_v1, %v4007_v35  ;;  %v4328_v54 = vmul.f32 0.7978846, %v4264_v43  ;;  %v3434_v39 = vadd.f32 %v3370_v10, %v3304_v32 }
 0x2bf   : > { %v4201_v8 = vmul.f32 %v4137_v17, %v8640_v14  ;;  %v3754_v30 = vadd.f32 %v3236_v21, %v2908_v44  ;;  %v10527_v51 = vrot.slane %v10526_v34, 1  ;;  %v10528_v15 = vrot.slane %v10506_v55, 1 }
 0x2c0   : > { %v2192_v53 = vsel %vm2164_vm1, %v10525_v6, %v10524_v48  ;;  %v2845_v45 = vmul.f32 %v5860_v28, %v2583_v56  ;;  %5287 = vtanh.f32 %v4328_v54  ;;  %v3564_v26 = vadd.f32 %v3500_v41, %v3434_v39  ;;  %4758 = vmatmul.f32.gmra.mxu3 %v4519_v63  ;;  %v10533_v54 = vld [vmem:[#allocation114_spill] sm:$0xff] }
 0x2c1   : > { %v8681_v24 = vsel %vm8642_vm3, %v2192_v53, 0.0  ;;  %v2447_v58 = vsel %vm2421_vm2, %v10528_v15, %v10527_v51  ;;  %v2977_v61 = vmul.f32 %v5736_v19, %v8588_v50  ;;  %v4265_v44 = vadd.f32 %v4201_v8, %v8640_v14 }
 0x2c2   : > { %v8693_v5 = vsel %vm8646_vm4, %v2447_v58, 0.0  ;;  %v2909_v35 = vadd.f32 %v2845_v45, %v10529_v38  ;;  %v3173_v56 = vmul.f32 %v10078_v25, %v8599_v36  ;;  %v3305_v27 = vmul.f32 %v10229_v59, %v8681_v24 }
 0x2c3   : > { %v8703_v46 = vadd.f32 %v3754_v30, %v3564_v26  ;;  %v3107_v11 = vadd.f32 %v10530_v60, %v2977_v61  ;;  %v3371_v29 = vmul.f32 %v5725_v13, %v10506_v55  ;;  %v3501_v1 = vmul.f32 %v8040_v42, %v8693_v5 }
 0x2c4   : > { %v4329_v43 = vmul.f32 0.7978846, %v4265_v44  ;;  %v4718_v32 = vadd.f32 %v4717_v52, %v4604_v3  ;;  %v1191_v10 = vadd.s32 152, %v5712_v4  ;;  %v10531_v17 = vrot.slane %v10515_v33, 7  ;;  %v10540_v52 = vld [vmem:[#allocation101_spill] sm:$0xff] }
 0x2c5   : > { %v10532_v21 = vrot.slane %v10496_v62, 7  ;;  %v4008_v48 = vmul.f32 0.5, %v8610_v22  ;;  %v4074_v6 = vmul.f32 0.044715, %v8703_v46  ;;  %v3237_v53 = vadd.f32 %v3173_v56, %v3107_v11 }
 0x2c6   : > { %v3435_v63 = vadd.f32 %v3371_v29, %v3305_v27  ;;  %5289 = vtanh.f32 %v4329_v43  ;;  %4811 = vst.msk [vmem:[%s8620_s29 + $0x8] sm:$0xff] %vm268_vm0, %v4718_v32  ;;  %v1341_v42 = vand.u32 7, %v1191_v10  ;;  %v10534_v39 = vrot.slane %v10533_v54, 1  ;;  %v5288_v51 = vpop.eup %5287 }
 0x2c7   : > { %v2189_v41 = vsel %vm2164_vm1, %v10532_v21, %v10531_v17  ;;  %v10535_v8 = vrot.slane %v10515_v33, 1  ;;  %v2650_v30 = vmul.f32 %v5745_v23, %v8540_v47  ;;  %v4138_v22 = vmul.f32 %v4074_v6, %v8703_v46  ;;  %v10541_v17 = vld [vmem:[#allocation107_spill] sm:$0xff] }
 0x2c8   : > { %v3565_v15 = vadd.f32 %v3501_v1, %v3435_v63  ;;  %v3755_v58 = vadd.f32 %v3237_v53, %v2909_v35  ;;  %v2846_v45 = vmul.f32 %v10314_v37, %v8560_v49  ;;  %v4456_v26 = vadd.f32 1.0, %v5288_v51  ;;  %v10544_v51 = vld [vmem:[#allocation117_spill] sm:$0xff] }
 0x2c9   : > { %v2444_v62 = vsel %vm2421_vm2, %v10535_v8, %v10534_v39  ;;  %vm8732_vm5 = vcmp.gt.s32.totalorder %v1341_v42, 0  ;;  %vm8736_vm6 = vcmp.lt.s32.totalorder %v1341_v42, 7  ;;  %v2780_v44 = vadd.f32 %v10540_v52, %v2650_v30 }
 0x2ca   : > { %v4202_v47 = vmul.f32 %v4138_v22, %v8703_v46  ;;  %v8742_v38 = vadd.f32 %v3755_v58, %v3565_v15  ;;  %v8746_v35 = vsel %vm8732_vm5, %v2189_v41, 0.0  ;;  %v8750_v49 = vsel %vm8736_vm6, %v2444_v62, 0.0 }
 0x2cb   : > { %v4520_v56 = vmul.f32 %v4456_v26, %v4008_v48  ;;  %v2910_v27 = vadd.f32 %v2846_v45, %v2780_v44  ;;  %v2978_v60 = vmul.f32 %v10273_v0, %v8653_v16  ;;  %v3174_v11 = vmul.f32 %v5733_v18, %v8657_v20 }
 0x2cc   : > { %v4009_v29 = vmul.f32 0.5, %v8640_v14  ;;  %v4266_v1 = vadd.f32 %v4202_v47, %v8703_v46  ;;  %v4075_v43 = vmul.f32 0.044715, %v8742_v38  ;;  %v3306_v32 = vmul.f32 %v10147_v57, %v8746_v35  ;;  %v5290_v10 = vpop.eup %5289  ;;  %v10547_v47 = vld [vmem:[#allocation103_spill] sm:$0xff] }
 0x2cd   : > { %4648 = vmatmul.f32.gmra.mxu2 %v4520_v56  ;;  %v3108_v21 = vadd.f32 %v10541_v17, %v2978_v60  ;;  %v3372_v41 = vmul.f32 %v5718_v7, %v10515_v33  ;;  %v3502_v48 = vmul.f32 %v8457_v40, %v8750_v49  ;;  %v10542_v6 = vrot.slane %v10526_v34, 7 }
 0x2ce   : > { %v10543_v14 = vrot.slane %v10506_v55, 7  ;;  %v4457_v63 = vadd.f32 1.0, %v5290_v10  ;;  %v4330_v42 = vmul.f32 0.7978846, %v4266_v1  ;;  %v4139_v39 = vmul.f32 %v4075_v43, %v8742_v38  ;;  %v4720_v1 = vpop.f32.mrf.mxu3  ;;  %v8807_v10 = vld [vmem:[%s9811_s2 + $0x18] ss:$0 sm:$0xff] }
 0x2cf   : > { %v3238_v62 = vadd.f32 %v3174_v11, %v3108_v21  ;;  %v3436_v30 = vadd.f32 %v3372_v41, %v3306_v32  ;;  %v10545_v22 = vrot.slane %v10544_v51, 1  ;;  %v10546_v15 = vrot.slane %v10526_v34, 1  ;;  %v4607_v11 = vpop.f32.mrf.mxu2  ;;  %v10548_v41 = vld [vmem:[#allocation110_spill] sm:$0xff] }
 0x2d0   : > { %v2190_v53 = vsel %vm2164_vm1, %v10543_v14, %v10542_v6  ;;  %v2651_v58 = vmul.f32 %v10064_v12, %v8588_v50  ;;  %v4521_v45 = vmul.f32 %v4457_v63, %v4009_v29  ;;  %5291 = vtanh.f32 %v4330_v42 }
 0x2d1   : > { %v8775_v8 = vsel %vm8732_vm5, %v2190_v53, 0.0  ;;  %v2445_v55 = vsel %vm2421_vm2, %v10546_v15, %v10545_v22  ;;  %v4203_v26 = vmul.f32 %v4139_v39, %v8742_v38  ;;  %v3566_v52 = vadd.f32 %v3502_v48, %v3436_v30 }
 0x2d2   : > { %v8788_v61 = vsel %vm8736_vm6, %v2445_v55, 0.0  ;;  %v3756_v44 = vadd.f32 %v3238_v62, %v2910_v27  ;;  %v2781_v56 = vadd.f32 %v10547_v47, %v2651_v58  ;;  %v2847_v60 = vmul.f32 %v5860_v28, %v8599_v36  ;;  %4761 = vmatmul.f32.gmra.mxu3 %v4521_v45  ;;  %v10551_v58 = vld [vmem:[#allocation121_spill] sm:$0xff] }
 0x2d3   : > { %v4267_v50 = vadd.f32 %v4203_v26, %v8742_v38  ;;  %v2979_v29 = vmul.f32 %v5736_v19, %v8681_v24  ;;  %v3175_v3 = vmul.f32 %v10078_v25, %v8693_v5  ;;  %v3307_v43 = vmul.f32 %v10229_v59, %v8775_v8 }
 0x2d4   : > { %v8800_v27 = vadd.f32 %v3756_v44, %v3566_v52  ;;  %v2911_v32 = vadd.f32 %v2847_v60, %v2781_v56  ;;  %v3373_v36 = vmul.f32 %v5725_v13, %v10526_v34  ;;  %v3503_v17 = vmul.f32 %v8807_v10, %v8788_v61 }
 0x2d5   : > { %v4331_v21 = vmul.f32 0.7978846, %v4267_v50  ;;  %v3109_v48 = vadd.f32 %v10548_v41, %v2979_v29  ;;  %v4721_v6 = vadd.f32 %v4720_v1, %v4607_v11  ;;  %v1192_v14 = vadd.s32 160, %v5712_v4 }
 0x2d6   : > { %v4010_v53 = vmul.f32 0.5, %v8703_v46  ;;  %v4076_v63 = vmul.f32 0.044715, %v8800_v27  ;;  %v3437_v42 = vadd.f32 %v3373_v36, %v3307_v43  ;;  %v10549_v39 = vrot.slane %v10533_v54, 7  ;;  %v5292_v22 = vpop.eup %5291 }
 0x2d7   : > { %v10550_v62 = vrot.slane %v10515_v33, 7  ;;  %5293 = vtanh.f32 %v4331_v21  ;;  %v3239_v15 = vadd.f32 %v3175_v3, %v3109_v48  ;;  %4812 = vst.msk [vmem:[%s8620_s29 + $0x10] sm:$0xff] %vm268_vm0, %v4721_v6  ;;  %v1348_v55 = vand.u32 7, %v1192_v14 }
 0x2d8   : > { %v10552_v45 = vrot.slane %v10551_v58, 1  ;;  %v10553_v46 = vrot.slane %v10533_v54, 1  ;;  %v4458_v52 = vadd.f32 1.0, %v5292_v22  ;;  %v4140_v44 = vmul.f32 %v4076_v63, %v8800_v27 }
 0x2d9   : > { %v2187_v30 = vsel %vm2164_vm1, %v10550_v62, %v10549_v39  ;;  %v3567_v33 = vadd.f32 %v3503_v17, %v3437_v42  ;;  %v2652_v47 = vmul.f32 %v5745_v23, %v8653_v16  ;;  %v3757_v56 = vadd.f32 %v3239_v15, %v2911_v32  ;;  %v10558_v32 = vld [vmem:[#allocation106_spill] sm:$0xff]  ;;  %v10559_v39 = vld [vmem:[#allocation113_spill] sm:$0xff] }
 0x2da   : > { %v2442_v26 = vsel %vm2421_vm2, %v10553_v46, %v10552_v45  ;;  %vm8832_vm7 = vcmp.gt.s32.totalorder %v1348_v55, 0  ;;  %vm8836_vm8 = vcmp.lt.s32.totalorder %v1348_v55, 7  ;;  %v2848_v1 = vmul.f32 %v10314_v37, %v8657_v20 }
 0x2db   : > { %v4522_v50 = vmul.f32 %v4458_v52, %v4010_v53  ;;  %v4204_v29 = vmul.f32 %v4140_v44, %v8800_v27  ;;  %v8845_v3 = vsel %vm8832_vm7, %v2187_v30, 0.0  ;;  %v8849_v16 = vsel %vm8836_vm8, %v2442_v26, 0.0  ;;  %v10562_v44 = vld [vmem:[#allocation125_spill] sm:$0xff] }
 0x2dc   : > { %v8851_v43 = vadd.f32 %v3757_v56, %v3567_v33  ;;  %v2782_v36 = vadd.f32 %v10558_v32, %v2652_v47  ;;  %v2980_v17 = vmul.f32 %v10273_v0, %v8746_v35  ;;  %v3176_v20 = vmul.f32 %v5733_v18, %v8750_v49 }
 0x2dd   : > { %4651 = vmatmul.f32.gmra.mxu2 %v4522_v50  ;;  %v4268_v21 = vadd.f32 %v4204_v29, %v8800_v27  ;;  %v3308_v41 = vmul.f32 %v10147_v57, %v8845_v3  ;;  %v3374_v48 = vmul.f32 %v5718_v7, %v10533_v54  ;;  %v3504_v6 = vmul.f32 %v8457_v40, %v8849_v16  ;;  %v5294_v14 = vpop.eup %5293 }
 0x2de   : > { %v4011_v53 = vmul.f32 0.5, %v8742_v38  ;;  %v4077_v63 = vmul.f32 0.044715, %v8851_v43  ;;  %v2912_v42 = vadd.f32 %v2848_v1, %v2782_v36  ;;  %v3110_v62 = vadd.f32 %v10559_v39, %v2980_v17  ;;  %v4610_v17 = vpop.f32.mrf.mxu2 }
 0x2df   : > { %v4459_v30 = vadd.f32 1.0, %v5294_v14  ;;  %v4332_v22 = vmul.f32 0.7978846, %v4268_v21  ;;  %v3438_v15 = vadd.f32 %v3374_v48, %v3308_v41  ;;  %v10560_v55 = vrot.slane %v10544_v51, 7 }
 0x2e0   : > { %v10561_v45 = vrot.slane %v10526_v34, 7  ;;  %v4141_v26 = vmul.f32 %v4077_v63, %v8851_v43  ;;  %v3240_v52 = vadd.f32 %v3176_v20, %v3110_v62  ;;  %v10563_v33 = vrot.slane %v10562_v44, 1  ;;  %v4723_v20 = vpop.f32.mrf.mxu3  ;;  %v10566_v63 = vld [vmem:[#allocation116_spill] sm:$0xff] }
 0x2e1   : > { %v10564_v47 = vrot.slane %v10544_v51, 1  ;;  %v4523_v1 = vmul.f32 %v4459_v30, %v4011_v53  ;;  %5295 = vtanh.f32 %v4332_v22  ;;  %v3568_v34 = vadd.f32 %v3504_v6, %v3438_v15 }
 0x2e2   : > { %v2188_v46 = vsel %vm2164_vm1, %v10561_v45, %v10560_v55  ;;  %v4205_v29 = vmul.f32 %v4141_v26, %v8851_v43  ;;  %v3758_v32 = vadd.f32 %v3240_v52, %v2912_v42  ;;  %v2653_v60 = vmul.f32 %v10064_v12, %v8681_v24 }
 0x2e3   : > { %v8877_v38 = vsel %vm8832_vm7, %v2188_v46, 0.0  ;;  %v2443_v56 = vsel %vm2421_vm2, %v10564_v47, %v10563_v33  ;;  %v2849_v36 = vmul.f32 %v5860_v28, %v8693_v5  ;;  %4764 = vmatmul.f32.gmra.mxu3 %v4523_v1  ;;  %v2981_v21 = vmul.f32 %v5736_v19, %v8775_v8  ;;  %v10565_v5 = vld [vmem:[#allocation109_spill] sm:$0xff] }
 0x2e4   : > { %v8887_v50 = vsel %vm8836_vm8, %v2443_v56, 0.0  ;;  %v3177_v11 = vmul.f32 %v10078_v25, %v8788_v61  ;;  %v3309_v41 = vmul.f32 %v10229_v59, %v8877_v38  ;;  %v3375_v48 = vmul.f32 %v5725_v13, %v10544_v51 }
 0x2e5   : > { %v4269_v24 = vadd.f32 %v4205_v29, %v8851_v43  ;;  %v8903_v6 = vadd.f32 %v3758_v32, %v3568_v34  ;;  %v2783_v14 = vadd.f32 %v10565_v5, %v2653_v60  ;;  %v3505_v53 = vmul.f32 %v8807_v10, %v8887_v50  ;;  %v10569_v29 = vld [vmem:[#allocation129_spill] sm:$0xff] }
 0x2e6   : > { %v3111_v42 = vadd.f32 %v10566_v63, %v2981_v21  ;;  %v3439_v39 = vadd.f32 %v3375_v48, %v3309_v41  ;;  %v4724_v62 = vadd.f32 %v4723_v20, %v4610_v17  ;;  %v1193_v30 = vadd.s32 168, %v5712_v4 }
 0x2e7   : > { %v4012_v22 = vmul.f32 0.5, %v8800_v27  ;;  %v4333_v15 = vmul.f32 0.7978846, %v4269_v24  ;;  %v4078_v55 = vmul.f32 0.044715, %v8903_v6  ;;  %v2913_v45 = vadd.f32 %v2849_v36, %v2783_v14  ;;  %v5296_v46 = vpop.eup %5295  ;;  %v10576_v14 = vld [vmem:[#allocation112_spill] sm:$0xff] }
 0x2e8   : > { %v3241_v26 = vadd.f32 %v3177_v11, %v3111_v42  ;;  %v3569_v52 = vadd.f32 %v3505_v53, %v3439_v39  ;;  %4813 = vst.msk [vmem:[%s8620_s29 + $0x18] sm:$0xff] %vm268_vm0, %v4724_v62  ;;  %v1355_v33 = vand.u32 7, %v1193_v30  ;;  %v10567_v47 = vrot.slane %v10551_v58, 7 }
 0x2e9   : > { %v10568_v56 = vrot.slane %v10533_v54, 7  ;;  %v4460_v34 = vadd.f32 1.0, %v5296_v46  ;;  %5297 = vtanh.f32 %v4333_v15  ;;  %v4142_v27 = vmul.f32 %v4078_v55, %v8903_v6  ;;  %v10577_v55 = vld [vmem:[#allocation120_spill] sm:$0xff] }
 0x2ea   : > { %v10570_v32 = vrot.slane %v10569_v29, 1  ;;  %v10571_v60 = vrot.slane %v10551_v58, 1  ;;  %v3759_v17 = vadd.f32 %v3241_v26, %v2913_v45  ;;  %vm8927_vm9 = vcmp.gt.s32.totalorder %v1355_v33, 0 }
 0x2eb   : > { %v2185_v1 = vsel %vm2164_vm1, %v10568_v56, %v10567_v47  ;;  %vm8931_vm10 = vcmp.lt.s32.totalorder %v1355_v33, 7  ;;  %v2654_v21 = vmul.f32 %v5745_v23, %v8746_v35  ;;  %v4524_v11 = vmul.f32 %v4460_v34, %v4012_v22 }
 0x2ec   : > { %v2440_v36 = vsel %vm2421_vm2, %v10571_v60, %v10570_v32  ;;  %v4206_v41 = vmul.f32 %v4142_v27, %v8903_v6  ;;  %v8940_v48 = vsel %vm8927_vm9, %v2185_v1, 0.0  ;;  %v8946_v5 = vadd.f32 %v3759_v17, %v3569_v52 }
 0x2ed   : > { %v8944_v24 = vsel %vm8931_vm10, %v2440_v36, 0.0  ;;  %v2784_v53 = vadd.f32 %v10576_v14, %v2654_v21  ;;  %v2850_v63 = vmul.f32 %v10314_v37, %v8750_v49  ;;  %v2982_v35 = vmul.f32 %v10273_v0, %v8845_v3  ;;  %4654 = vmatmul.f32.gmra.mxu2 %v4524_v11  ;;  %v10580_v36 = vld [vmem:[#allocation131_spill] sm:$0xff] }
 0x2ee   : > { %v4270_v42 = vadd.f32 %v4206_v41, %v8903_v6  ;;  %v3178_v39 = vmul.f32 %v5733_v18, %v8849_v16  ;;  %v3310_v62 = vmul.f32 %v10147_v57, %v8940_v48  ;;  %v3376_v30 = vmul.f32 %v5718_v7, %v10551_v58 }
 0x2ef   : > { %v4013_v22 = vmul.f32 0.5, %v8851_v43  ;;  %v4079_v15 = vmul.f32 0.044715, %v8946_v5  ;;  %v2914_v49 = vadd.f32 %v2850_v63, %v2784_v53  ;;  %v3112_v45 = vadd.f32 %v10577_v55, %v2982_v35  ;;  %v5298_v46 = vpop.eup %5297  ;;  %v4613_v63 = vpop.f32.mrf.mxu2 }
 0x2f0   : > { %v4334_v26 = vmul.f32 0.7978846, %v4270_v42  ;;  %v3440_v52 = vadd.f32 %v3376_v30, %v3310_v62  ;;  %v3506_v33 = vmul.f32 %v8457_v40, %v8944_v24  ;;  %v10578_v47 = vrot.slane %v10562_v44, 7  ;;  %v4726_v35 = vpop.f32.mrf.mxu3  ;;  %v10583_v42 = vld [vmem:[#allocation115_spill] sm:$0xff] }
 0x2f1   : > { %v10579_v56 = vrot.slane %v10544_v51, 7  ;;  %v4461_v34 = vadd.f32 1.0, %v5298_v46  ;;  %v4143_v43 = vmul.f32 %v4079_v15, %v8946_v5  ;;  %v3242_v27 = vadd.f32 %v3178_v39, %v3112_v45 }
 0x2f2   : > { %5299 = vtanh.f32 %v4334_v26  ;;  %v3570_v60 = vadd.f32 %v3506_v33, %v3440_v52  ;;  %v10581_v17 = vrot.slane %v10580_v36, 1  ;;  %v10582_v21 = vrot.slane %v10562_v44, 1 }
 0x2f3   : > { %v2186_v1 = vsel %vm2164_vm1, %v10579_v56, %v10578_v47  ;;  %v2655_v11 = vmul.f32 %v10064_v12, %v8775_v8  ;;  %v4525_v41 = vmul.f32 %v4461_v34, %v4013_v22  ;;  %v4207_v14 = vmul.f32 %v4143_v43, %v8946_v5 }
 0x2f4   : > { %v8974_v32 = vsel %vm8927_vm9, %v2186_v1, 0.0  ;;  %v2441_v51 = vsel %vm2421_vm2, %v10582_v21, %v10581_v17  ;;  %v3760_v53 = vadd.f32 %v3242_v27, %v2914_v49  ;;  %v2851_v62 = vmul.f32 %v5860_v28, %v8788_v61  ;;  %v10584_v61 = vld [vmem:[#allocation123_spill] sm:$0xff] }
 0x2f5   : > { %v8987_v20 = vsel %vm8931_vm10, %v2441_v51, 0.0  ;;  %v2785_v39 = vadd.f32 %v10583_v42, %v2655_v11  ;;  %v2983_v30 = vmul.f32 %v5736_v19, %v8877_v38  ;;  %v3179_v8 = vmul.f32 %v10078_v25, %v8887_v50  ;;  %4767 = vmatmul.f32.gmra.mxu3 %v4525_v41 }
 0x2f6   : > { %v4271_v22 = vadd.f32 %v4207_v14, %v8946_v5  ;;  %v8997_v54 = vadd.f32 %v3760_v53, %v3570_v60  ;;  %v3311_v15 = vmul.f32 %v10229_v59, %v8974_v32  ;;  %v3377_v49 = vmul.f32 %v5725_v13, %v10562_v44  ;;  %v10587_v53 = vld [vmem:[#allocation119_spill] sm:$0xff] }
 0x2f7   : > { %v2915_v55 = vadd.f32 %v2851_v62, %v2785_v39  ;;  %v3113_v45 = vadd.f32 %v10584_v61, %v2983_v30  ;;  %v3507_v46 = vmul.f32 %v8807_v10, %v8987_v20  ;;  %v4727_v26 = vadd.f32 %v4726_v35, %v4613_v63  ;;  %v10593_v61 = vld [vmem:[#allocation126_spill] sm:$0xff] }
 0x2f8   : > { %v4014_v52 = vmul.f32 0.5, %v8903_v6  ;;  %v4335_v33 = vmul.f32 0.7978846, %v4271_v22  ;;  %v4080_v47 = vmul.f32 0.044715, %v8997_v54  ;;  %v3441_v56 = vadd.f32 %v3377_v49, %v3311_v15  ;;  %v5300_v1 = vpop.eup %5299  ;;  %v10592_v49 = vld [vmem:[#allocation133_spill] sm:$0xff] }
 0x2f9   : > { %v3243_v34 = vadd.f32 %v3179_v8, %v3113_v45  ;;  %4814 = vst.msk [vmem:[%s8620_s29 + $0x20] sm:$0xff] %vm268_vm0, %v4727_v26  ;;  %v1194_v43 = vadd.s32 176, %v5712_v4  ;;  %v10585_v27 = vrot.slane %v10569_v29, 7  ;;  %v10586_v60 = vrot.slane %v10551_v58, 7 }
 0x2fa   : > { %v2656_v6 = vmul.f32 %v5745_v23, %v8845_v3  ;;  %v4462_v21 = vadd.f32 1.0, %v5300_v1  ;;  %5301 = vtanh.f32 %v4335_v33  ;;  %v4144_v51 = vmul.f32 %v4080_v47, %v8997_v54 }
 0x2fb   : > { %v2183_v17 = vsel %vm2164_vm1, %v10586_v60, %v10585_v27  ;;  %v3571_v11 = vadd.f32 %v3507_v46, %v3441_v56  ;;  %v3761_v41 = vadd.f32 %v3243_v34, %v2915_v55  ;;  %v1362_v14 = vand.u32 7, %v1194_v43 }
 0x2fc   : > { %v2786_v63 = vadd.f32 %v10587_v53, %v2656_v6  ;;  %v2852_v35 = vmul.f32 %v10314_v37, %v8849_v16  ;;  %v4526_v42 = vmul.f32 %v4462_v21, %v4014_v52  ;;  %v4208_v58 = vmul.f32 %v4144_v51, %v8997_v54 }
 0x2fd   : > { %v2984_v39 = vmul.f32 %v10273_v0, %v8940_v48  ;;  %v3180_v3 = vmul.f32 %v5733_v18, %v8944_v24  ;;  %v9028_v62 = vadd.f32 %v3761_v41, %v3571_v11  ;;  %vm9030_vm11 = vcmp.gt.s32.totalorder %v1362_v14, 0  ;;  %v10596_v11 = vld [vmem:[#allocation138_spill] sm:$0xff] }
 0x2fe   : > { %vm9034_vm12 = vcmp.lt.s32.totalorder %v1362_v14, 7  ;;  %v2916_v16 = vadd.f32 %v2852_v35, %v2786_v63  ;;  %4657 = vmatmul.f32.gmra.mxu2 %v4526_v42  ;;  %v4272_v22 = vadd.f32 %v4208_v58, %v8997_v54  ;;  %v9041_v15 = vsel %vm9030_vm11, %v2183_v17, 0.0  ;;  %v4616_v42 = vpop.f32.mrf.mxu2  ;;  %v4729_v58 = vpop.f32.mrf.mxu3 }
 0x2ff   : > { %v9046_v55 = vsel %vm9034_vm12, %v10592_v49, 0.0  ;;  %v3114_v45 = vadd.f32 %v10593_v61, %v2984_v39  ;;  %v4015_v46 = vmul.f32 0.5, %v8946_v5  ;;  %v4081_v26 = vmul.f32 0.044715, %v9028_v62  ;;  %v10597_v39 = vld [vmem:[#allocation122_spill] sm:$0xff] }
 0x300   : > { %v3312_v52 = vmul.f32 %v10147_v57, %v9041_v15  ;;  %v3378_v33 = vmul.f32 %v5718_v7, %v10569_v29  ;;  %v5302_v47 = vpop.eup %5301  ;;  %v4336_v56 = vmul.f32 0.7978846, %v4272_v22  ;;  %v3508_v34 = vmul.f32 %v8457_v40, %v9046_v55 }
 0x301   : > { %v3244_v1 = vadd.f32 %v3180_v3, %v3114_v45  ;;  %v10594_v43 = vrot.slane %v10580_v36, 7  ;;  %v10595_v27 = vrot.slane %v10562_v44, 7  ;;  %v4463_v60 = vadd.f32 1.0, %v5302_v47  ;;  %v10598_v45 = vld [vmem:[#allocation128_spill] sm:$0xff] }
 0x302   : > { %v4145_v17 = vmul.f32 %v4081_v26, %v9028_v62  ;;  %v3442_v6 = vadd.f32 %v3378_v33, %v3312_v52  ;;  %5303 = vtanh.f32 %v4336_v56  ;;  %v9071_v41 = vsel %vm9034_vm12, %v10596_v11, 0.0 }
 0x303   : > { %v2184_v5 = vsel %vm2164_vm1, %v10595_v27, %v10594_v43  ;;  %v3762_v51 = vadd.f32 %v3244_v1, %v2916_v16  ;;  %v2657_v44 = vmul.f32 %v10064_v12, %v8877_v38  ;;  %v4527_v14 = vmul.f32 %v4463_v60, %v4015_v46 }
 0x304   : > { %v9066_v21 = vsel %vm9030_vm11, %v2184_v5, 0.0  ;;  %v4209_v53 = vmul.f32 %v4145_v17, %v9028_v62  ;;  %v3572_v63 = vadd.f32 %v3508_v34, %v3442_v6  ;;  %v2853_v35 = vmul.f32 %v5860_v28, %v8887_v50  ;;  %v10599_v5 = vld [vmem:[#allocation139_spill] sm:$0xff]  ;;  %v10601_v17 = vld [vmem:[#allocation130_spill] sm:$0xff] }
 0x305   : > { %v2787_v3 = vadd.f32 %v10597_v39, %v2657_v44  ;;  %v2985_v30 = vmul.f32 %v5736_v19, %v8974_v32  ;;  %v3181_v8 = vmul.f32 %v10078_v25, %v8987_v20  ;;  %v3313_v38 = vmul.f32 %v10229_v59, %v9066_v21  ;;  %4770 = vmatmul.f32.gmra.mxu3 %v4527_v14 }
 0x306   : > { %v4273_v16 = vadd.f32 %v4209_v53, %v9028_v62  ;;  %v9086_v22 = vadd.f32 %v3762_v51, %v3572_v63  ;;  %v3379_v50 = vmul.f32 %v5725_v13, %v10580_v36  ;;  %v3509_v49 = vmul.f32 %v8807_v10, %v9071_v41 }
 0x307   : > { %v2917_v61 = vadd.f32 %v2853_v35, %v2787_v3  ;;  %v3115_v46 = vadd.f32 %v10598_v45, %v2985_v30  ;;  %v4730_v26 = vadd.f32 %v4729_v58, %v4616_v42  ;;  %v1195_v52 = vadd.s32 184, %v5712_v4  ;;  %v10607_v42 = vld [vmem:[#allocation12_spill] sm:$0xff] }
 0x308   : > { %v4016_v33 = vmul.f32 0.5, %v8997_v54  ;;  %v4337_v47 = vmul.f32 0.7978846, %v4273_v16  ;;  %v4082_v56 = vmul.f32 0.044715, %v9086_v22  ;;  %v3443_v1 = vadd.f32 %v3379_v50, %v3313_v38  ;;  %v5304_v34 = vpop.eup %5303 }
 0x309   : > { %v3245_v43 = vadd.f32 %v3181_v8, %v3115_v46  ;;  %4815 = vst.msk [vmem:[%s8620_s29 + $0x28] sm:$0xff] %vm268_vm0, %v4730_v26  ;;  %v1369_v27 = vand.u32 7, %v1195_v52  ;;  %v10600_v60 = vrot.slane %v10599_v5, 1  ;;  %v10602_v6 = vrot.slane %v10601_v17, 1 }
 0x30a   : > { %v2658_v11 = vmul.f32 %v5745_v23, %v8940_v48  ;;  %v4464_v54 = vadd.f32 1.0, %v5304_v34  ;;  %5305 = vtanh.f32 %v4337_v47  ;;  %v4146_v44 = vmul.f32 %v4082_v56, %v9086_v22  ;;  %v10608_v48 = vld [vmem:[#allocation132_spill] sm:$0xff]  ;;  %v10609_v47 = vld [vmem:[#allocation134_spill] sm:$0xff]  ;;  %v10610_v56 = vld [vmem:[#allocation137_spill] sm:$0xff] }
 0x30b   : > { %v2436_v51 = vsel %vm2421_vm2, %v10602_v6, %v10600_v60  ;;  %v3573_v14 = vadd.f32 %v3509_v49, %v3443_v1  ;;  %v3763_v53 = vadd.f32 %v3245_v43, %v2917_v61  ;;  %vm9107_vm13 = vcmp.gt.s32.totalorder %v1369_v27, 0  ;;  %v10614_v6 = vld [vmem:[#allocation135_spill] sm:$0xff] }
 0x30c   : > { %vm9111_vm14 = vcmp.lt.s32.totalorder %v1369_v27, 7  ;;  %v2788_v58 = vadd.f32 %v10607_v42, %v2658_v11  ;;  %v4528_v39 = vmul.f32 %v4464_v54, %v4016_v33  ;;  %v4210_v3 = vmul.f32 %v4146_v44, %v9086_v22  ;;  %v10611_v27 = vld [vmem:[#allocation141_spill] sm:$0xff]  ;;  %v10616_v42 = vld [vmem:[#allocation127_spill] sm:$0xff] }
 0x30d   : > { %v2339_v30 = vsel %vm9107_vm13, %v10608_v48, 0.0  ;;  %v2596_v8 = vsel %vm9111_vm14, %v2436_v51, 0.0  ;;  %v9122_v38 = vadd.f32 %v3763_v53, %v3573_v14  ;;  %v2854_v16 = vmul.f32 %v10314_v37, %v8944_v24  ;;  %v4732_v48 = vpop.f32.mrf.mxu3 }
 0x30e   : > { %v2986_v50 = vmul.f32 %v10273_v0, %v9041_v15  ;;  %v3182_v49 = vmul.f32 %v5733_v18, %v9046_v55  ;;  %4660 = vmatmul.f32.gmra.mxu2 %v4528_v39  ;;  %v4017_v61 = vmul.f32 0.5, %v9028_v62  ;;  %v4274_v45 = vadd.f32 %v4210_v3, %v9086_v22  ;;  %v10612_v62 = vld [vmem:[#allocation142_spill] sm:$0xff]  ;;  %v4619_v3 = vpop.f32.mrf.mxu2 }
 0x30f   : > { %v3314_v46 = vmul.f32 %v10147_v57, %v2339_v30  ;;  %v3510_v26 = vmul.f32 %v8457_v40, %v2596_v8  ;;  %v4083_v52 = vmul.f32 0.044715, %v9122_v38  ;;  %v2918_v33 = vadd.f32 %v2854_v16, %v2788_v58 }
 0x310   : > { %v3116_v24 = vadd.f32 %v10609_v47, %v2986_v50  ;;  %v2340_v1 = vsel %vm9107_vm13, %v10610_v56, 0.0  ;;  %v5306_v34 = vpop.eup %5305  ;;  %v4338_v43 = vmul.f32 0.7978846, %v4274_v45  ;;  %v10613_v17 = vrot.slane %v10612_v62, 1 }
 0x311   : > { %v3444_v60 = vadd.f32 %v10611_v27, %v3314_v46  ;;  %v10615_v51 = vrot.slane %v10614_v6, 1  ;;  %v2659_v11 = vmul.f32 %v10064_v12, %v8974_v32  ;;  %v4465_v54 = vadd.f32 1.0, %v5306_v34 }
 0x312   : > { %v4147_v44 = vmul.f32 %v4083_v52, %v9122_v38  ;;  %v3246_v14 = vadd.f32 %v3182_v49, %v3116_v24  ;;  %5307 = vtanh.f32 %v4338_v43  ;;  %v2855_v39 = vmul.f32 %v5860_v28, %v8987_v20 }
 0x313   : > { %v2437_v40 = vsel %vm2421_vm2, %v10615_v51, %v10613_v17  ;;  %v3574_v63 = vadd.f32 %v3510_v26, %v3444_v60  ;;  %v2789_v58 = vadd.f32 %v10616_v42, %v2659_v11  ;;  %v4529_v16 = vmul.f32 %v4465_v54, %v4017_v61  ;;  %v10617_v61 = vld [vmem:[#allocation136_spill] sm:$0xff] }
 0x314   : > { %v2597_v53 = vsel %vm9111_vm14, %v2437_v40, 0.0  ;;  %v4211_v50 = vmul.f32 %v4147_v44, %v9122_v38  ;;  %v3764_v32 = vadd.f32 %v3246_v14, %v2918_v33  ;;  %v2987_v45 = vmul.f32 %v5736_v19, %v9066_v21  ;;  %v10618_v33 = vld [vmem:[#allocation144_spill] sm:$0xff] }
 0x315   : > { %v2919_v49 = vadd.f32 %v2855_v39, %v2789_v58  ;;  %v3183_v35 = vmul.f32 %v10078_v25, %v9071_v41  ;;  %v3315_v46 = vmul.f32 %v10229_v59, %v2340_v1  ;;  %v3511_v26 = vmul.f32 %v8807_v10, %v2597_v53  ;;  %4773 = vmatmul.f32.gmra.mxu3 %v4529_v16 }
 0x316   : > { %v4275_v20 = vadd.f32 %v4211_v50, %v9122_v38  ;;  %v3956_v52 = vadd.f32 %v3764_v32, %v3574_v63  ;;  %v3117_v47 = vadd.f32 %v10617_v61, %v2987_v45  ;;  %v4733_v24 = vadd.f32 %v4732_v48, %v4619_v3  ;;  %v4622_v39 = vpop.f32.mrf.mxu2  ;;  %v4735_v3 = vpop.f32.mrf.mxu3 }
 0x317   : > { %v3445_v56 = vadd.f32 %v10618_v33, %v3315_v46  ;;  %v2660_v34 = vmul.f32 %v5745_v23, %v9041_v15  ;;  %v2726_v43 = vmul.f32 %v10313_v9, %v10569_v29  ;;  %v2856_v27 = vmul.f32 %v10314_v37, %v9046_v55  ;;  %v10619_v55 = vld [vmem:[#allocation140_spill] sm:$0xff] }
 0x318   : > { %v4018_v60 = vmul.f32 0.5, %v9086_v22  ;;  %v4339_v17 = vmul.f32 0.7978846, %v4275_v20  ;;  %v4084_v6 = vmul.f32 0.044715, %v3956_v52  ;;  %v3247_v51 = vadd.f32 %v3183_v35, %v3117_v47  ;;  %4816 = vst.msk [vmem:[%s8620_s29 + $0x30] sm:$0xff] %vm268_vm0, %v4733_v24  ;;  %v5308_v40 = vpop.eup %5307 }
 0x319   : > { %v3575_v11 = vadd.f32 %v3511_v26, %v3445_v56  ;;  %v2790_v54 = vadd.f32 %v2726_v43, %v2660_v34  ;;  %v2988_v44 = vmul.f32 %v10273_v0, %v2339_v30  ;;  %v3184_v15 = vmul.f32 %v5733_v18, %v2596_v8  ;;  %v10620_v20 = vld [vmem:[#allocation143_spill] sm:$0xff] }
 0x31a   : > { %v4466_v14 = vadd.f32 1.0, %v5308_v40  ;;  %5309 = vtanh.f32 %v4339_v17  ;;  %v4148_v9 = vmul.f32 %v4084_v6, %v3956_v52  ;;  %v3765_v29 = vadd.f32 %v3247_v51, %v2919_v49  ;;  %v10624_v17 = vld [vmem:[#allocation118_spill] sm:$0xff] }
 0x31b   : > { %v2920_v63 = vadd.f32 %v2856_v27, %v2790_v54  ;;  %v3118_v42 = vadd.f32 %v10619_v55, %v2988_v44  ;;  %v2661_v22 = vmul.f32 %v10064_v12, %v9066_v21  ;;  %v2727_v58 = vmul.f32 %v5710_v2, %v10580_v36 }
 0x31c   : > { %v4530_v48 = vmul.f32 %v4466_v14, %v4018_v60  ;;  %v4212_v16 = vmul.f32 %v4148_v9, %v3956_v52  ;;  %v3957_v30 = vadd.f32 %v3765_v29, %v3575_v11  ;;  %v2857_v8 = vmul.f32 %v5860_v28, %v9071_v41  ;;  %v10628_v11 = vld [vmem:[#allocation155_spill] sm:$0xff] }
 0x31d   : > { %v3248_v50 = vadd.f32 %v3184_v15, %v3118_v42  ;;  %v2791_v32 = vadd.f32 %v2727_v58, %v2661_v22  ;;  %v2989_v45 = vmul.f32 %v5736_v19, %v2340_v1  ;;  %v3185_v49 = vmul.f32 %v10078_v25, %v2597_v53  ;;  %v10621_v1 = vld [vmem:[#allocation148_spill] sm:$0xff] }
 0x31e   : > { %4663 = vmatmul.f32.gmra.mxu2 %v4530_v48  ;;  %v4019_v21 = vmul.f32 0.5, %v9122_v38  ;;  %v4276_v35 = vadd.f32 %v4212_v16, %v3956_v52  ;;  %v4085_v2 = vmul.f32 0.044715, %v3957_v30  ;;  %v4736_v36 = vadd.f32 %v4735_v3, %v4622_v39  ;;  %v4625_v58 = vpop.f32.mrf.mxu2  ;;  %v10648_v39 = vld [vmem:[#allocation152_spill] sm:$0xff] }
 0x31f   : > { %v3766_v46 = vadd.f32 %v3248_v50, %v2920_v63  ;;  %v2921_v26 = vadd.f32 %v2857_v8, %v2791_v32  ;;  %v3119_v61 = vadd.f32 %v10620_v20, %v2989_v45  ;;  %v1197_v47 = vadd.s32 200, %v5712_v4  ;;  %v10638_v20 = vld [vmem:[#allocation149_spill] sm:$0xff] }
 0x320   : > { %v5310_v41 = vpop.eup %5309  ;;  %v4020_v24 = vmul.f32 0.5, %v3956_v52  ;;  %v4340_v33 = vmul.f32 0.7978846, %v4276_v35  ;;  %v4149_v56 = vmul.f32 %v4085_v2, %v3957_v30  ;;  %4817 = vst.msk [vmem:[%s8620_s29 + $0x38] sm:$0xff] %vm268_vm0, %v4736_v36  ;;  %v10622_v53 = vrot.slane %v10621_v1, 7 }
 0x321   : > { %v10623_v34 = vrot.slane %v10599_v5, 7  ;;  %v4467_v43 = vadd.f32 1.0, %v5310_v41  ;;  %v4086_v27 = vmul.f32 0.044715, %v3766_v46  ;;  %v3249_v60 = vadd.f32 %v3185_v49, %v3119_v61  ;;  %v10637_v49 = vld [vmem:[#allocation145_spill] sm:$0xff] }
 0x322   : > { %v10625_v6 = vand.u32 7, %v10624_v17  ;;  %5311 = vtanh.f32 %v4340_v33  ;;  %v4213_v52 = vmul.f32 %v4149_v56, %v3957_v30  ;;  %v1383_v40 = vand.u32 7, %v1197_v47  ;;  %v9248_v41 = vld [vmem:[%s9811_s2 + $0x10] ss:$0 sm:$0xff]  ;;  %v10642_v17 = vld [vmem:[#allocation159_spill] sm:$0xff] }
 0x323   : > { %v2177_v38 = vsel %vm2164_vm1, %v10623_v34, %v10622_v53  ;;  %v10629_v54 = vrot.slane %v10628_v11, 1  ;;  %v10630_v44 = vrot.slane %v10621_v1, 1  ;;  %v4531_v14 = vmul.f32 %v4467_v43, %v4019_v21  ;;  %v10639_v34 = vld [vmem:[#allocation151_spill] sm:$0xff] }
 0x324   : > { %vm9197_vm15 = vcmp.lt.s32.totalorder %v10625_v6, 7  ;;  %v4150_v9 = vmul.f32 %v4086_v27, %v3766_v46  ;;  %v9207_v29 = vadd.f32 %v3249_v60, %v2921_v26  ;;  %v10632_v55 = vrot.slane %v10599_v5, 1 }
 0x325   : > { %v2432_v15 = vsel %vm2421_vm2, %v10630_v44, %v10629_v54  ;;  %v10631_v63 = vmov %v10630_v44  ;;  %v4277_v22 = vadd.f32 %v4213_v52, %v3957_v30  ;;  %vm9215_vm3 = vcmp.gt.s32.totalorder %v1383_v40, 0  ;;  %4776 = vmatmul.f32.gmra.mxu3 %v4531_v14 }
 0x326   : > { %v2434_v42 = vsel %vm2421_vm2, %v10632_v55, %v10631_v63  ;;  %vm9219_vm4 = vcmp.lt.s32.totalorder %v1383_v40, 7  ;;  %v4021_v48 = vmul.f32 0.5, %v3957_v30  ;;  %v4214_v16 = vmul.f32 %v4150_v9, %v3766_v46 }
 0x327   : > { %v2598_v3 = vsel %vm9197_vm15, %v2434_v42, 0.0  ;;  %v4087_v5 = vmul.f32 0.044715, %v9207_v29  ;;  %v9228_v8 = vsel %vm9215_vm3, %v2177_v38, 0.0  ;;  %v4341_v50 = vmul.f32 0.7978846, %v4277_v22 }
 0x328   : > { %v9230_v32 = vmul.f32 0.5, %v3766_v46  ;;  %v9234_v45 = vsel %vm9219_vm4, %v2432_v15, 0.0  ;;  %v2990_v21 = vmul.f32 %v10273_v0, %v10637_v49  ;;  %v4278_v35 = vadd.f32 %v4214_v16, %v3766_v46  ;;  %v5312_v26 = vpop.eup %5311  ;;  %v10647_v22 = vld [vmem:[#allocation147_spill] sm:$0xff]  ;;  %v4738_v16 = vpop.f32.mrf.mxu3 }
 0x329   : > { %v4151_v30 = vmul.f32 %v4087_v5, %v9207_v29  ;;  %v3186_v2 = vmul.f32 %v5733_v18, %v2598_v3  ;;  %v3318_v36 = vmul.f32 %v10147_v57, %v9228_v8  ;;  %5313 = vtanh.f32 %v4341_v50 }
 0x32a   : > { %v3120_v61 = vadd.f32 %v10638_v20, %v2990_v21  ;;  %v3384_v47 = vmul.f32 %v5718_v7, %v10621_v1  ;;  %v3514_v46 = vmul.f32 %v9248_v41, %v9234_v45  ;;  %v4468_v33 = vadd.f32 1.0, %v5312_v26 }
 0x32b   : > { %v4342_v56 = vmul.f32 0.7978846, %v4278_v35  ;;  %v4215_v53 = vmul.f32 %v4151_v30, %v9207_v29  ;;  %v10640_v38 = vrot.slane %v10639_v34, 7  ;;  %v10641_v43 = vrot.slane %v10612_v62, 7 }
 0x32c   : > { %v3250_v7 = vadd.f32 %v3186_v2, %v3120_v61  ;;  %v3448_v1 = vadd.f32 %v3384_v47, %v3318_v36  ;;  %v10643_v6 = vrot.slane %v10642_v17, 1  ;;  %v10644_v52 = vrot.slane %v10639_v34, 1 }
 0x32d   : > { %v2178_v27 = vsel %vm2164_vm1, %v10641_v43, %v10640_v38  ;;  %v4532_v54 = vmul.f32 %v4468_v33, %v4020_v24  ;;  %5315 = vtanh.f32 %v4342_v56  ;;  %v4279_v44 = vadd.f32 %v4215_v53, %v9207_v29 }
 0x32e   : > { %v9261_v60 = vsel %vm9215_vm3, %v2178_v27, 0.0  ;;  %v2433_v40 = vsel %vm2421_vm2, %v10644_v52, %v10643_v6  ;;  %v10645_v15 = vmov %v10644_v52  ;;  %v10646_v14 = vrot.slane %v10612_v62, 1  ;;  %v10652_v27 = vld [vmem:[#allocation146_spill] sm:$0xff] }
 0x32f   : > { %v3578_v63 = vadd.f32 %v3514_v46, %v3448_v1  ;;  %v9280_v42 = vsel %vm9219_vm4, %v2433_v40, 0.0  ;;  %v2991_v24 = vmul.f32 %v5736_v19, %v10647_v22  ;;  %4666 = vmatmul.f32.gmra.mxu2 %v4532_v54  ;;  %v4343_v5 = vmul.f32 0.7978846, %v4279_v44  ;;  %v5314_v51 = vpop.eup %5313  ;;  %v10657_v44 = vld [vmem:[#allocation167_spill] sm:$0xff] }
 0x330   : > { %v2435_v9 = vsel %vm2421_vm2, %v10646_v14, %v10645_v15  ;;  %v2860_v62 = vmul.f32 %v10314_v37, %v2598_v3  ;;  %v3319_v49 = vmul.f32 %v10229_v59, %v9261_v60  ;;  %v3385_v30 = vmul.f32 %v5725_v13, %v10639_v34  ;;  %v10649_v13 = vld [vmem:[#allocation160_spill] sm:$0xff] }
 0x331   : > { %v2599_v55 = vsel %vm9197_vm15, %v2435_v9, 0.0  ;;  %v9288_v21 = vadd.f32 %v3578_v63, %v3250_v7  ;;  %v3121_v35 = vadd.f32 %v10648_v39, %v2991_v24  ;;  %v3515_v2 = vmul.f32 %v8807_v10, %v9280_v42  ;;  %v10660_v24 = vld [vmem:[#allocation158_spill] sm:$0xff] }
 0x332   : > { %v3187_v50 = vmul.f32 %v10078_v25, %v2599_v55  ;;  %v4469_v36 = vadd.f32 1.0, %v5314_v51  ;;  %5317 = vtanh.f32 %v4343_v5  ;;  %v4739_v3 = vadd.f32 %v4738_v16, %v4625_v58 }
 0x333   : > { %v1198_v26 = vadd.s32 208, %v5712_v4  ;;  %v4088_v20 = vmul.f32 0.044715, %v9288_v21  ;;  %v2861_v61 = vmul.f32 %v5860_v28, %v2599_v55  ;;  %v3449_v46 = vadd.f32 %v3385_v30, %v3319_v49  ;;  %v5316_v33 = vpop.eup %5315 }
 0x334   : > { %v3251_v47 = vadd.f32 %v3187_v50, %v3121_v35  ;;  %v4533_v56 = vmul.f32 %v4469_v36, %v4021_v48  ;;  %4818 = vst.msk [vmem:[%s8620_s29 + $0x40] sm:$0xff] %vm268_vm0, %v4739_v3  ;;  %v10650_v34 = vrot.slane %v10649_v13, 1  ;;  %v10651_v38 = vrot.slane %v10628_v11, 1  ;;  %v10662_v35 = vld [vmem:[#allocation162_spill] sm:$0xff]  ;;  %v10665_v48 = vld [vmem:[#allocation157_spill] sm:$0xff] }
 0x335   : > { %v1390_v53 = vand.u32 7, %v1198_v26  ;;  %v2924_v7 = vadd.f32 %v2860_v62, %v10652_v27  ;;  %v4470_v1 = vadd.f32 1.0, %v5316_v33  ;;  %v4152_v6 = vmul.f32 %v4088_v20, %v9288_v21  ;;  %v10664_v33 = vld [vmem:[#allocation150_spill] sm:$0xff] }
 0x336   : > { %v2430_v43 = vsel %vm2421_vm2, %v10651_v38, %v10650_v34  ;;  %v3579_v52 = vadd.f32 %v3515_v2, %v3449_v46  ;;  %v2992_v40 = vmul.f32 %v10273_v0, %v9228_v8  ;;  %4779 = vmatmul.f32.gmra.mxu3 %v4533_v56  ;;  %v3188_v11 = vmul.f32 %v5733_v18, %v9234_v45  ;;  %v10663_v2 = vld [vmem:[#allocation164_spill] sm:$0xff]  ;;  %v4741_v34 = vpop.f32.mrf.mxu3 }
 0x337   : > { %vm9310_vm1 = vcmp.gt.s32.totalorder %v1390_v53, 0  ;;  %vm9314_vm5 = vcmp.lt.s32.totalorder %v1390_v53, 7  ;;  %v10658_v15 = vrot.slane %v10657_v44, 1  ;;  %v10659_v14 = vrot.slane %v10642_v17, 1  ;;  %v10661_v17 = vld [vmem:[#allocation154_spill] sm:$0xff]  ;;  %v4628_v53 = vpop.f32.mrf.mxu2 }
 0x338   : > { %v4534_v63 = vmul.f32 %v4470_v1, %v9230_v32  ;;  %v4216_v55 = vmul.f32 %v4152_v6, %v9288_v21  ;;  %v3961_v22 = vadd.f32 %v3579_v52, %v3251_v47  ;;  %v9331_v58 = vsel %vm9310_vm1, %v10660_v24, 0.0  ;;  %v5318_v16 = vpop.eup %5317 }
 0x339   : > { %v2431_v9 = vsel %vm2421_vm2, %v10659_v14, %v10658_v15  ;;  %v4023_v5 = vmul.f32 0.5, %v9207_v29  ;;  %v9336_v62 = vsel %vm9314_vm5, %v2430_v43, 0.0  ;;  %v3122_v50 = vadd.f32 %v10661_v17, %v2992_v40  ;;  %v10666_v14 = vld [vmem:[#allocation170_spill] sm:$0xff] }
 0x33a   : > { %v3320_v32 = vmul.f32 %v10147_v57, %v9331_v58  ;;  %4669 = vmatmul.f32.gmra.mxu2 %v4534_v63  ;;  %v4471_v49 = vadd.f32 1.0, %v5318_v16  ;;  %v4280_v51 = vadd.f32 %v4216_v55, %v9288_v21  ;;  %v4089_v39 = vmul.f32 0.044715, %v3961_v22  ;;  %v10667_v63 = vld [vmem:[#allocation176_spill] sm:$0xff] }
 0x33b   : > { %v9345_v30 = vsel %vm9310_vm1, %v10662_v35, 0.0  ;;  %v3252_v29 = vadd.f32 %v3188_v11, %v3122_v50  ;;  %v3516_v3 = vmul.f32 %v9248_v41, %v9336_v62  ;;  %v9352_v26 = vsel %vm9314_vm5, %v2431_v9, 0.0  ;;  %v10670_v35 = vld [vmem:[#allocation153_spill] sm:$0xff] }
 0x33c   : > { %v3450_v36 = vadd.f32 %v10663_v2, %v3320_v32  ;;  %v4535_v20 = vmul.f32 %v4471_v49, %v4023_v5  ;;  %v4344_v47 = vmul.f32 0.7978846, %v4280_v51  ;;  %v4153_v46 = vmul.f32 %v4089_v39, %v3961_v22 }
 0x33d   : > { %v2925_v56 = vadd.f32 %v2861_v61, %v10664_v33  ;;  %v3770_v43 = vadd.f32 %v3252_v29, %v2924_v7  ;;  %v2993_v27 = vmul.f32 %v5736_v19, %v9261_v60  ;;  %v3189_v1 = vmul.f32 %v10078_v25, %v9280_v42 }
 0x33e   : > { %v3580_v38 = vadd.f32 %v3516_v3, %v3450_v36  ;;  %5319 = vtanh.f32 %v4344_v47  ;;  %v4217_v6 = vmul.f32 %v4153_v46, %v3961_v22  ;;  %v3321_v52 = vmul.f32 %v10229_v59, %v9345_v30  ;;  %4782 = vmatmul.f32.gmra.mxu3 %v4535_v20  ;;  %v10675_v20 = vld [vmem:[#allocation165_spill] sm:$0xff] }
 0x33f   : > { %v3517_v40 = vmul.f32 %v8807_v10, %v9352_v26  ;;  %v3123_v7 = vadd.f32 %v10665_v48, %v2993_v27  ;;  %v4742_v54 = vadd.f32 %v4741_v34, %v4628_v53  ;;  %v1199_v11 = vadd.s32 216, %v5712_v4  ;;  %v10676_v48 = vld [vmem:[#allocation174_spill] sm:$0xff] }
 0x340   : > { %v9363_v61 = vadd.f32 %v3770_v43, %v3580_v38  ;;  %v4281_v15 = vadd.f32 %v4217_v6, %v3961_v22  ;;  %v3451_v9 = vadd.f32 %v10666_v14, %v3321_v52  ;;  %v10668_v55 = vrot.slane %v10667_v63, 1  ;;  %v10679_v14 = vld [vmem:[#allocation178_spill] sm:$0xff] }
 0x341   : > { %v10669_v24 = vrot.slane %v10649_v13, 1  ;;  %v2666_v5 = vmul.f32 %v5745_v23, %v9228_v8  ;;  %v4024_v17 = vmul.f32 0.5, %v9288_v21  ;;  %v3253_v32 = vadd.f32 %v3189_v1, %v3123_v7  ;;  %4819 = vst.msk [vmem:[%s8620_s29 + $0x48] sm:$0xff] %vm268_vm0, %v4742_v54 }
 0x342   : > { %v4090_v50 = vmul.f32 0.044715, %v9363_v61  ;;  %v1397_v49 = vand.u32 7, %v1199_v11  ;;  %v4345_v51 = vmul.f32 0.7978846, %v4281_v15  ;;  %v3581_v39 = vadd.f32 %v3517_v40, %v3451_v9  ;;  %v10678_v11 = vld [vmem:[#allocation175_spill] sm:$0xff] }
 0x343   : > { %v2428_v16 = vsel %vm2421_vm2, %v10669_v24, %v10668_v55  ;;  %v2796_v29 = vadd.f32 %v10670_v35, %v2666_v5  ;;  %v2862_v13 = vmul.f32 %v10314_v37, %v9234_v45  ;;  %v3771_v36 = vadd.f32 %v3253_v32, %v2925_v56 }
 0x344   : > { %v4154_v2 = vmul.f32 %v4090_v50, %v9363_v61  ;;  %vm9384_vm6 = vcmp.gt.s32.totalorder %v1397_v49, 0  ;;  %vm9388_vm7 = vcmp.lt.s32.totalorder %v1397_v49, 7  ;;  %v5320_v3 = vpop.eup %5319  ;;  %5321 = vtanh.f32 %v4345_v51 }
 0x345   : > { %v9395_v47 = vsel %vm9384_vm6, %v10675_v20, 0.0  ;;  %v9399_v45 = vsel %vm9388_vm7, %v2428_v16, 0.0  ;;  %v2926_v46 = vadd.f32 %v2862_v13, %v2796_v29  ;;  %v4472_v33 = vadd.f32 1.0, %v5320_v3  ;;  %v4744_v13 = vpop.f32.mrf.mxu3  ;;  %v10683_v3 = vld [vmem:[#allocation169_spill] sm:$0xff] }
 0x346   : > { %v4218_v56 = vmul.f32 %v4154_v2, %v9363_v61  ;;  %v9402_v53 = vadd.f32 %v3771_v36, %v3581_v39  ;;  %v2994_v34 = vmul.f32 %v10273_v0, %v9331_v58  ;;  %v4025_v38 = vmul.f32 0.5, %v3961_v22  ;;  %v10677_v22 = vld [vmem:[#allocation163_spill] sm:$0xff]  ;;  %v10682_v39 = vld [vmem:[#allocation156_spill] sm:$0xff] }
 0x347   : > { %v3190_v43 = vmul.f32 %v5733_v18, %v9336_v62  ;;  %v3322_v27 = vmul.f32 %v10147_v57, %v9395_v47  ;;  %v3518_v1 = vmul.f32 %v9248_v41, %v9399_v45  ;;  %v4536_v6 = vmul.f32 %v4472_v33, %v4024_v17 }
 0x348   : > { %v4282_v52 = vadd.f32 %v4218_v56, %v9363_v61  ;;  %v4091_v40 = vmul.f32 0.044715, %v9402_v53  ;;  %v9417_v7 = vsel %vm9384_vm6, %v10676_v48, 0.0  ;;  %v3124_v54 = vadd.f32 %v10677_v22, %v2994_v34  ;;  %v10685_v22 = vld [vmem:[#allocation186_spill] sm:$0xff] }
 0x349   : > { %v3452_v15 = vadd.f32 %v10678_v11, %v3322_v27  ;;  %v10680_v9 = vrot.slane %v10679_v14, 1  ;;  %v10681_v55 = vrot.slane %v10657_v44, 1  ;;  %v2667_v16 = vmul.f32 %v10064_v12, %v9261_v60  ;;  %4672 = vmatmul.f32.gmra.mxu2 %v4536_v6  ;;  %v4631_v60 = vpop.f32.mrf.mxu2 }
 0x34a   : > { %v4346_v5 = vmul.f32 0.7978846, %v4282_v52  ;;  %v4155_v17 = vmul.f32 %v4091_v40, %v9402_v53  ;;  %v2863_v32 = vmul.f32 %v5860_v28, %v9280_v42  ;;  %v5322_v49 = vpop.eup %5321  ;;  %v3254_v51 = vadd.f32 %v3190_v43, %v3124_v54  ;;  %v10684_v52 = vld [vmem:[#allocation181_spill] sm:$0xff] }
 0x34b   : > { %v2429_v24 = vsel %vm2421_vm2, %v10681_v55, %v10680_v9  ;;  %v3582_v44 = vadd.f32 %v3518_v1, %v3452_v15  ;;  %v2797_v35 = vadd.f32 %v10682_v39, %v2667_v16  ;;  %v2995_v29 = vmul.f32 %v5736_v19, %v9345_v30 }
 0x34c   : > { %v9432_v50 = vsel %vm9388_vm7, %v2429_v24, 0.0  ;;  %v4473_v2 = vadd.f32 1.0, %v5322_v49  ;;  %5323 = vtanh.f32 %v4346_v5  ;;  %v4219_v36 = vmul.f32 %v4155_v17, %v9402_v53 }
 0x34d   : > { %v3191_v8 = vmul.f32 %v10078_v25, %v9352_v26  ;;  %v3772_v21 = vadd.f32 %v3254_v51, %v2926_v46  ;;  %v2927_v42 = vadd.f32 %v2863_v32, %v2797_v35  ;;  %v3125_v20 = vadd.f32 %v10683_v3, %v2995_v29  ;;  %v10688_v32 = vld [vmem:[#allocation161_spill] sm:$0xff] }
 0x34e   : > { %v3323_v33 = vmul.f32 %v10229_v59, %v9417_v7  ;;  %v4537_v56 = vmul.f32 %v4473_v2, %v4025_v38  ;;  %v4283_v34 = vadd.f32 %v4219_v36, %v9402_v53  ;;  %v3519_v43 = vmul.f32 %v8807_v10, %v9432_v50  ;;  %v10691_v35 = vld [vmem:[#allocation173_spill] sm:$0xff] }
 0x34f   : > { %v4745_v27 = vadd.f32 %v4744_v13, %v4631_v60  ;;  %v9448_v1 = vadd.f32 %v3772_v21, %v3582_v44  ;;  %v3255_v6 = vadd.f32 %v3191_v8, %v3125_v20  ;;  %v1200_v46 = vadd.s32 224, %v5712_v4  ;;  %v10692_v8 = vld [vmem:[#allocation180_spill] sm:$0xff]  ;;  %v10693_v20 = vld [vmem:[#allocation183_spill] sm:$0xff] }
 0x350   : > { %v3453_v40 = vadd.f32 %v10684_v52, %v3323_v33  ;;  %4785 = vmatmul.f32.gmra.mxu3 %v4537_v56  ;;  %v4347_v48 = vmul.f32 0.7978846, %v4283_v34  ;;  %v10686_v54 = vrot.slane %v10685_v22, 1  ;;  %v10687_v38 = vrot.slane %v10667_v63, 1  ;;  %v10694_v52 = vld [vmem:[#allocation187_spill] sm:$0xff] }
 0x351   : > { %4820 = vst.msk [vmem:[%s8620_s29 + $0x50] sm:$0xff] %vm268_vm0, %v4745_v27  ;;  %v2668_v10 = vmul.f32 %v5745_v23, %v9331_v58  ;;  %v2864_v15 = vmul.f32 %v10314_v37, %v9336_v62  ;;  %v4026_v9 = vmul.f32 0.5, %v9363_v61  ;;  %v4092_v55 = vmul.f32 0.044715, %v9448_v1 }
 0x352   : > { %v2426_v11 = vsel %vm2421_vm2, %v10687_v38, %v10686_v54  ;;  %v3583_v24 = vadd.f32 %v3519_v43, %v3453_v40  ;;  %v3773_v16 = vadd.f32 %v3255_v6, %v2927_v42  ;;  %v5324_v5 = vpop.eup %5323  ;;  %5325 = vtanh.f32 %v4347_v48 }
 0x353   : > { %v1404_v17 = vand.u32 7, %v1200_v46  ;;  %v2798_v63 = vadd.f32 %v10688_v32, %v2668_v10  ;;  %v2996_v49 = vmul.f32 %v10273_v0, %v9395_v47  ;;  %v4474_v51 = vadd.f32 1.0, %v5324_v5 }
 0x354   : > { %v4156_v58 = vmul.f32 %v4092_v55, %v9448_v1  ;;  %v9470_v44 = vadd.f32 %v3773_v16, %v3583_v24  ;;  %v3192_v62 = vmul.f32 %v5733_v18, %v9399_v45  ;;  %v4027_v13 = vmul.f32 0.5, %v9402_v53 }
 0x355   : > { %vm2000_vm8 = vcmp.gt.s32.totalorder %v1404_v17, 0  ;;  %vm9474_vm9 = vcmp.lt.s32.totalorder %v1404_v17, 7  ;;  %v2928_v39 = vadd.f32 %v2864_v15, %v2798_v63  ;;  %v3126_v29 = vadd.f32 %v10691_v35, %v2996_v49  ;;  %v4634_v17 = vpop.f32.mrf.mxu2 }
 0x356   : > { %v4538_v60 = vmul.f32 %v4474_v51, %v4026_v9  ;;  %v4220_v2 = vmul.f32 %v4156_v58, %v9448_v1  ;;  %v4093_v36 = vmul.f32 0.044715, %v9470_v44  ;;  %v9483_v21 = vsel %vm2000_vm8, %v10692_v8, 0.0  ;;  %v10697_v9 = vld [vmem:[#allocation185_spill] sm:$0xff]  ;;  %v10699_v58 = vld [vmem:[#allocation179_spill] sm:$0xff]  ;;  %v10700_v8 = vld [vmem:[#allocation190_spill] sm:$0xff] }
 0x357   : > { %v9487_v42 = vsel %vm9474_vm9, %v2426_v11, 0.0  ;;  %v3256_v3 = vadd.f32 %v3192_v62, %v3126_v29  ;;  %v9490_v33 = vsel %vm2000_vm8, %v10693_v20, 0.0  ;;  %v3324_v34 = vmul.f32 %v10147_v57, %v9483_v21  ;;  %v10701_v20 = vld [vmem:[#allocation15_spill] sm:$0xff] }
 0x358   : > { %4675 = vmatmul.f32.gmra.mxu2 %v4538_v60  ;;  %v4284_v56 = vadd.f32 %v4220_v2, %v9448_v1  ;;  %v4157_v53 = vmul.f32 %v4093_v36, %v9470_v44  ;;  %v3520_v43 = vmul.f32 %v9248_v41, %v9487_v42  ;;  %v5326_v27 = vpop.eup %5325  ;;  %v10695_v40 = vrot.slane %v10694_v52, 1 }
 0x359   : > { %v3774_v6 = vadd.f32 %v3256_v3, %v2928_v39  ;;  %v10696_v46 = vrot.slane %v10679_v14, 1  ;;  %v2669_v54 = vmul.f32 %v10064_v12, %v9345_v30  ;;  %v2865_v38 = vmul.f32 %v5860_v28, %v9352_v26  ;;  %v10698_v14 = vld [vmem:[#allocation168_spill] sm:$0xff]  ;;  %v4747_v26 = vpop.f32.mrf.mxu3  ;;  %v9526_v39 = vld [vmem:[%s9811_s2 + $0x18] ss:$0 sm:$0xff] }
 0x35a   : > { %v4475_v11 = vadd.f32 1.0, %v5326_v27  ;;  %v4348_v10 = vmul.f32 0.7978846, %v4284_v56  ;;  %v4221_v15 = vmul.f32 %v4157_v53, %v9470_v44  ;;  %v3454_v55 = vadd.f32 %v10697_v9, %v3324_v34 }
 0x35b   : > { %v2427_v48 = vsel %vm2421_vm2, %v10696_v46, %v10695_v40  ;;  %v2799_v16 = vadd.f32 %v10698_v14, %v2669_v54  ;;  %v2997_v5 = vmul.f32 %v5736_v19, %v9417_v7  ;;  %v3193_v30 = vmul.f32 %v10078_v25, %v9432_v50  ;;  %v10704_v54 = vld [vmem:[#allocation172_spill] sm:$0xff]  ;;  %v10709_v14 = vld [vmem:[#allocation191_spill] sm:$0xff] }
 0x35c   : > { %v9512_v24 = vsel %vm9474_vm9, %v2427_v48, 0.0  ;;  %v4539_v32 = vmul.f32 %v4475_v11, %v4027_v13  ;;  %5327 = vtanh.f32 %v4348_v10  ;;  %v4285_v63 = vadd.f32 %v4221_v15, %v9470_v44 }
 0x35d   : > { %v3584_v49 = vadd.f32 %v3520_v43, %v3454_v55  ;;  %v2929_v51 = vadd.f32 %v2865_v38, %v2799_v16  ;;  %v3127_v62 = vadd.f32 %v10699_v58, %v2997_v5  ;;  %v3325_v61 = vmul.f32 %v10229_v59, %v9490_v33 }
 0x35e   : > { %v3521_v35 = vmul.f32 %v9526_v39, %v9512_v24  ;;  %4788 = vmatmul.f32.gmra.mxu3 %v4539_v32  ;;  %v4349_v29 = vmul.f32 0.7978846, %v4285_v63  ;;  %v4748_v13 = vadd.f32 %v4747_v26, %v4634_v17  ;;  %v1201_v2 = vadd.s32 232, %v5712_v4  ;;  %v10710_v17 = vld [vmem:[#allocation184_spill] sm:$0xff]  ;;  %v10716_v4 = vld [vmem:[#allocation177_spill] sm:$0xff] }
 0x35f   : > { %v9530_v60 = vadd.f32 %v3774_v6, %v3584_v49  ;;  %v3257_v36 = vadd.f32 %v3193_v30, %v3127_v62  ;;  %v3455_v3 = vadd.f32 %v10700_v8, %v3325_v61  ;;  %v10702_v56 = vrot.slane %v10701_v20, 1  ;;  %v10712_v8 = vld [vmem:[#allocation195_spill] sm:$0xff] }
 0x360   : > { %v10703_v53 = vrot.slane %v10685_v22, 1  ;;  %v2670_v43 = vmul.f32 %v5745_v23, %v9395_v47  ;;  %v4028_v27 = vmul.f32 0.5, %v9448_v1  ;;  %5329 = vtanh.f32 %v4349_v29  ;;  %4821 = vst.msk [vmem:[%s8620_s29 + $0x58] sm:$0xff] %vm268_vm0, %v4748_v13  ;;  %v10711_v13 = vld [vmem:[#allocation192_spill] sm:$0xff]  ;;  %v10713_v20 = vld [vmem:[#allocation199_spill] sm:$0xff] }
 0x361   : > { %v4094_v6 = vmul.f32 0.044715, %v9530_v60  ;;  %v1411_v40 = vand.u32 7, %v1201_v2  ;;  %v3585_v46 = vadd.f32 %v3521_v35, %v3455_v3  ;;  %v3775_v48 = vadd.f32 %v3257_v36, %v2929_v51 }
 0x362   : > { %v2424_v34 = vsel %vm2421_vm2, %v10703_v53, %v10702_v56  ;;  %v2800_v38 = vadd.f32 %v10704_v54, %v2670_v43  ;;  %v2866_v22 = vmul.f32 %v10314_v37, %v9399_v45  ;;  %v5328_v11 = vpop.eup %5327  ;;  %v2998_v15 = vmul.f32 %v10273_v0, %v9483_v21 }
 0x363   : > { %v4158_v10 = vmul.f32 %v4094_v6, %v9530_v60  ;;  %vm9550_vm10 = vcmp.gt.s32.totalorder %v1411_v40, 0  ;;  %vm9554_vm11 = vcmp.lt.s32.totalorder %v1411_v40, 7  ;;  %v4476_v9 = vadd.f32 1.0, %v5328_v11 }
 0x364   : > { %v9560_v55 = vadd.f32 %v3775_v48, %v3585_v46  ;;  %v9565_v45 = vsel %vm9550_vm10, %v10709_v14, 0.0  ;;  %v9569_v16 = vsel %vm9554_vm11, %v2424_v34, 0.0  ;;  %v2930_v30 = vadd.f32 %v2866_v22, %v2800_v38  ;;  %v4750_v22 = vpop.f32.mrf.mxu3  ;;  %v10717_v14 = vld [vmem:[#allocation189_spill] sm:$0xff] }
 0x365   : > { %v4222_v5 = vmul.f32 %v4158_v10, %v9530_v60  ;;  %v3128_v26 = vadd.f32 %v10710_v17, %v2998_v15  ;;  %v3194_v32 = vmul.f32 %v5733_v18, %v9487_v42  ;;  %v4540_v63 = vmul.f32 %v4476_v9, %v4028_v27  ;;  %v10718_v17 = vld [vmem:[#allocation166_spill] sm:$0xff] }
 0x366   : > { %v4029_v49 = vmul.f32 0.5, %v9470_v44  ;;  %v4095_v51 = vmul.f32 0.044715, %v9560_v55  ;;  %v3326_v58 = vmul.f32 %v10147_v57, %v9565_v45  ;;  %v5330_v62 = vpop.eup %5329  ;;  %v3522_v29 = vmul.f32 %v9248_v41, %v9569_v16 }
 0x367   : > { %v4286_v61 = vadd.f32 %v4222_v5, %v9530_v60  ;;  %v3258_v35 = vadd.f32 %v3194_v32, %v3128_v26  ;;  %v9585_v2 = vsel %vm9550_vm10, %v10711_v13, 0.0  ;;  %4678 = vmatmul.f32.gmra.mxu2 %v4540_v63  ;;  %v4477_v36 = vadd.f32 1.0, %v5330_v62 }
 0x368   : > { %v4159_v44 = vmul.f32 %v4095_v51, %v9560_v55  ;;  %v3456_v3 = vadd.f32 %v10712_v8, %v3326_v58  ;;  %v10714_v56 = vrot.slane %v10713_v20, 1  ;;  %v10715_v53 = vrot.slane %v10694_v52, 1  ;;  %v4637_v52 = vpop.f32.mrf.mxu2  ;;  %v10722_v58 = vld [vmem:[#allocation198_spill] sm:$0xff] }
 0x369   : > { %v4350_v43 = vmul.f32 0.7978846, %v4286_v61  ;;  %v3776_v27 = vadd.f32 %v3258_v35, %v2930_v30  ;;  %v2671_v40 = vmul.f32 %v10064_v12, %v9417_v7  ;;  %v4541_v46 = vmul.f32 %v4477_v36, %v4029_v49  ;;  %v10723_v35 = vld [vmem:[#allocation200_spill] sm:$0xff] }
 0x36a   : > { %v2425_v34 = vsel %vm2421_vm2, %v10715_v53, %v10714_v56  ;;  %v4223_v48 = vmul.f32 %v4159_v44, %v9560_v55  ;;  %v3586_v54 = vadd.f32 %v3522_v29, %v3456_v3  ;;  %v2867_v38 = vmul.f32 %v5860_v28, %v9432_v50  ;;  %v10724_v56 = vld [vmem:[#allocation182_spill] sm:$0xff] }
 0x36b   : > { %v9597_v6 = vsel %vm9554_vm11, %v2425_v34, 0.0  ;;  %5331 = vtanh.f32 %v4350_v43  ;;  %v2801_v11 = vadd.f32 %v10716_v4, %v2671_v40  ;;  %v2999_v10 = vmul.f32 %v5736_v19, %v9490_v33  ;;  %4791 = vmatmul.f32.gmra.mxu3 %v4541_v46  ;;  %v10725_v40 = vld [vmem:[#allocation194_spill] sm:$0xff]  ;;  %v10728_v4 = vld [vmem:[#allocation204_spill] sm:$0xff] }
 0x36c   : > { %v3195_v47 = vmul.f32 %v10078_v25, %v9512_v24  ;;  %v4287_v7 = vadd.f32 %v4223_v48, %v9560_v55  ;;  %v3968_v1 = vadd.f32 %v3776_v27, %v3586_v54  ;;  %v3327_v15 = vmul.f32 %v10229_v59, %v9585_v2  ;;  %v10726_v46 = vld [vmem:[#allocation18_spill] sm:$0xff] }
 0x36d   : > { %v3523_v50 = vmul.f32 %v9526_v39, %v9597_v6  ;;  %v2931_v9 = vadd.f32 %v2867_v38, %v2801_v11  ;;  %v3129_v5 = vadd.f32 %v10717_v14, %v2999_v10  ;;  %v4751_v30 = vadd.f32 %v4750_v22, %v4637_v52  ;;  %v10727_v52 = vld [vmem:[#allocation203_spill] sm:$0xff] }
 0x36e   : > { %v10719_v26 = vand.u32 7, %v10718_v17  ;;  %v4030_v63 = vmul.f32 0.5, %v9530_v60  ;;  %v4351_v49 = vmul.f32 0.7978846, %v4287_v7  ;;  %v4096_v51 = vmul.f32 0.044715, %v3968_v1 }
 0x36f   : > { %v3457_v62 = vadd.f32 %v10722_v58, %v3327_v15  ;;  %v3259_v61 = vadd.f32 %v3195_v47, %v3129_v5  ;;  %4822 = vst.msk [vmem:[%s8620_s29 + $0x60] sm:$0xff] %vm268_vm0, %v4751_v30  ;;  %v2672_v13 = vmul.f32 %v5745_v23, %v9483_v21  ;;  %v2868_v36 = vmul.f32 %v10314_v37, %v9487_v42 }
 0x370   : > { %vm9617_vm2 = vcmp.gt.s32.totalorder %v10719_v26, 0  ;;  %5333 = vtanh.f32 %v4351_v49  ;;  %v4160_v60 = vmul.f32 %v4096_v51, %v3968_v1  ;;  %v3000_v8 = vmul.f32 %v10273_v0, %v9565_v45  ;;  %v10729_v26 = vld [vmem:[#allocation188_spill] sm:$0xff]  ;;  %v4640_v58 = vpop.f32.mrf.mxu2 }
 0x371   : > { %v9628_v29 = vsel %vm9617_vm2, %v10723_v35, 0.0  ;;  %v3587_v44 = vadd.f32 %v3523_v50, %v3457_v62  ;;  %v5332_v3 = vpop.eup %5331  ;;  %v3777_v20 = vadd.f32 %v3259_v61, %v2931_v9  ;;  %v2802_v53 = vadd.f32 %v10724_v56, %v2672_v13  ;;  %v4753_v62 = vpop.f32.mrf.mxu3  ;;  %v10730_v35 = vld [vmem:[#allocation197_spill] sm:$0xff] }
 0x372   : > { %v3196_v34 = vmul.f32 %v5733_v18, %v9569_v16  ;;  %v3328_v43 = vmul.f32 %v10147_v57, %v9628_v29  ;;  %v4478_v21 = vadd.f32 1.0, %v5332_v3  ;;  %v4224_v27 = vmul.f32 %v4160_v60, %v3968_v1 }
 0x373   : > { %v3130_v42 = vadd.f32 %v10725_v40, %v3000_v8  ;;  %v3524_v48 = vmul.f32 %v9248_v41, %v10726_v46  ;;  %v3969_v54 = vadd.f32 %v3777_v20, %v3587_v44  ;;  %v2932_v38 = vadd.f32 %v2868_v36, %v2802_v53  ;;  %v10731_v44 = vld [vmem:[#allocation209_spill] sm:$0xff] }
 0x374   : > { %v3458_v22 = vadd.f32 %v10727_v52, %v3328_v43  ;;  %v9648_v11 = vsel %vm9617_vm2, %v10728_v4, 0.0  ;;  %v4542_v10 = vmul.f32 %v4478_v21, %v4030_v63  ;;  %v4288_v47 = vadd.f32 %v4224_v27, %v3968_v1  ;;  %v10732_v21 = vld [vmem:[#allocation171_spill] sm:$0xff] }
 0x375   : > { %v3260_v7 = vadd.f32 %v3196_v34, %v3130_v42  ;;  %v2673_v57 = vmul.f32 %v10064_v12, %v9490_v33  ;;  %v4031_v15 = vmul.f32 0.5, %v9560_v55  ;;  %v4097_v50 = vmul.f32 0.044715, %v3969_v54 }
 0x376   : > { %v3588_v9 = vadd.f32 %v3524_v48, %v3458_v22  ;;  %v2869_v14 = vmul.f32 %v5860_v28, %v9512_v24  ;;  %v5334_v5 = vpop.eup %5333  ;;  %4681 = vmatmul.f32.gmra.mxu2 %v4542_v10  ;;  %v4352_v30 = vmul.f32 0.7978846, %v4288_v47  ;;  %v3001_v63 = vmul.f32 %v5736_v19, %v9585_v2  ;;  %v10737_v10 = vld [vmem:[#allocation193_spill] sm:$0xff] }
 0x377   : > { %v3778_v17 = vadd.f32 %v3260_v7, %v2932_v38  ;;  %v2803_v32 = vadd.f32 %v10729_v26, %v2673_v57  ;;  %v4479_v49 = vadd.f32 1.0, %v5334_v5  ;;  %v4161_v51 = vmul.f32 %v4097_v50, %v3969_v54 }
 0x378   : > { %v3197_v33 = vmul.f32 %v10078_v25, %v9597_v6  ;;  %v3329_v55 = vmul.f32 %v10229_v59, %v9648_v11  ;;  %5335 = vtanh.f32 %v4352_v30  ;;  %v3131_v13 = vadd.f32 %v10730_v35, %v3001_v63  ;;  %v10738_v30 = vld [vmem:[#allocation202_spill] sm:$0xff] }
 0x379   : > { %v9662_v24 = vadd.f32 %v3778_v17, %v3588_v9  ;;  %v2933_v61 = vadd.f32 %v2869_v14, %v2803_v32  ;;  %v4543_v36 = vmul.f32 %v4479_v49, %v4031_v15  ;;  %v4225_v60 = vmul.f32 %v4161_v51, %v3969_v54  ;;  %v10739_v32 = vld [vmem:[#allocation13_spill] sm:$0xff] }
 0x37a   : > { %v3459_v8 = vadd.f32 %v10731_v44, %v3329_v55  ;;  %v3525_v3 = vmul.f32 %v9526_v39, %v7988_v31  ;;  %v4032_v20 = vmul.f32 0.5, %v3968_v1  ;;  %v3261_v59 = vadd.f32 %v3197_v33, %v3131_v13  ;;  %v10736_v1 = vld [vmem:[#allocation9_spill] sm:$0xff]  ;;  %v10741_v44 = vld [vmem:[#allocation196_spill] sm:$0xff] }
 0x37b   : > { %v4098_v56 = vmul.f32 0.044715, %v9662_v24  ;;  %v4754_v53 = vadd.f32 %v4753_v62, %v4640_v58  ;;  %4794 = vmatmul.f32.gmra.mxu3 %v4543_v36  ;;  %v4289_v34 = vadd.f32 %v4225_v60, %v3969_v54  ;;  %v10733_v27 = vand.u32 7, %v10732_v21  ;;  %v10740_v49 = vld [vmem:[#allocation17_spill] sm:$0xff]  ;;  %v4643_v58 = vpop.f32.mrf.mxu2  ;;  %v4756_v62 = vpop.f32.mrf.mxu3 }
 0x37c   : > { %v3589_v43 = vadd.f32 %v3525_v3, %v3459_v8  ;;  %v2674_v42 = vmul.f32 %v5745_v23, %v9565_v45  ;;  %v3779_v38 = vadd.f32 %v3261_v59, %v2933_v61  ;;  %v2870_v22 = vmul.f32 %v10314_v37, %v9569_v16 }
 0x37d   : > { %vm9671_vm12 = vcmp.lt.s32.totalorder %v10733_v27, 7  ;;  %v4162_v48 = vmul.f32 %v4098_v56, %v9662_v24  ;;  %4823 = vst.msk [vmem:[%s8620_s29 + $0x68] sm:$0xff] %vm268_vm0, %v4754_v53  ;;  %v4353_v4 = vmul.f32 0.7978846, %v4289_v34  ;;  %v3002_v7 = vmul.f32 %v10273_v0, %v9628_v29 }
 0x37e   : > { %v2612_v52 = vsel %vm9671_vm12, %v10736_v1, 0.0  ;;  %v2804_v47 = vadd.f32 %v10737_v10, %v2674_v42  ;;  %v3198_v45 = vmul.f32 %v5733_v18, %v10726_v46  ;;  %v5336_v57 = vpop.eup %5335  ;;  %v4033_v15 = vmul.f32 0.5, %v3969_v54 }
 0x37f   : > { %v4226_v50 = vmul.f32 %v4162_v48, %v9662_v24  ;;  %v9691_v9 = vadd.f32 %v3779_v38, %v3589_v43  ;;  %v3526_v14 = vmul.f32 %v9248_v41, %v2612_v52  ;;  %v4480_v5 = vadd.f32 1.0, %v5336_v57  ;;  %v10743_v43 = vld [vmem:[#allocation23_spill] sm:$0xff]  ;;  %v10744_v48 = vld [vmem:[#allocation201_spill] sm:$0xff] }
 0x380   : > { %5337 = vtanh.f32 %v4353_v4  ;;  %v2934_v16 = vadd.f32 %v2870_v22, %v2804_v47  ;;  %v3132_v17 = vadd.f32 %v10738_v30, %v3002_v7  ;;  %v2613_v54 = vsel %vm9671_vm12, %v10740_v49, 0.0  ;;  %v10746_v57 = vld [vmem:[#allocation207_spill] sm:$0xff] }
 0x381   : > { %v4290_v26 = vadd.f32 %v4226_v50, %v9662_v24  ;;  %v4099_v0 = vmul.f32 0.044715, %v9691_v9  ;;  %v3590_v63 = vadd.f32 %v3526_v14, %v10739_v32  ;;  %v4544_v51 = vmul.f32 %v4480_v5, %v4032_v20  ;;  %v10742_v20 = vld [vmem:[#allocation208_spill] sm:$0xff] }
 0x382   : > { %v3262_v33 = vadd.f32 %v3198_v45, %v3132_v17  ;;  %v2675_v41 = vmul.f32 %v10064_v12, %v9585_v2  ;;  %v2871_v55 = vmul.f32 %v5860_v28, %v9597_v6  ;;  %v3003_v13 = vmul.f32 %v5736_v19, %v9648_v11 }
 0x383   : > { %v4354_v61 = vmul.f32 0.7978846, %v4290_v26  ;;  %v4163_v35 = vmul.f32 %v4099_v0, %v9691_v9  ;;  %v3199_v36 = vmul.f32 %v10078_v25, %v7988_v31  ;;  %4684 = vmatmul.f32.gmra.mxu2 %v4544_v51  ;;  %v3527_v2 = vmul.f32 %v9526_v39, %v2613_v54  ;;  %v4646_v14 = vpop.f32.mrf.mxu2  ;;  %v4759_v5 = vpop.f32.mrf.mxu3  ;;  %v10747_v0 = vld [vmem:[#allocation14_spill] sm:$0xff] }
 0x384   : > { %v3780_v60 = vadd.f32 %v3262_v33, %v2934_v16  ;;  %v2805_v8 = vadd.f32 %v10741_v44, %v2675_v41  ;;  %v4757_v3 = vadd.f32 %v4756_v62, %v4643_v58  ;;  %v3133_v56 = vadd.f32 %v10742_v20, %v3003_v13 }
 0x385   : > { %5339 = vtanh.f32 %v4354_v61  ;;  %v4227_v6 = vmul.f32 %v4163_v35, %v9691_v9  ;;  %v2676_v59 = vmul.f32 %v5745_v23, %v9628_v29  ;;  %v3591_v21 = vadd.f32 %v3527_v2, %v10743_v43 }
 0x386   : > { %v5338_v53 = vpop.eup %5337  ;;  %v9716_v19 = vadd.f32 %v3780_v60, %v3590_v63  ;;  %v2935_v34 = vadd.f32 %v2871_v55, %v2805_v8  ;;  %4824 = vst.msk [vmem:[%s8620_s29 + $0x70] sm:$0xff] %vm268_vm0, %v4757_v3  ;;  %v2872_v39 = vmul.f32 %v10314_v37, %v10726_v46  ;;  %v3263_v42 = vadd.f32 %v3199_v36, %v3133_v56  ;;  %v10745_v46 = vld [vmem:[#allocation31_spill] sm:$0xff] }
 0x387   : > { %v4481_v27 = vadd.f32 1.0, %v5338_v53  ;;  %v4291_v40 = vadd.f32 %v4227_v6, %v9691_v9  ;;  %v2806_v38 = vadd.f32 %v10744_v48, %v2676_v59  ;;  %v4034_v1 = vmul.f32 0.5, %v9662_v24 }
 0x388   : > { %v4100_v23 = vmul.f32 0.044715, %v9716_v19  ;;  %v3200_v29 = vmul.f32 %v5733_v18, %v2612_v52  ;;  %v2677_v22 = vmul.f32 %v10064_v12, %v9648_v11  ;;  %v3781_v47 = vadd.f32 %v3263_v42, %v2935_v34 }
 0x389   : > { %v4545_v4 = vmul.f32 %v4481_v27, %v4033_v15  ;;  %v4355_v10 = vmul.f32 0.7978846, %v4291_v40  ;;  %v2936_v7 = vadd.f32 %v2872_v39, %v2806_v38  ;;  %v2873_v24 = vmul.f32 %v5860_v28, %v7988_v31 }
 0x38a   : > { %v4164_v37 = vmul.f32 %v4100_v23, %v9716_v19  ;;  %v3264_v45 = vadd.f32 %v3200_v29, %v10745_v46  ;;  %v2807_v50 = vadd.f32 %v10746_v57, %v2677_v22  ;;  %v3973_v12 = vadd.f32 %v3781_v47, %v3591_v21 }
 0x38b   : > { %v5340_v18 = vpop.eup %5339  ;;  %4797 = vmatmul.f32.gmra.mxu3 %v4545_v4  ;;  %5341 = vtanh.f32 %v4355_v10  ;;  %v3201_v11 = vmul.f32 %v10078_v25, %v2613_v54  ;;  %v4760_v52 = vadd.f32 %v4759_v5, %v4646_v14  ;;  %v4035_v58 = vmul.f32 0.5, %v9691_v9  ;;  %v4649_v35 = vpop.f32.mrf.mxu2 }
 0x38c   : > { %v4482_v15 = vadd.f32 1.0, %v5340_v18  ;;  %v4228_v16 = vmul.f32 %v4164_v37, %v9716_v19  ;;  %v3782_v30 = vadd.f32 %v3264_v45, %v2936_v7  ;;  %v2937_v17 = vadd.f32 %v2873_v24, %v2807_v50  ;;  %v4762_v13 = vpop.f32.mrf.mxu3 }
 0x38d   : > { %v4101_v26 = vmul.f32 0.044715, %v3973_v12  ;;  %v3265_v32 = vadd.f32 %v3201_v11, %v10747_v0  ;;  %4825 = vst.msk [vmem:[%s8620_s29 + $0x78] sm:$0xff] %vm268_vm0, %v4760_v52  ;;  %v4763_v44 = vadd.f32 %v4762_v13, %v4649_v35  ;;  %v4036_v59 = vmul.f32 0.5, %v9716_v19 }
 0x38e   : > { %v4546_v28 = vmul.f32 %v4482_v15, %v4034_v1  ;;  %v4292_v31 = vadd.f32 %v4228_v16, %v9716_v19  ;;  %v4102_v63 = vmul.f32 0.044715, %v3782_v30  ;;  %v4037_v48 = vmul.f32 0.5, %v3973_v12 }
 0x38f   : > { %v4165_v49 = vmul.f32 %v4101_v26, %v3973_v12  ;;  %v3783_v51 = vadd.f32 %v3265_v32, %v2937_v17  ;;  %4826 = vst.msk [vmem:[%s8620_s29 + $0x80] sm:$0xff] %vm268_vm0, %v4763_v44  ;;  %v4038_v19 = vmul.f32 0.5, %v3782_v30 }
 0x390   : > { %4687 = vmatmul.f32.gmra.mxu2 %v4546_v28  ;;  %v4356_v33 = vmul.f32 0.7978846, %v4292_v31  ;;  %v4166_v25 = vmul.f32 %v4102_v63, %v3782_v30 }
 0x391   : > { %v5342_v54 = vpop.eup %5341  ;;  %v4229_v41 = vmul.f32 %v4165_v49, %v3973_v12  ;;  %v4103_v55 = vmul.f32 0.044715, %v3783_v51  ;;  %v4039_v37 = vmul.f32 0.5, %v3783_v51 }
 0x392   : > { %v4483_v62 = vadd.f32 1.0, %v5342_v54  ;;  %5343 = vtanh.f32 %v4356_v33  ;;  %v4230_v61 = vmul.f32 %v4166_v25, %v3782_v30 }
 0x393   : > { %v4293_v36 = vadd.f32 %v4229_v41, %v3973_v12  ;;  %v4167_v60 = vmul.f32 %v4103_v55, %v3783_v51  ;;  %v4652_v43 = vpop.f32.mrf.mxu2 }
 0x394   : > { %v4547_v8 = vmul.f32 %v4483_v62, %v4035_v58  ;;  %v4294_v2 = vadd.f32 %v4230_v61, %v3782_v30  ;;  %v4765_v21 = vpop.f32.mrf.mxu3 }
 0x395   : > { %v4357_v3 = vmul.f32 0.7978846, %v4293_v36  ;;  %v4231_v6 = vmul.f32 %v4167_v60, %v3783_v51  ;;  %v4766_v27 = vadd.f32 %v4765_v21, %v4652_v43 }
 0x396   : > { %4800 = vmatmul.f32.gmra.mxu3 %v4547_v8  ;;  %v4358_v20 = vmul.f32 0.7978846, %v4294_v2 }
 0x397   : > { %5345 = vtanh.f32 %v4357_v3  ;;  %v4295_v56 = vadd.f32 %v4231_v6, %v3783_v51  ;;  %4827 = vst.msk [vmem:[%s8620_s29 + $0x88] sm:$0xff] %vm268_vm0, %v4766_v27 }
 0x398   : > { %v5344_v9 = vpop.eup %5343  ;;  %5347 = vtanh.f32 %v4358_v20 }
 0x399   : > { %v4484_v53 = vadd.f32 1.0, %v5344_v9  ;;  %v4359_v34 = vmul.f32 0.7978846, %v4295_v56 }
 0x39b   : > { %v4548_v39 = vmul.f32 %v4484_v53, %v4036_v59  ;;  %5349 = vtanh.f32 %v4359_v34  ;;  %v4655_v22 = vpop.f32.mrf.mxu2 }
 0x39c   : > { %v4768_v4 = vpop.f32.mrf.mxu3 }
 0x39d   : > { %v5346_v40 = vpop.eup %5345  ;;  %4690 = vmatmul.f32.gmra.mxu2 %v4548_v39  ;;  %v4769_v47 = vadd.f32 %v4768_v4, %v4655_v22 }
 0x39e   : > { %v5348_v42 = vpop.eup %5347  ;;  %v4485_v38 = vadd.f32 1.0, %v5346_v40 }
 0x39f   : > { %v4486_v1 = vadd.f32 1.0, %v5348_v42  ;;  %4828 = vst.msk [vmem:[%s8620_s29 + $0x90] sm:$0xff] %vm268_vm0, %v4769_v47 }
 0x3a0   : > { %v4549_v23 = vmul.f32 %v4485_v38, %v4037_v48 }
 0x3a1   : > { %v5350_v29 = vpop.eup %5349  ;;  %v4550_v10 = vmul.f32 %v4486_v1, %v4038_v19 }
 0x3a2   : > { %4803 = vmatmul.f32.gmra.mxu3 %v4549_v23  ;;  %v4487_v7 = vadd.f32 1.0, %v5350_v29 }
 0x3a3   : > { %v4658_v45 = vpop.f32.mrf.mxu2 }
 0x3a4   : > { %v4551_v46 = vmul.f32 %v4487_v7, %v4039_v37  ;;  %v4771_v57 = vpop.f32.mrf.mxu3 }
 0x3a5   : > { %4693 = vmatmul.f32.gmra.mxu2 %v4550_v10  ;;  %v4772_v50 = vadd.f32 %v4771_v57, %v4658_v45 }
 0x3a7   : > { %4829 = vst.msk [vmem:[%s8620_s29 + $0x98] sm:$0xff] %vm268_vm0, %v4772_v50 }
 0x3aa   : > { %4806 = vmatmul.f32.gmra.mxu3 %v4551_v46 }
 0x3ab   : > { %v4661_v24 = vpop.f32.mrf.mxu2 }
 0x3ac   : > { %v4774_v14 = vpop.f32.mrf.mxu3 }
 0x3ad   : > { %v4775_v5 = vadd.f32 %v4774_v14, %v4661_v24 }
 0x3af   : > { %4830 = vst.msk [vmem:[%s8620_s29 + $0xa0] sm:$0xff] %vm268_vm0, %v4775_v5 }
 0x3b3   : > { %v4664_v18 = vpop.f32.mrf.mxu2 }
 0x3b4   : > { %v4777_v12 = vpop.f32.mrf.mxu3 }
 0x3b5   : > { %v4778_v11 = vadd.f32 %v4777_v12, %v4664_v18 }
 0x3b7   : > { %4831 = vst.msk [vmem:[%s8620_s29 + $0xa8] sm:$0xff] %vm268_vm0, %v4778_v11 }
 0x3bb   : > { %v4667_v52 = vpop.f32.mrf.mxu2 }
 0x3bc   : > { %v4780_v15 = vpop.f32.mrf.mxu3 }
 0x3bd   : > { %v4781_v16 = vadd.f32 %v4780_v15, %v4667_v52 }
 0x3bf   : > { %4832 = vst.msk [vmem:[%s8620_s29 + $0xb0] sm:$0xff] %vm268_vm0, %v4781_v16 }
 0x3c3   : > { %v4670_v30 = vpop.f32.mrf.mxu2 }
 0x3c4   : > { %v4783_v17 = vpop.f32.mrf.mxu3 }
 0x3c5   : > { %v4784_v26 = vadd.f32 %v4783_v17, %v4670_v30 }
 0x3c7   : > { %4833 = vst.msk [vmem:[%s8620_s29 + $0xb8] sm:$0xff] %vm268_vm0, %v4784_v26 }
 0x3cc   : > { %v4673_v0 = vpop.f32.mrf.mxu2 }
 0x3d3   : > { %v4786_v32 = vpop.f32.mrf.mxu3 }
 0x3d4   : > { %v4787_v28 = vadd.f32 %v4786_v32, %v4673_v0 }
 0x3d6   : > { %4834 = vst.msk [vmem:[%s8620_s29 + $0xc0] sm:$0xff] %vm268_vm0, %v4787_v28 }
 0x3db   : > { %v4676_v31 = vpop.f32.mrf.mxu2 }
 0x3e1   : > { %v4789_v63 = vpop.f32.mrf.mxu3 }
 0x3e2   : > { %v4790_v49 = vadd.f32 %v4789_v63, %v4676_v31 }
 0x3e4   : > { %4835 = vst.msk [vmem:[%s8620_s29 + $0xc8] sm:$0xff] %vm268_vm0, %v4790_v49 }
 0x3ea   : > { %v4679_v51 = vpop.f32.mrf.mxu2 }
 0x3ee   : > { %v4792_v33 = vpop.f32.mrf.mxu3 }
 0x3ef   : > { %v4793_v25 = vadd.f32 %v4792_v33, %v4679_v51 }
 0x3f1   : > { %4836 = vst.msk [vmem:[%s8620_s29 + $0xd0] sm:$0xff] %vm268_vm0, %v4793_v25 }
 0x3f9   : > { %v4682_v54 = vpop.f32.mrf.mxu2 }
 0x3fe   : > { %v4795_v41 = vpop.f32.mrf.mxu3 }
 0x3ff   : > { %v4796_v55 = vadd.f32 %v4795_v41, %v4682_v54 }
 0x401   : > { %4837 = vst.msk [vmem:[%s8620_s29 + $0xd8] sm:$0xff] %vm268_vm0, %v4796_v55 }
 0x406   : > { %v4685_v58 = vpop.f32.mrf.mxu2 }
 0x40e   : > { %v4798_v62 = vpop.f32.mrf.mxu3 }
 0x40f   : > { %v4799_v61 = vadd.f32 %v4798_v62, %v4685_v58 }
 0x411   : > { %4838 = vst.msk [vmem:[%s8620_s29 + $0xe0] sm:$0xff] %vm268_vm0, %v4799_v61 }
 0x413   : > { %v4688_v35 = vpop.f32.mrf.mxu2 }
 0x419   : > { %v4801_v13 = vpop.f32.mrf.mxu3 }
 0x41a   : > { %v4802_v36 = vadd.f32 %v4801_v13, %v4688_v35 }
 0x41c   : > { %4839 = vst.msk [vmem:[%s8620_s29 + $0xe8] sm:$0xff] %vm268_vm0, %v4802_v36 }
 0x420   : > { %v4691_v60 = vpop.f32.mrf.mxu2 }
 0x425   : > { %v4804_v44 = vpop.f32.mrf.mxu3 }
 0x426   : > { %v4805_v8 = vadd.f32 %v4804_v44, %v4691_v60 }
 0x428   : > { %4840 = vst.msk [vmem:[%s8620_s29 + $0xf0] sm:$0xff] %vm268_vm0, %v4805_v8  ;;  %v4694_v2 = vpop.f32.mrf.mxu2 }
 0x42d   : > { %v4807_v3 = vpop.f32.mrf.mxu3 }
 0x42e   : > { %v4808_v6 = vadd.f32 %v4807_v3, %v4694_v2 }
 0x430   : > { %4841 = vst.msk [vmem:[%s8620_s29 + $0xf8] sm:$0xff] %vm268_vm0, %v4808_v6 }
 0x431   : > { %5416 = shalt.err (!%p5413_p4)
}
 0x432   : > { %s5459_s7 = smov 128   ;;  %s5460_s29 = smov 8  }
 0x433   : > { %5045 = dma.vmem_to_hbm [thread:$0]  (%p5536_p11), %s4856_s23, 4096, %s4858_s25, %s4843_s26, %s5459_s7, %s5459_s7, %s5460_s29  }
 0x434 PF: > { %s4872_s9 = sand.u32 1, %s5443_s15   ;;  %p10748_p7 = scmp.ge.s32.totalorder %s5455_s18, 2 }
 0x435   : > { %s4873_s11 = scalar_lea.sflag [#allocation4], %s4872_s9 }
 0x436   : > { %p5052_p5 = pnand %p10748_p7, %p5540_p12 }
 0x438   : > { %p5053_p8 = pneg %p5052_p5 }
 0x43a   : > { %5438 = dma.done.wait (%p5053_p8), %s4873_s11, 4096  }
 0x43b   : > { %5440 = vsyncadd (%p5053_p8), %s4873_s11, 4294963200  ;;  %p17_p10 = scmp.ge.s32.totalorder %s5511_s21, 4   ;;  %s10749_s15 = smov %s5447_s16 }
 0x43c   : > { %s10750_s16 = smov %s5451_s17  ;;  %s10751_s17 = smov %s5523_s24 }
 0x43d   : > { %s10752_s18 = smov %s5511_s21  ;;  %19 = sbr.rel (!%p17_p10) target bundleno = 5 (0x5), region = 81 }
 0x442   :  { %4879 = vsyncpa [#allocation3], 1 }
 0x443   :  { %4881 = vsyncpa [#allocation3 + $0x1], 1 }
 0x444   :  { %4882 = vsyncpa [#allocation4], 1 }
 0x445   :  { %4884 = vsyncpa [#allocation4 + $0x1], 1 }

</bundles_post_ra>
